<compile_context>
chip_gen: v7x
topology: tpu7x:2x2x1
jax: 0.10.0
libtpu: 0.0.40
codegen_flags: <defaults>
</compile_context>

<pallas_src>
import jax
import jax.numpy as jnp
from jax.experimental import pallas as pl
from jax.experimental.pallas import tpu as pltpu

LATENT_DIM = 100
IMAGE_SIZE = 28 * 28          # 784
HIDDEN = (256, 512, 1024)

# Lane-aligned (multiple-of-128) padded dims.
LATENT_PAD = 128              # 100 -> 128
IMAGE_PAD = 896               # 784 -> 896 = 7 * 128


def _round_up(v, m):
    return ((v + m - 1) // m) * m


# ----------------------------------------------------------------------------
# Kernel
# ----------------------------------------------------------------------------
def generator_kernel(x_ref,
                     w1_ref, b1_ref,
                     w2_ref, b2_ref,
                     w3_ref, b3_ref,
                     w4_ref, b4_ref,
                     out_ref):
    # Layer 1: Linear(128pad -> 256) + ReLU   (bf16 x bf16 -> f32 accumulate)
    h = jnp.dot(x_ref[...], w1_ref[...], preferred_element_type=jnp.float32)
    h = jnp.maximum(h + b1_ref[...], 0.0)
    # Layer 2: Linear(256 -> 512) + ReLU
    h = jnp.dot(h.astype(jnp.bfloat16), w2_ref[...],
                preferred_element_type=jnp.float32)
    h = jnp.maximum(h + b2_ref[...], 0.0)
    # Layer 3: Linear(512 -> 1024) + ReLU
    h = jnp.dot(h.astype(jnp.bfloat16), w3_ref[...],
                preferred_element_type=jnp.float32)
    h = jnp.maximum(h + b3_ref[...], 0.0)
    # Layer 4: Linear(1024 -> 896pad) + Tanh
    h = jnp.dot(h.astype(jnp.bfloat16), w4_ref[...],
                preferred_element_type=jnp.float32)
    out_ref[...] = jnp.tanh(h + b4_ref[...]).astype(out_ref.dtype)


# ----------------------------------------------------------------------------
# One-time parameter preparation (do this at init, not per forward call)
# ----------------------------------------------------------------------------
def prepare_params(params):
    """Cast weights to bf16 and zero-pad to lane-aligned shapes ONCE.

    params: list of (W (in,out) f32, b (1,out) f32) matching the nn.Linear's.
    Returns a flat tuple consumed directly by `generator_forward`.
    """
    (w1, b1), (w2, b2), (w3, b3), (w4, b4) = params
    w1p = jnp.zeros((LATENT_PAD, HIDDEN[0]), jnp.bfloat16)
    w1p = w1p.at[:LATENT_DIM, :].set(w1.astype(jnp.bfloat16))
    w2p = w2.astype(jnp.bfloat16)
    w3p = w3.astype(jnp.bfloat16)
    w4p = jnp.zeros((HIDDEN[2], IMAGE_PAD), jnp.bfloat16)
    w4p = w4p.at[:, :IMAGE_SIZE].set(w4.astype(jnp.bfloat16))
    b4p = jnp.zeros((1, IMAGE_PAD), jnp.float32).at[:, :IMAGE_SIZE].set(b4)
    return (w1p, b1.astype(jnp.float32), w2p, b2.astype(jnp.float32),
            w3p, b3.astype(jnp.float32), w4p, b4p)


def _choose_tile(batch, block_batch):
    # bf16 LHS: round the batch tile to a multiple of 16 (native (16,128) tile).
    tm = min(block_batch, _round_up(batch, 16))
    b_pad = _round_up(batch, tm)
    # Guarantee >= 2 grid steps when there is enough work, so v7x's two
    # TensorCores both get grid steps under dimension_semantics=("parallel",).
    if b_pad // tm < 2 and batch >= 32:
        tm = _round_up(pl.cdiv(b_pad, 2), 16)
        b_pad = _round_up(batch, tm)
    return tm, b_pad


# ----------------------------------------------------------------------------
# Forward wrapper
# ----------------------------------------------------------------------------
def generator_forward(x, prepared, *, block_batch=256,
                      out_dtype=jnp.float32, trim_output=True):
    """x: (B, LATENT_DIM) f32; prepared: output of prepare_params().

    out_dtype=bf16 / trim_output=False halve writeback & skip the pad-removal
    copy at large batch; defaults keep the PyTorch module's f32 (B, 784) output.
    """
    batch = x.shape[0]
    w1p, b1, w2p, b2, w3p, b3, w4p, b4p = prepared

    tm, b_pad = _choose_tile(batch, block_batch)
    grid = (b_pad // tm,)

    # Pad batch to the tile multiple and latent dim to 128; activations bf16.
    xp = jnp.zeros((b_pad, LATENT_PAD), jnp.bfloat16)
    xp = xp.at[:batch, :LATENT_DIM].set(x.astype(jnp.bfloat16))

    def resident(arr):
        # Constant block index -> DMA'd once, stays VMEM-resident across steps.
        return pl.BlockSpec(arr.shape, lambda i: (0, 0))

    in_specs = [
        pl.BlockSpec((tm, LATENT_PAD), lambda i: (i, 0)),   # x tile
        resident(w1p), resident(b1),
        resident(w2p), resident(b2),
        resident(w3p), resident(b3),
        resident(w4p), resident(b4p),
    ]
    out_specs = pl.BlockSpec((tm, IMAGE_PAD), lambda i: (i, 0))

    weight_bytes = sum(int(a.size) * a.dtype.itemsize
                       for a in (w1p, w2p, w3p, w4p, b1, b2, b3, b4p))
    out_itemsize = jnp.dtype(out_dtype).itemsize
    io_bytes = int(xp.size) * 2 + b_pad * IMAGE_PAD * out_itemsize
    flops = 2 * b_pad * (LATENT_PAD * HIDDEN[0] + HIDDEN[0] * HIDDEN[1]
                         + HIDDEN[1] * HIDDEN[2] + HIDDEN[2] * IMAGE_PAD)
    cost = pl.CostEstimate(flops=flops,
                           transcendentals=b_pad * IMAGE_PAD,
                           bytes_accessed=weight_bytes + io_bytes)

    out = pl.pallas_call(
        generator_kernel,
        out_shape=jax.ShapeDtypeStruct((b_pad, IMAGE_PAD), out_dtype),
        grid=grid,
        in_specs=in_specs,
        out_specs=out_specs,
        compiler_params=pltpu.CompilerParams(
            dimension_semantics=("parallel",),   # v7x: shard batch over 2 TCs
            vmem_limit_bytes=32 << 20,           # fits v7x's 64 MiB VMEM
        ),
        cost_estimate=cost,
    )(xp, w1p, b1, w2p, b2, w3p, b3, w4p, b4p)

    if trim_output:
        return out[:batch, :IMAGE_SIZE]
    return out


# ----------------------------------------------------------------------------
# Init & references
# ----------------------------------------------------------------------------
def init_params(key):
    """Deterministic init mirroring the nn.Linear shapes of the module."""
    dims = (LATENT_DIM,) + HIDDEN + (IMAGE_SIZE,)
    params = []
    for i in range(len(dims) - 1):
        fan_in, fan_out = dims[i], dims[i + 1]
        key, kw, kb = jax.random.split(key, 3)
        bound = 1.0 / jnp.sqrt(fan_in)
        w = jax.random.uniform(kw, (fan_in, fan_out), jnp.float32, -bound, bound)
        b = jax.random.uniform(kb, (1, fan_out), jnp.float32, -bound, bound)
        params.append((w, b))
    return params


def reference_forward_f32(x, params):
    h = x
    for i, (w, b) in enumerate(params):
        h = h @ w + b
        h = jnp.maximum(h, 0.0) if i < len(params) - 1 else jnp.tanh(h)
    return h


def reference_forward_bf16(x, params):
    """Same bf16-weight / f32-accumulate recipe as the kernel."""
    h = x.astype(jnp.bfloat16)
    for i, (w, b) in enumerate(params):
        h = jnp.dot(h, w.astype(jnp.bfloat16),
                    preferred_element_type=jnp.float32) + b
        if i < len(params) - 1:
            h = jnp.maximum(h, 0.0).astype(jnp.bfloat16)
        else:
            h = jnp.tanh(h)
    return h


if __name__ == "__main__":
    key = jax.random.PRNGKey(0)
    key, kx = jax.random.split(key)

    batch = 8
    x = jax.random.normal(kx, (batch, LATENT_DIM), dtype=jnp.float32)
    params = init_params(key)

    # One-time weight prep (bf16 cast + padding) -- NOT on the per-call path.
    prepared = jax.block_until_ready(prepare_params(params))

    fwd = jax.jit(lambda z: generator_forward(z, prepared))
    out = jax.block_until_ready(fwd(x))
    assert out.shape == (batch, IMAGE_SIZE)
    assert out.dtype == jnp.float32

    ref_bf16 = reference_forward_bf16(x, params)
    ref_f32 = reference_forward_f32(x, params)
    assert jnp.allclose(out, ref_bf16, atol=2e-3, rtol=2e-3), (
        float(jnp.max(jnp.abs(out - ref_bf16))))
    # bf16 weights vs the f32 module: loose sanity check (GAN-generator scale).
    assert jnp.allclose(out, ref_f32, atol=5e-2, rtol=5e-2), (
        float(jnp.max(jnp.abs(out - ref_f32))))

    # Exercise the >=2-grid-step path (v7x megacore sharding) as well.
    batch2 = 64
    x2 = jax.random.normal(kx, (batch2, LATENT_DIM), dtype=jnp.float32)
    out2 = jax.block_until_ready(generator_forward(x2, prepared))
    assert out2.shape == (batch2, IMAGE_SIZE)
    assert jnp.allclose(out2, reference_forward_bf16(x2, params),
                        atol=2e-3, rtol=2e-3)

    print("KERNEL_OK")
</pallas_src>

<mosaic_0001>
module attributes {stable_mosaic.version = 11 : i64} {
  func.func @generator_kernel(%arg0: i32, %arg1: memref<16x128xbf16, #tpu.memory_space<vmem>>, %arg2: memref<128x256xbf16, #tpu.memory_space<vmem>>, %arg3: memref<1x256xf32, #tpu.memory_space<vmem>>, %arg4: memref<256x512xbf16, #tpu.memory_space<vmem>>, %arg5: memref<1x512xf32, #tpu.memory_space<vmem>>, %arg6: memref<512x1024xbf16, #tpu.memory_space<vmem>>, %arg7: memref<1x1024xf32, #tpu.memory_space<vmem>>, %arg8: memref<1024x896xbf16, #tpu.memory_space<vmem>>, %arg9: memref<1x896xf32, #tpu.memory_space<vmem>>, %arg10: memref<16x896xf32, #tpu.memory_space<vmem>>) attributes {dimension_semantics = [#tpu.dimension_semantics<parallel>], iteration_bounds = array<i64: 1>, scalar_prefetch = 0 : i64, scratch_operands = 0 : i64, tpu.core_type = #tpu.core_type<tc>, window_params = [{transform_indices = @transform_0, window_bounds = array<i64: 16, 128>}, {pipeline_mode = #tpu.pipeline_mode<synchronous>, transform_indices = @transform_1, window_bounds = array<i64: 128, 256>}, {pipeline_mode = #tpu.pipeline_mode<synchronous>, transform_indices = @transform_2, window_bounds = array<i64: 1, 256>}, {pipeline_mode = #tpu.pipeline_mode<synchronous>, transform_indices = @transform_3, window_bounds = array<i64: 256, 512>}, {pipeline_mode = #tpu.pipeline_mode<synchronous>, transform_indices = @transform_4, window_bounds = array<i64: 1, 512>}, {pipeline_mode = #tpu.pipeline_mode<synchronous>, transform_indices = @transform_5, window_bounds = array<i64: 512, 1024>}, {pipeline_mode = #tpu.pipeline_mode<synchronous>, transform_indices = @transform_6, window_bounds = array<i64: 1, 1024>}, {pipeline_mode = #tpu.pipeline_mode<synchronous>, transform_indices = @transform_7, window_bounds = array<i64: 1024, 896>}, {pipeline_mode = #tpu.pipeline_mode<synchronous>, transform_indices = @transform_8, window_bounds = array<i64: 1, 896>}, {transform_indices = @transform_9, window_bounds = array<i64: 16, 896>}]} {
    %c0 = arith.constant 0 : index
    %c0_0 = arith.constant 0 : index
    %0 = vector.load %arg1[%c0, %c0_0] : memref<16x128xbf16, #tpu.memory_space<vmem>>, vector<16x128xbf16>
    %c0_1 = arith.constant 0 : index
    %c0_2 = arith.constant 0 : index
    %1 = vector.load %arg2[%c0_1, %c0_2] : memref<128x256xbf16, #tpu.memory_space<vmem>>, vector<128x256xbf16>
    %cst = arith.constant dense<0.000000e+00> : vector<16x256xf32>
    %2 = tpu.matmul %0, %1, %cst {dimension_numbers = #tpu.dot_dimension_numbers<[1], [0], [0], [1], [0, 0, 1, 1], [], []>} : vector<16x128xbf16>, vector<128x256xbf16>, vector<16x256xf32> -> vector<16x256xf32>
    %c0_3 = arith.constant 0 : index
    %c0_4 = arith.constant 0 : index
    %3 = vector.load %arg3[%c0_3, %c0_4] : memref<1x256xf32, #tpu.memory_space<vmem>>, vector<1x256xf32>
    %4 = vector.broadcast %3 : vector<1x256xf32> to vector<16x256xf32>
    %5 = arith.addf %2, %4 : vector<16x256xf32>
    %cst_5 = arith.constant 0.000000e+00 : f32
    %6 = vector.broadcast %cst_5 : f32 to vector<16x256xf32>
    %7 = arith.maximumf %5, %6 : vector<16x256xf32>
    %8 = arith.truncf %7 : vector<16x256xf32> to vector<16x256xbf16>
    %c0_6 = arith.constant 0 : index
    %c0_7 = arith.constant 0 : index
    %9 = vector.load %arg4[%c0_6, %c0_7] : memref<256x512xbf16, #tpu.memory_space<vmem>>, vector<256x512xbf16>
    %cst_8 = arith.constant dense<0.000000e+00> : vector<16x512xf32>
    %10 = tpu.matmul %8, %9, %cst_8 {dimension_numbers = #tpu.dot_dimension_numbers<[1], [0], [0], [1], [0, 0, 1, 1], [], []>} : vector<16x256xbf16>, vector<256x512xbf16>, vector<16x512xf32> -> vector<16x512xf32>
    %c0_9 = arith.constant 0 : index
    %c0_10 = arith.constant 0 : index
    %11 = vector.load %arg5[%c0_9, %c0_10] : memref<1x512xf32, #tpu.memory_space<vmem>>, vector<1x512xf32>
    %12 = vector.broadcast %11 : vector<1x512xf32> to vector<16x512xf32>
    %13 = arith.addf %10, %12 : vector<16x512xf32>
    %cst_11 = arith.constant 0.000000e+00 : f32
    %14 = vector.broadcast %cst_11 : f32 to vector<16x512xf32>
    %15 = arith.maximumf %13, %14 : vector<16x512xf32>
    %16 = arith.truncf %15 : vector<16x512xf32> to vector<16x512xbf16>
    %c0_12 = arith.constant 0 : index
    %c0_13 = arith.constant 0 : index
    %17 = vector.load %arg6[%c0_12, %c0_13] : memref<512x1024xbf16, #tpu.memory_space<vmem>>, vector<512x1024xbf16>
    %cst_14 = arith.constant dense<0.000000e+00> : vector<16x1024xf32>
    %18 = tpu.matmul %16, %17, %cst_14 {dimension_numbers = #tpu.dot_dimension_numbers<[1], [0], [0], [1], [0, 0, 1, 1], [], []>} : vector<16x512xbf16>, vector<512x1024xbf16>, vector<16x1024xf32> -> vector<16x1024xf32>
    %c0_15 = arith.constant 0 : index
    %c0_16 = arith.constant 0 : index
    %19 = vector.load %arg7[%c0_15, %c0_16] : memref<1x1024xf32, #tpu.memory_space<vmem>>, vector<1x1024xf32>
    %20 = vector.broadcast %19 : vector<1x1024xf32> to vector<16x1024xf32>
    %21 = arith.addf %18, %20 : vector<16x1024xf32>
    %cst_17 = arith.constant 0.000000e+00 : f32
    %22 = vector.broadcast %cst_17 : f32 to vector<16x1024xf32>
    %23 = arith.maximumf %21, %22 : vector<16x1024xf32>
    %24 = arith.truncf %23 : vector<16x1024xf32> to vector<16x1024xbf16>
    %c0_18 = arith.constant 0 : index
    %c0_19 = arith.constant 0 : index
    %25 = vector.load %arg8[%c0_18, %c0_19] : memref<1024x896xbf16, #tpu.memory_space<vmem>>, vector<1024x896xbf16>
    %cst_20 = arith.constant dense<0.000000e+00> : vector<16x896xf32>
    %26 = tpu.matmul %24, %25, %cst_20 {dimension_numbers = #tpu.dot_dimension_numbers<[1], [0], [0], [1], [0, 0, 1, 1], [], []>} : vector<16x1024xbf16>, vector<1024x896xbf16>, vector<16x896xf32> -> vector<16x896xf32>
    %c0_21 = arith.constant 0 : index
    %c0_22 = arith.constant 0 : index
    %27 = vector.load %arg9[%c0_21, %c0_22] : memref<1x896xf32, #tpu.memory_space<vmem>>, vector<1x896xf32>
    %28 = vector.broadcast %27 : vector<1x896xf32> to vector<16x896xf32>
    %29 = arith.addf %26, %28 : vector<16x896xf32>
    %30 = math.tanh %29 : vector<16x896xf32>
    %c0_23 = arith.constant 0 : index
    %c0_24 = arith.constant 0 : index
    %31 = vector.load %arg10[%c0_23, %c0_24] : memref<16x896xf32, #tpu.memory_space<vmem>>, vector<16x896xf32>
    tpu.vector_store %arg10[%c0_23, %c0_24], %30 {strides = array<i32>} : memref<16x896xf32, #tpu.memory_space<vmem>>, vector<16x896xf32>,
    return
  }
  func.func @transform_0(%arg0: i32) -> (i32, i32) {
    %c0_i32 = arith.constant 0 : i32
    %c0_i32_0 = arith.constant 0 : i32
    return %arg0, %c0_i32 : i32, i32
  }
  func.func @transform_1(%arg0: i32) -> (i32, i32) {
    %c0_i32 = arith.constant 0 : i32
    %c0_i32_0 = arith.constant 0 : i32
    %c0_i32_1 = arith.constant 0 : i32
    return %c0_i32, %c0_i32_0 : i32, i32
  }
  func.func @transform_2(%arg0: i32) -> (i32, i32) {
    %c0_i32 = arith.constant 0 : i32
    %c0_i32_0 = arith.constant 0 : i32
    %c0_i32_1 = arith.constant 0 : i32
    return %c0_i32, %c0_i32_0 : i32, i32
  }
  func.func @transform_3(%arg0: i32) -> (i32, i32) {
    %c0_i32 = arith.constant 0 : i32
    %c0_i32_0 = arith.constant 0 : i32
    %c0_i32_1 = arith.constant 0 : i32
    return %c0_i32, %c0_i32_0 : i32, i32
  }
  func.func @transform_4(%arg0: i32) -> (i32, i32) {
    %c0_i32 = arith.constant 0 : i32
    %c0_i32_0 = arith.constant 0 : i32
    %c0_i32_1 = arith.constant 0 : i32
    return %c0_i32, %c0_i32_0 : i32, i32
  }
  func.func @transform_5(%arg0: i32) -> (i32, i32) {
    %c0_i32 = arith.constant 0 : i32
    %c0_i32_0 = arith.constant 0 : i32
    %c0_i32_1 = arith.constant 0 : i32
    return %c0_i32, %c0_i32_0 : i32, i32
  }
  func.func @transform_6(%arg0: i32) -> (i32, i32) {
    %c0_i32 = arith.constant 0 : i32
    %c0_i32_0 = arith.constant 0 : i32
    %c0_i32_1 = arith.constant 0 : i32
    return %c0_i32, %c0_i32_0 : i32, i32
  }
  func.func @transform_7(%arg0: i32) -> (i32, i32) {
    %c0_i32 = arith.constant 0 : i32
    %c0_i32_0 = arith.constant 0 : i32
    %c0_i32_1 = arith.constant 0 : i32
    return %c0_i32, %c0_i32_0 : i32, i32
  }
  func.func @transform_8(%arg0: i32) -> (i32, i32) {
    %c0_i32 = arith.constant 0 : i32
    %c0_i32_0 = arith.constant 0 : i32
    %c0_i32_1 = arith.constant 0 : i32
    return %c0_i32, %c0_i32_0 : i32, i32
  }
  func.func @transform_9(%arg0: i32) -> (i32, i32) {
    %c0_i32 = arith.constant 0 : i32
    %c0_i32_0 = arith.constant 0 : i32
    return %arg0, %c0_i32 : i32, i32
  }
}

</mosaic_0001>

<bundles_post_ra>
// kernel: _lambda_.1
= control target key start
LH: loop header
LB: loop body
LE: loop exit
PB: predicated region body
PF: predicated region fallthrough
CT: control target
= control target key end

     0   :  { %v7956_v1 = vmov 0   ;;  %s10583_s1 = inlined_call_operand.vmem [shape: bf16[128,256], index: 1, kind: input, shape index: {}]   ;;  %s10584_s0 = inlined_call_operand.vmem [shape: bf16[16,128], index: 0, kind: input, shape index: {}]   ;;  %s10585_s3 = inlined_call_operand.vmem [shape: bf16[256,512], index: 3, kind: input, shape index: {}]   ;;  %s10586_s5 = inlined_call_operand.vmem [shape: bf16[512,1024], index: 5, kind: input, shape index: {}]   ;;  %s10587_s2 = inlined_call_operand.vmem [shape: f32[1,256], index: 2, kind: input, shape index: {}]   ;;  %s10588_s4 = inlined_call_operand.vmem [shape: f32[1,512], index: 4, kind: input, shape index: {}]   ;;  %s10589_s7 = inlined_call_operand.vmem [shape: bf16[1024,896], index: 7, kind: input, shape index: {}]   ;;  %s10590_s6 = inlined_call_operand.vmem [shape: f32[1,1024], index: 6, kind: input, shape index: {}]   ;;  %s10591_s8 = inlined_call_operand.vmem [shape: f32[1,896], index: 8, kind: input, shape index: {}]   ;;  %s10592_s9 = inlined_call_operand.vmem [shape: f32[16,896], index: 9, kind: output, shape index: {}]  }
   0x1   :  { %v7167_v0 = vld [vmem:[%s10583_s1 + $0x4] ss:$8 sps:$4 sm:$0xff]   ;;  %181 = vmatprep.mubr.bf16.mxu0 %v7956_v1  ;;  %v7169_v2 = vld [vmem:[%s10583_s1] ss:$8 sps:$4 sm:$0xff]   ;;  %v7170_v3 = vld [vmem:[%s10583_s1 + $0x14] ss:$8 sps:$4 sm:$0xff]  }
   0x2   :  { %149 = vmatprep.subr.bf16.mxu0 %v7167_v0  ;;  %v7172_v4 = vld [vmem:[%s10583_s1 + $0x10] ss:$8 sps:$4 sm:$0xff]   ;;  %v7173_v5 = vld [vmem:[%s10583_s1 + $0x24] ss:$8 sps:$4 sm:$0xff]   ;;  %v7175_v6 = vld [vmem:[%s10583_s1 + $0x20] ss:$8 sps:$4 sm:$0xff]  }
   0x3   :  { %150 = vmatpush1.bf16.msra.mxu0 %v7169_v2  ;;  %v7176_v7 = vld [vmem:[%s10583_s1 + $0x34] ss:$8 sps:$4 sm:$0xff]   ;;  %v7178_v8 = vld [vmem:[%s10583_s1 + $0x30] ss:$8 sps:$4 sm:$0xff]   ;;  %v7179_v9 = vld [vmem:[%s10583_s1 + $0x44] ss:$8 sps:$4 sm:$0xff]  }
   0x4   :  { %151 = vmatprep.subr.bf16.mxu0 %v7170_v3  ;;  %v7181_v10 = vld [vmem:[%s10583_s1 + $0x40] ss:$8 sps:$4 sm:$0xff]   ;;  %v7182_v11 = vld [vmem:[%s10583_s1 + $0x54] ss:$8 sps:$4 sm:$0xff]   ;;  %v7184_v12 = vld [vmem:[%s10583_s1 + $0x50] ss:$8 sps:$4 sm:$0xff]  }
   0x5   :  { %v7185_v13 = vld [vmem:[%s10583_s1 + $0x64] ss:$8 sps:$4 sm:$0xff]   ;;  %v7187_v14 = vld [vmem:[%s10583_s1 + $0x60] ss:$8 sps:$4 sm:$0xff]   ;;  %v7188_v15 = vld [vmem:[%s10583_s1 + $0x74] ss:$8 sps:$4 sm:$0xff]  }
   0x6   :  { %v7190_v16 = vld [vmem:[%s10583_s1 + $0x70] ss:$8 sps:$4 sm:$0xff]   ;;  %v7194_v17 = vld [vmem:[%s10585_s3 + $0x4] ss:$16 sps:$4 sm:$0xff]   ;;  %v7242_v50 = vld [vmem:[%s10585_s3 + $0xc] ss:$16 sps:$4 sm:$0xff]  }
   0x7   :  { %152 = vmatpush1.bf16.msra.mxu0 %v7172_v4  ;;  %v7191_v18 = vld [vmem:[%s10584_s0] sm:$0xff]  }
   0x8   :  { %153 = vmatprep.subr.bf16.mxu0 %v7173_v5  ;;  %v7192_v19 = vld [vmem:[%s10585_s3] ss:$16 sps:$4 sm:$0xff]   ;;  %v7197_v20 = vld [vmem:[%s10585_s3 + $0x24] ss:$16 sps:$4 sm:$0xff]  }
   0x9   :  { %v7195_v21 = vld [vmem:[%s10585_s3 + $0x20] ss:$16 sps:$4 sm:$0xff]   ;;  %v7200_v22 = vld [vmem:[%s10585_s3 + $0x44] ss:$16 sps:$4 sm:$0xff]  }
   0xa   :  { %v7198_v23 = vld [vmem:[%s10585_s3 + $0x40] ss:$16 sps:$4 sm:$0xff]   ;;  %v7203_v24 = vld [vmem:[%s10585_s3 + $0x64] ss:$16 sps:$4 sm:$0xff]  }
   0xb   :  { %154 = vmatpush1.bf16.msra.mxu0 %v7175_v6  ;;  %v7201_v25 = vld [vmem:[%s10585_s3 + $0x60] ss:$16 sps:$4 sm:$0xff]   ;;  %v7206_v26 = vld [vmem:[%s10585_s3 + $0x84] ss:$16 sps:$4 sm:$0xff]  }
   0xc   :  { %155 = vmatprep.subr.bf16.mxu0 %v7176_v7  ;;  %v7204_v27 = vld [vmem:[%s10585_s3 + $0x80] ss:$16 sps:$4 sm:$0xff]   ;;  %v7209_v28 = vld [vmem:[%s10585_s3 + $0xa4] ss:$16 sps:$4 sm:$0xff]  }
   0xd   :  { %v7207_v29 = vld [vmem:[%s10585_s3 + $0xa0] ss:$16 sps:$4 sm:$0xff]   ;;  %v7212_v30 = vld [vmem:[%s10585_s3 + $0xc4] ss:$16 sps:$4 sm:$0xff]  }
   0xe   :  { %v7210_v31 = vld [vmem:[%s10585_s3 + $0xc0] ss:$16 sps:$4 sm:$0xff]   ;;  %v7215_v32 = vld [vmem:[%s10585_s3 + $0xe4] ss:$16 sps:$4 sm:$0xff]  }
   0xf   :  { %156 = vmatpush1.bf16.msra.mxu0 %v7178_v8  ;;  %v7213_v33 = vld [vmem:[%s10585_s3 + $0xe0] ss:$16 sps:$4 sm:$0xff]   ;;  %v7218_v34 = vld [vmem:[%s10585_s3 + $0x104] ss:$16 sps:$4 sm:$0xff]  }
  0x10   :  { %157 = vmatprep.subr.bf16.mxu0 %v7179_v9  ;;  %v7216_v35 = vld [vmem:[%s10585_s3 + $0x100] ss:$16 sps:$4 sm:$0xff]   ;;  %v7221_v36 = vld [vmem:[%s10585_s3 + $0x124] ss:$16 sps:$4 sm:$0xff]  }
  0x11   :  { %v7219_v37 = vld [vmem:[%s10585_s3 + $0x120] ss:$16 sps:$4 sm:$0xff]   ;;  %v7224_v38 = vld [vmem:[%s10585_s3 + $0x144] ss:$16 sps:$4 sm:$0xff]  }
  0x12   :  { %v7222_v39 = vld [vmem:[%s10585_s3 + $0x140] ss:$16 sps:$4 sm:$0xff]   ;;  %v7227_v40 = vld [vmem:[%s10585_s3 + $0x164] ss:$16 sps:$4 sm:$0xff]  }
  0x13   :  { %158 = vmatpush1.bf16.msra.mxu0 %v7181_v10  ;;  %v7225_v41 = vld [vmem:[%s10585_s3 + $0x160] ss:$16 sps:$4 sm:$0xff]   ;;  %v7230_v42 = vld [vmem:[%s10585_s3 + $0x184] ss:$16 sps:$4 sm:$0xff]  }
  0x14   :  { %159 = vmatprep.subr.bf16.mxu0 %v7182_v11  ;;  %v7228_v43 = vld [vmem:[%s10585_s3 + $0x180] ss:$16 sps:$4 sm:$0xff]   ;;  %v7233_v44 = vld [vmem:[%s10585_s3 + $0x1a4] ss:$16 sps:$4 sm:$0xff]  }
  0x15   :  { %v7231_v45 = vld [vmem:[%s10585_s3 + $0x1a0] ss:$16 sps:$4 sm:$0xff]   ;;  %v7236_v46 = vld [vmem:[%s10585_s3 + $0x1c4] ss:$16 sps:$4 sm:$0xff]  }
  0x16   :  { %v7234_v47 = vld [vmem:[%s10585_s3 + $0x1c0] ss:$16 sps:$4 sm:$0xff]   ;;  %v7239_v48 = vld [vmem:[%s10585_s3 + $0x1e4] ss:$16 sps:$4 sm:$0xff]  }
  0x17   :  { %160 = vmatpush1.bf16.msra.mxu0 %v7184_v12  ;;  %v7237_v49 = vld [vmem:[%s10585_s3 + $0x1e0] ss:$16 sps:$4 sm:$0xff]  }
  0x18   :  { %161 = vmatprep.subr.bf16.mxu0 %v7185_v13  ;;  %v702_v51 = vld [vmem:[%s10586_s5] sm:$0xff] }
  0x19   :  { %v706_v52 = vld [vmem:[%s10586_s5 + $0x20] sm:$0xff] }
  0x1a   :  { %v6295_v53 = vcombine.high %v702_v51, %v706_v52  ;;  %v6294_v54 = vcombine.low %v702_v51, %v706_v52  ;;  %v710_v55 = vld [vmem:[%s10586_s5 + $0x40] sm:$0xff] }
  0x1b   :  { %162 = vmatpush1.bf16.msra.mxu0 %v7187_v14  ;;  %v714_v56 = vld [vmem:[%s10586_s5 + $0x60] sm:$0xff] }
  0x1c   :  { %163 = vmatprep.subr.bf16.mxu0 %v7188_v15  ;;  %v6303_v57 = vcombine.high %v710_v55, %v714_v56  ;;  %2280 = vmatprep.subr.bf16.mxu1 %v6295_v53  ;;  %v6302_v58 = vcombine.low %v710_v55, %v714_v56  ;;  %v718_v59 = vld [vmem:[%s10586_s5 + $0x80] sm:$0xff] }
  0x1d   :  { %2281 = vmatpush1.bf16.msra.mxu1 %v6294_v54  ;;  %v722_v60 = vld [vmem:[%s10586_s5 + $0xa0] sm:$0xff] }
  0x1e   :  { %2282 = vmatprep.subr.bf16.mxu1 %v6303_v57  ;;  %v6311_v61 = vcombine.high %v718_v59, %v722_v60  ;;  %v6310_v62 = vcombine.low %v718_v59, %v722_v60  ;;  %v726_v63 = vld [vmem:[%s10586_s5 + $0xc0] sm:$0xff] }
  0x1f   :  { %164 = vmatpush1.bf16.msra.mxu0 %v7190_v16  ;;  %v730_v0 = vld [vmem:[%s10586_s5 + $0xe0] sm:$0xff] }
  0x20   :  { %604 = vmatprep.subr.bf16.mxu0 %v7194_v17  ;;  %v6319_v1 = vcombine.high %v726_v63, %v730_v0  ;;  %v6318_v2 = vcombine.low %v726_v63, %v730_v0  ;;  %v734_v3 = vld [vmem:[%s10586_s5 + $0x100] sm:$0xff]  ;;  %v7240_v0 = vld [vmem:[%s10585_s3 + $0x8] ss:$16 sps:$4 sm:$0xff]  }
  0x21   :  { %2283 = vmatpush1.bf16.msra.mxu1 %v6302_v58  ;;  %v738_v4 = vld [vmem:[%s10586_s5 + $0x120] sm:$0xff] }
  0x22   :  { %182 = vmatmul.mubr.bf16.vlgmr.msra.gmra.mrb[0].mxu0 %v7191_v18  ;;  %2284 = vmatprep.subr.bf16.mxu1 %v6311_v61  ;;  %v6327_v5 = vcombine.high %v734_v3, %v738_v4  ;;  %v6326_v6 = vcombine.low %v734_v3, %v738_v4  ;;  %v742_v7 = vld [vmem:[%s10586_s5 + $0x140] sm:$0xff]  ;;  %v7248_v3 = vld [vmem:[%s10585_s3 + $0x4c] ss:$16 sps:$4 sm:$0xff]   ;;  %v7246_v4 = vld [vmem:[%s10585_s3 + $0x48] ss:$16 sps:$4 sm:$0xff]  }
  0x23   :  { %605 = vmatpush1.bf16.msra.mxu0 %v7192_v19  ;;  %v746_v8 = vld [vmem:[%s10586_s5 + $0x160] sm:$0xff] }
  0x24   :  { %606 = vmatprep.subr.bf16.mxu0 %v7197_v20  ;;  %v6335_v9 = vcombine.high %v742_v7, %v746_v8  ;;  %v6334_v10 = vcombine.low %v742_v7, %v746_v8  ;;  %v750_v11 = vld [vmem:[%s10586_s5 + $0x180] sm:$0xff]  ;;  %v7254_v7 = vld [vmem:[%s10585_s3 + $0x8c] ss:$16 sps:$4 sm:$0xff]   ;;  %v7252_v8 = vld [vmem:[%s10585_s3 + $0x88] ss:$16 sps:$4 sm:$0xff]  }
  0x25   :  { %2285 = vmatpush1.bf16.msra.mxu1 %v6310_v62  ;;  %v754_v12 = vld [vmem:[%s10586_s5 + $0x1a0] sm:$0xff] }
  0x26   :  { %2286 = vmatprep.subr.bf16.mxu1 %v6319_v1  ;;  %v6343_v13 = vcombine.high %v750_v11, %v754_v12  ;;  %v6342_v14 = vcombine.low %v750_v11, %v754_v12  ;;  %v758_v15 = vld [vmem:[%s10586_s5 + $0x1c0] sm:$0xff]  ;;  %v7245_v1 = vld [vmem:[%s10585_s3 + $0x2c] ss:$16 sps:$4 sm:$0xff]   ;;  %v7258_v12 = vld [vmem:[%s10585_s3 + $0xc8] ss:$16 sps:$4 sm:$0xff]  }
  0x27   :  { %607 = vmatpush1.bf16.msra.mxu0 %v7195_v21  ;;  %v762_v16 = vld [vmem:[%s10586_s5 + $0x1e0] sm:$0xff]  ;;  %v7260_v11 = vld [vmem:[%s10585_s3 + $0xcc] ss:$16 sps:$4 sm:$0xff]  }
  0x28   :  { %608 = vmatprep.subr.bf16.mxu0 %v7200_v22  ;;  %v6351_v17 = vcombine.high %v758_v15, %v762_v16  ;;  %v6350_v18 = vcombine.low %v758_v15, %v762_v16  ;;  %v766_v19 = vld [vmem:[%s10586_s5 + $0x200] sm:$0xff]  ;;  %v7266_v15 = vld [vmem:[%s10585_s3 + $0x10c] ss:$16 sps:$4 sm:$0xff]   ;;  %v7264_v16 = vld [vmem:[%s10585_s3 + $0x108] ss:$16 sps:$4 sm:$0xff]  }
  0x29   :  { %2287 = vmatpush1.bf16.msra.mxu1 %v6318_v2  ;;  %v770_v20 = vld [vmem:[%s10586_s5 + $0x220] sm:$0xff]  ;;  %v7243_v2 = vld [vmem:[%s10585_s3 + $0x28] ss:$16 sps:$4 sm:$0xff]  }
  0x2a   :  { %2288 = vmatprep.subr.bf16.mxu1 %v6327_v5  ;;  %v6359_v21 = vcombine.high %v766_v19, %v770_v20  ;;  %v6358_v22 = vcombine.low %v766_v19, %v770_v20  ;;  %v7251_v5 = vld [vmem:[%s10585_s3 + $0x6c] ss:$16 sps:$4 sm:$0xff]   ;;  %v7270_v20 = vld [vmem:[%s10585_s3 + $0x148] ss:$16 sps:$4 sm:$0xff]  }
  0x2b   :  { %609 = vmatpush1.bf16.msra.mxu0 %v7198_v23  ;;  %v774_v23 = vld [vmem:[%s10586_s5 + $0x240] sm:$0xff]  ;;  %v7272_v19 = vld [vmem:[%s10585_s3 + $0x14c] ss:$16 sps:$4 sm:$0xff]  }
  0x2c   :  { %610 = vmatprep.subr.bf16.mxu0 %v7203_v24  ;;  %v778_v24 = vld [vmem:[%s10586_s5 + $0x260] sm:$0xff] }
  0x2d   :  { %2289 = vmatpush1.bf16.msra.mxu1 %v6326_v6  ;;  %v7249_v6 = vld [vmem:[%s10585_s3 + $0x68] ss:$16 sps:$4 sm:$0xff]  }
  0x2e   :  { %2290 = vmatprep.subr.bf16.mxu1 %v6335_v9  ;;  %v7257_v9 = vld [vmem:[%s10585_s3 + $0xac] ss:$16 sps:$4 sm:$0xff]  }
  0x2f   :  { %611 = vmatpush1.bf16.msra.mxu0 %v7201_v25  ;;  %v6367_v25 = vcombine.high %v774_v23, %v778_v24 }
  0x30   :  { %612 = vmatprep.subr.bf16.mxu0 %v7206_v26  ;;  %v6366_v26 = vcombine.low %v774_v23, %v778_v24  ;;  %v7278_v23 = vld [vmem:[%s10585_s3 + $0x18c] ss:$16 sps:$4 sm:$0xff]   ;;  %v7276_v24 = vld [vmem:[%s10585_s3 + $0x188] ss:$16 sps:$4 sm:$0xff]  }
  0x31   :  { %2291 = vmatpush1.bf16.msra.mxu1 %v6334_v10  ;;  %v7255_v10 = vld [vmem:[%s10585_s3 + $0xa8] ss:$16 sps:$4 sm:$0xff]  }
  0x32   :  { %2292 = vmatprep.subr.bf16.mxu1 %v6343_v13  ;;  %v7263_v13 = vld [vmem:[%s10585_s3 + $0xec] ss:$16 sps:$4 sm:$0xff]  }
  0x33   :  { %613 = vmatpush1.bf16.msra.mxu0 %v7204_v27  ;;  %v782_v27 = vld [vmem:[%s10586_s5 + $0x280] sm:$0xff] }
  0x34   :  { %614 = vmatprep.subr.bf16.mxu0 %v7209_v28  ;;  %v786_v28 = vld [vmem:[%s10586_s5 + $0x2a0] sm:$0xff] }
  0x35   :  { %2293 = vmatpush1.bf16.msra.mxu1 %v6342_v14  ;;  %v7261_v14 = vld [vmem:[%s10585_s3 + $0xe8] ss:$16 sps:$4 sm:$0xff]  }
  0x36   :  { %2294 = vmatprep.subr.bf16.mxu1 %v6351_v17  ;;  %v7269_v17 = vld [vmem:[%s10585_s3 + $0x12c] ss:$16 sps:$4 sm:$0xff]  }
  0x37   :  { %615 = vmatpush1.bf16.msra.mxu0 %v7207_v29  ;;  %v53_v29 = vlaneseq }
  0x38   :  { %616 = vmatprep.subr.bf16.mxu0 %v7212_v30  ;;  %v6375_v30 = vcombine.high %v782_v27, %v786_v28 }
  0x39   :  { %2295 = vmatpush1.bf16.msra.mxu1 %v6350_v18  ;;  %v7267_v18 = vld [vmem:[%s10585_s3 + $0x128] ss:$16 sps:$4 sm:$0xff]  }
  0x3a   :  { %2296 = vmatprep.subr.bf16.mxu1 %v6359_v21  ;;  %v7275_v21 = vld [vmem:[%s10585_s3 + $0x16c] ss:$16 sps:$4 sm:$0xff]  }
  0x3b   :  { %617 = vmatpush1.bf16.msra.mxu0 %v7210_v31  ;;  %v6374_v31 = vcombine.low %v782_v27, %v786_v28  ;;  %v7284_v27 = vld [vmem:[%s10585_s3 + $0x1cc] ss:$16 sps:$4 sm:$0xff]   ;;  %v7282_v28 = vld [vmem:[%s10585_s3 + $0x1c8] ss:$16 sps:$4 sm:$0xff]  }
  0x3c   :  { %618 = vmatprep.subr.bf16.mxu0 %v7215_v32  ;;  %v790_v32 = vld [vmem:[%s10586_s5 + $0x2c0] sm:$0xff] }
  0x3d   :  { %2297 = vmatpush1.bf16.msra.mxu1 %v6358_v22  ;;  %v7273_v22 = vld [vmem:[%s10585_s3 + $0x168] ss:$16 sps:$4 sm:$0xff]  }
  0x3e   :  { %2298 = vmatprep.subr.bf16.mxu1 %v6367_v25  ;;  %v7281_v25 = vld [vmem:[%s10585_s3 + $0x1ac] ss:$16 sps:$4 sm:$0xff]  }
  0x3f   :  { %619 = vmatpush1.bf16.msra.mxu0 %v7213_v33  ;;  %v794_v33 = vld [vmem:[%s10586_s5 + $0x2e0] sm:$0xff] }
  0x40   :  { %620 = vmatprep.subr.bf16.mxu0 %v7218_v34  ;;  %v8229_v34 = vshrl.u32 %v53_v29, 7  ;;  %v7287_v29 = vld [vmem:[%s10585_s3 + $0x1ec] ss:$16 sps:$4 sm:$0xff]  }
  0x41   :  { %2299 = vmatpush1.bf16.msra.mxu1 %v6366_v26  ;;  %v7279_v26 = vld [vmem:[%s10585_s3 + $0x1a8] ss:$16 sps:$4 sm:$0xff]  }
  0x42   :  { %2300 = vmatprep.subr.bf16.mxu1 %v6375_v30  ;;  %v703_v30 = vld [vmem:[%s10586_s5 + $0x8] sm:$0xff] }
  0x43   :  { %621 = vmatpush1.bf16.msra.mxu0 %v7216_v35  ;;  %v6383_v35 = vcombine.high %v790_v32, %v794_v33 }
  0x44   :  { %622 = vmatprep.subr.bf16.mxu0 %v7221_v36  ;;  %v6382_v36 = vcombine.low %v790_v32, %v794_v33  ;;  %v7285_v32 = vld [vmem:[%s10585_s3 + $0x1e8] ss:$16 sps:$4 sm:$0xff]  }
  0x45   :  { %2301 = vmatpush1.bf16.msra.mxu1 %v6374_v31  ;;  %v707_v31 = vld [vmem:[%s10586_s5 + $0x28] sm:$0xff] }
  0x46   :  { %2302 = vmatprep.subr.bf16.mxu1 %v6383_v35  ;;  %v6297_v33 = vcombine.high %v703_v30, %v707_v31  ;;  %v711_v35 = vld [vmem:[%s10586_s5 + $0x48] sm:$0xff] }
  0x47   :  { %623 = vmatpush1.bf16.msra.mxu0 %v7219_v37  ;;  %v798_v37 = vld [vmem:[%s10586_s5 + $0x300] sm:$0xff] }
  0x48   :  { %624 = vmatprep.subr.bf16.mxu0 %v7224_v38  ;;  %v802_v38 = vld [vmem:[%s10586_s5 + $0x320] sm:$0xff] }
  0x49   :  { %2303 = vmatpush1.bf16.msra.mxu1 %v6382_v36  ;;  %v715_v36 = vld [vmem:[%s10586_s5 + $0x68] sm:$0xff] }
  0x4b   :  { %625 = vmatpush1.bf16.msra.mxu0 %v7222_v39  ;;  %v8238_v39 = vsub.s32 0, %v8229_v34 }
  0x4c   :  { %626 = vmatprep.subr.bf16.mxu0 %v7227_v40  ;;  %v6391_v40 = vcombine.high %v798_v37, %v802_v38 }
  0x4e   :  { %2304 = vmatprep.subr.bf16.mxu1 %v6391_v40  ;;  %v719_v40 = vld [vmem:[%s10586_s5 + $0x88] sm:$0xff] }
  0x4f   :  { %627 = vmatpush1.bf16.msra.mxu0 %v7225_v41  ;;  %v51_v41 = vld [vmem:[%s10587_s2] sm:$0x3] }
  0x50   :  { %628 = vmatprep.subr.bf16.mxu0 %v7230_v42  ;;  %v8244_v42 = vsub.s32 1, %v8229_v34 }
  0x53   :  { %629 = vmatpush1.bf16.msra.mxu0 %v7228_v43  ;;  %v6390_v43 = vcombine.low %v798_v37, %v802_v38  ;;  %v6296_v37 = vcombine.low %v703_v30, %v707_v31  ;;  %v6305_v38 = vcombine.high %v711_v35, %v715_v36 }
  0x54   :  { %630 = vmatprep.subr.bf16.mxu0 %v7233_v44  ;;  %v806_v44 = vld [vmem:[%s10586_s5 + $0x340] sm:$0xff] }
  0x55   :  { %2305 = vmatpush1.bf16.msra.mxu1 %v6390_v43  ;;  %v6304_v43 = vcombine.low %v711_v35, %v715_v36 }
  0x57   :  { %631 = vmatpush1.bf16.msra.mxu0 %v7231_v45  ;;  %v810_v45 = vld [vmem:[%s10586_s5 + $0x360] sm:$0xff] }
  0x58   :  { %632 = vmatprep.subr.bf16.mxu0 %v7236_v46  ;;  %v56_v46 = vrot.slane %v51_v41, %v8238_v39 }
  0x5b   :  { %633 = vmatpush1.bf16.msra.mxu0 %v7234_v47  ;;  %v6399_v47 = vcombine.high %v806_v44, %v810_v45 }
  0x5c   :  { %634 = vmatprep.subr.bf16.mxu0 %v7239_v48  ;;  %v60_v48 = vrot.slane %v51_v41, %v8244_v42  ;;  %v723_v41 = vld [vmem:[%s10586_s5 + $0xa8] sm:$0xff] }
  0x5d   :  { %2306 = vmatprep.subr.bf16.mxu1 %v6399_v47  ;;  %v6312_v47 = vcombine.low %v719_v40, %v723_v41 }
  0x5f   :  { %635 = vmatpush1.bf16.msra.mxu0 %v7237_v49 }
  0x60   :  { %647 = vmatprep.subr.bf16.mxu0 %v7242_v50  ;;  %v6398_v50 = vcombine.low %v806_v44, %v810_v45  ;;  %v6313_v44 = vcombine.high %v719_v40, %v723_v41  ;;  %v727_v45 = vld [vmem:[%s10586_s5 + $0xc8] sm:$0xff] }
  0x62   :  { %2307 = vmatpush1.bf16.msra.mxu1 %v6398_v50  ;;  %v739_v50 = vld [vmem:[%s10586_s5 + $0x128] sm:$0xff] }
  0xf5   :  { %v183_v49 = vpop.f32.mrb[0].mxu0 }
  0xf6   :  { %v184_v51 = vadd.f32 %v183_v49, %v56_v46  ;;  %v185_v52 = vpop.f32.mrb[1].mxu0  ;;  %v735_v49 = vld [vmem:[%s10586_s5 + $0x108] sm:$0xff] }
  0xf7   :  { %v186_v53 = vadd.f32 %v185_v52, %v60_v48  ;;  %v187_v54 = vpop.f32.mrb[2].mxu0  ;;  %v6329_v52 = vcombine.high %v735_v49, %v739_v50 }
  0xf8   :  { %v188_v55 = vadd.f32 %v187_v54, %v56_v46  ;;  %v189_v56 = vpop.f32.mrb[3].mxu0  ;;  %v192_v58 = vmax.f32 %v184_v51, 0.0  ;;  %v731_v46 = vld [vmem:[%s10586_s5 + $0xe8] sm:$0xff] }
  0xf9   :  { %v190_v57 = vadd.f32 %v189_v56, %v60_v48  ;;  %v193_v60 = vmax.f32 %v186_v53, 0.0  ;;  %v6321_v48 = vcombine.high %v727_v45, %v731_v46  ;;  %v6320_v51 = vcombine.low %v727_v45, %v731_v46  ;;  %v743_v53 = vld [vmem:[%s10586_s5 + $0x148] sm:$0xff] }
  0xfa   :  { %v194_v59 = vmax.f32 %v188_v55, 0.0  ;;  %v747_v54 = vld [vmem:[%s10586_s5 + $0x168] sm:$0xff]  ;;  %v6328_v55 = vcombine.low %v735_v49, %v739_v50 }
  0xfb   :  { %v195_v61 = vmax.f32 %v190_v57, 0.0  ;;  %v6337_v56 = vcombine.high %v743_v53, %v747_v54  ;;  %v751_v57 = vld [vmem:[%s10586_s5 + $0x188] sm:$0xff] }
  0xfc   :  { %v8254_v62 = vpack.c.bf16 %v194_v59, %v192_v58  ;;  %v755_v58 = vld [vmem:[%s10586_s5 + $0x1a8] sm:$0xff]  ;;  %v6336_v59 = vcombine.low %v743_v53, %v747_v54  ;;  %v8490_v53 = vld [vmem:[%s10588_s4] sm:$0xf] }
  0xfd   :  { %v197_v63 = vpack.c.bf16 %v195_v61, %v193_v60  ;;  %v6345_v60 = vcombine.high %v751_v57, %v755_v58  ;;  %v759_v61 = vld [vmem:[%s10586_s5 + $0x1c8] sm:$0xff]  ;;  %v267_v54 = vrot.slane %v8490_v53, %v8238_v39 }
  0xff   :  { %636 = vmatprep.mubr.bf16.mxu0 %v197_v63 }
 0x100   :  { %637 = vmatmul.mubr.bf16.vlgmr.msra.gmra.mrb[4].mxu0 %v8254_v62 }
 0x101   :  { %648 = vmatpush1.bf16.msra.mxu0 %v7240_v0  ;;  %679 = vmatprep.mubr.bf16.mxu0 %v197_v63  ;;  %v814_v63 = vld [vmem:[%s10586_s5 + $0x380] sm:$0xff] }
 0x102   :  { %649 = vmatprep.subr.bf16.mxu0 %v7245_v1  ;;  %v818_v0 = vld [vmem:[%s10586_s5 + $0x3a0] sm:$0xff] }
 0x103   :  { %v6407_v1 = vcombine.high %v814_v63, %v818_v0 }
 0x105   :  { %650 = vmatpush1.bf16.msra.mxu0 %v7243_v2  ;;  %v6344_v2 = vcombine.low %v751_v57, %v755_v58  ;;  %2308 = vmatprep.subr.bf16.mxu1 %v6407_v1 }
 0x106   :  { %651 = vmatprep.subr.bf16.mxu0 %v7248_v3  ;;  %v6406_v3 = vcombine.low %v814_v63, %v818_v0 }
 0x108   :  { %2309 = vmatpush1.bf16.msra.mxu1 %v6406_v3 }
 0x109   :  { %652 = vmatpush1.bf16.msra.mxu0 %v7246_v4 }
 0x10a   :  { %653 = vmatprep.subr.bf16.mxu0 %v7251_v5  ;;  %v767_v5 = vld [vmem:[%s10586_s5 + $0x208] sm:$0xff] }
 0x10d   :  { %654 = vmatpush1.bf16.msra.mxu0 %v7249_v6  ;;  %v771_v6 = vld [vmem:[%s10586_s5 + $0x228] sm:$0xff] }
 0x10e   :  { %655 = vmatprep.subr.bf16.mxu0 %v7254_v7  ;;  %v822_v7 = vld [vmem:[%s10586_s5 + $0x3c0] sm:$0xff] }
 0x111   :  { %656 = vmatpush1.bf16.msra.mxu0 %v7252_v8  ;;  %v826_v8 = vld [vmem:[%s10586_s5 + $0x3e0] sm:$0xff] }
 0x112   :  { %657 = vmatprep.subr.bf16.mxu0 %v7257_v9  ;;  %v6415_v9 = vcombine.high %v822_v7, %v826_v8 }
 0x114   :  { %2310 = vmatprep.subr.bf16.mxu1 %v6415_v9 }
 0x115   :  { %658 = vmatpush1.bf16.msra.mxu0 %v7255_v10 }
 0x116   :  { %659 = vmatprep.subr.bf16.mxu0 %v7260_v11  ;;  %v6414_v11 = vcombine.low %v822_v7, %v826_v8  ;;  %v843_v7 = vld [vmem:[%s10586_s5 + $0x468] sm:$0xff] }
 0x118   :  { %2311 = vmatpush1.bf16.msra.mxu1 %v6414_v11 }
 0x119   :  { %660 = vmatpush1.bf16.msra.mxu0 %v7258_v12  ;;  %v6361_v12 = vcombine.high %v767_v5, %v771_v6 }
 0x11a   :  { %661 = vmatprep.subr.bf16.mxu0 %v7263_v13  ;;  %v775_v13 = vld [vmem:[%s10586_s5 + $0x248] sm:$0xff] }
 0x11d   :  { %662 = vmatpush1.bf16.msra.mxu0 %v7261_v14  ;;  %v779_v14 = vld [vmem:[%s10586_s5 + $0x268] sm:$0xff] }
 0x11e   :  { %663 = vmatprep.subr.bf16.mxu0 %v7266_v15  ;;  %v8426_v15 = vld [vmem:[%s10586_s5 + $0x400] sm:$0xff] }
 0x121   :  { %664 = vmatpush1.bf16.msra.mxu0 %v7264_v16  ;;  %v8431_v16 = vld [vmem:[%s10586_s5 + $0x420] sm:$0xff] }
 0x122   :  { %665 = vmatprep.subr.bf16.mxu0 %v7269_v17  ;;  %v8436_v17 = vld [vmem:[%s10586_s5 + $0x408] sm:$0xff] }
 0x125   :  { %666 = vmatpush1.bf16.msra.mxu0 %v7267_v18  ;;  %v6423_v18 = vcombine.high %v8426_v15, %v8431_v16 }
 0x126   :  { %667 = vmatprep.subr.bf16.mxu0 %v7272_v19  ;;  %v8443_v19 = vld [vmem:[%s10586_s5 + $0x428] sm:$0xff] }
 0x127   :  { %2323 = vmatprep.subr.bf16.mxu1 %v6423_v18  ;;  %v851_v18 = vld [vmem:[%s10586_s5 + $0x4a8] sm:$0xff] }
 0x129   :  { %668 = vmatpush1.bf16.msra.mxu0 %v7270_v20  ;;  %v6360_v20 = vcombine.low %v767_v5, %v771_v6  ;;  %v842_v5 = vld [vmem:[%s10586_s5 + $0x460] sm:$0xff]  ;;  %v839_v6 = vld [vmem:[%s10586_s5 + $0x448] sm:$0xff] }
 0x12a   :  { %669 = vmatprep.subr.bf16.mxu0 %v7275_v21  ;;  %v6422_v21 = vcombine.low %v8426_v15, %v8431_v16  ;;  %v6433_v11 = vcombine.high %v839_v6, %v843_v7  ;;  %v855_v15 = vld [vmem:[%s10586_s5 + $0x4c8] sm:$0xff] }
 0x12b   :  { %v859_v16 = vld [vmem:[%s10586_s5 + $0x4e8] sm:$0xff] }
 0x12d   :  { %670 = vmatpush1.bf16.msra.mxu0 %v7273_v22  ;;  %v6424_v22 = vcombine.low %v8436_v17, %v8443_v19 }
 0x12e   :  { %671 = vmatprep.subr.bf16.mxu0 %v7278_v23  ;;  %v6369_v23 = vcombine.high %v775_v13, %v779_v14 }
 0x131   :  { %672 = vmatpush1.bf16.msra.mxu0 %v7276_v24  ;;  %v783_v24 = vld [vmem:[%s10586_s5 + $0x288] sm:$0xff] }
 0x132   :  { %673 = vmatprep.subr.bf16.mxu0 %v7281_v25  ;;  %v787_v25 = vld [vmem:[%s10586_s5 + $0x2a8] sm:$0xff] }
 0x133   :  { %v6376_v30 = vcombine.low %v783_v24, %v787_v25 }
 0x135   :  { %674 = vmatpush1.bf16.msra.mxu0 %v7279_v26  ;;  %v6368_v26 = vcombine.low %v775_v13, %v779_v14  ;;  %v850_v13 = vld [vmem:[%s10586_s5 + $0x4a0] sm:$0xff]  ;;  %v847_v14 = vld [vmem:[%s10586_s5 + $0x488] sm:$0xff] }
 0x136   :  { %675 = vmatprep.subr.bf16.mxu0 %v7284_v27  ;;  %v6377_v27 = vcombine.high %v783_v24, %v787_v25  ;;  %v6441_v25 = vcombine.high %v847_v14, %v851_v18 }
 0x139   :  { %676 = vmatpush1.bf16.msra.mxu0 %v7282_v28  ;;  %v791_v28 = vld [vmem:[%s10586_s5 + $0x2c8] sm:$0xff] }
 0x13a   :  { %677 = vmatprep.subr.bf16.mxu0 %v7287_v29  ;;  %v795_v29 = vld [vmem:[%s10586_s5 + $0x2e8] sm:$0xff] }
 0x13b   :  { %v6385_v31 = vcombine.high %v791_v28, %v795_v29  ;;  %v6384_v35 = vcombine.low %v791_v28, %v795_v29  ;;  %v862_v28 = vld [vmem:[%s10586_s5 + $0x500] sm:$0xff] }
 0x13c   :  { %v866_v29 = vld [vmem:[%s10586_s5 + $0x520] sm:$0xff] }
 0x13d   :  { %678 = vmatpush1.bf16.msra.mxu0 %v7285_v32  ;;  %v799_v32 = vld [vmem:[%s10586_s5 + $0x308] sm:$0xff] }
 0x13e   :  { %2366 = vmatprep.subr.bf16.mxu0 %v6297_v33  ;;  %v803_v33 = vld [vmem:[%s10586_s5 + $0x328] sm:$0xff] }
 0x13f   :  { %v6393_v36 = vcombine.high %v799_v32, %v803_v33  ;;  %v6392_v40 = vcombine.low %v799_v32, %v803_v33  ;;  %v6448_v33 = vcombine.low %v855_v15, %v859_v16 }
 0x140   :  { %680 = vmatmul.mubr.bf16.vlgmr.msra.gmra.mrb[8].mxu0 %v8254_v62  ;;  %v763_v62 = vld [vmem:[%s10586_s5 + $0x1e8] sm:$0xff] }
 0x141   :  { %2367 = vmatpush1.bf16.msra.mxu0 %v6296_v37  ;;  %v6353_v4 = vcombine.high %v759_v61, %v763_v62  ;;  %v6352_v10 = vcombine.low %v759_v61, %v763_v62  ;;  %v807_v37 = vld [vmem:[%s10586_s5 + $0x348] sm:$0xff] }
 0x142   :  { %2368 = vmatprep.subr.bf16.mxu0 %v6305_v38  ;;  %v811_v38 = vld [vmem:[%s10586_s5 + $0x368] sm:$0xff] }
 0x143   :  { %v6401_v41 = vcombine.high %v807_v37, %v811_v38  ;;  %v6400_v45 = vcombine.low %v807_v37, %v811_v38  ;;  %v870_v37 = vld [vmem:[%s10586_s5 + $0x540] sm:$0xff] }
 0x144   :  { %v874_v38 = vld [vmem:[%s10586_s5 + $0x560] sm:$0xff] }
 0x145   :  { %2369 = vmatpush1.bf16.msra.mxu0 %v6304_v43  ;;  %v815_v43 = vld [vmem:[%s10586_s5 + $0x388] sm:$0xff] }
 0x146   :  { %2370 = vmatprep.subr.bf16.mxu0 %v6313_v44  ;;  %v819_v44 = vld [vmem:[%s10586_s5 + $0x3a8] sm:$0xff] }
 0x147   :  { %v6409_v46 = vcombine.high %v815_v43, %v819_v44  ;;  %v6408_v49 = vcombine.low %v815_v43, %v819_v44  ;;  %v6454_v43 = vcombine.low %v862_v28, %v866_v29 }
 0x149   :  { %2371 = vmatpush1.bf16.msra.mxu0 %v6312_v47  ;;  %v823_v47 = vld [vmem:[%s10586_s5 + $0x3c8] sm:$0xff] }
 0x14a   :  { %2372 = vmatprep.subr.bf16.mxu0 %v6321_v48  ;;  %v827_v48 = vld [vmem:[%s10586_s5 + $0x3e8] sm:$0xff] }
 0x14b   :  { %v6417_v50 = vcombine.high %v823_v47, %v827_v48 }
 0x14d   :  { %2373 = vmatpush1.bf16.msra.mxu0 %v6320_v51  ;;  %v6416_v51 = vcombine.low %v823_v47, %v827_v48  ;;  %v878_v47 = vld [vmem:[%s10586_s5 + $0x580] sm:$0xff] }
 0x14e   :  { %2374 = vmatprep.subr.bf16.mxu0 %v6329_v52  ;;  %v6425_v52 = vcombine.high %v8436_v17, %v8443_v19  ;;  %v6440_v19 = vcombine.low %v847_v14, %v851_v18  ;;  %v882_v48 = vld [vmem:[%s10586_s5 + $0x5a0] sm:$0xff] }
 0x151   :  { %2375 = vmatpush1.bf16.msra.mxu0 %v6328_v55  ;;  %v271_v55 = vrot.slane %v8490_v53, %v8244_v42 }
 0x152   :  { %2376 = vmatprep.subr.bf16.mxu0 %v6337_v56 }
 0x155   :  { %2377 = vmatpush1.bf16.msra.mxu0 %v6336_v59 }
 0x156   :  { %2378 = vmatprep.subr.bf16.mxu0 %v6345_v60 }
 0x159   :  { %2379 = vmatpush1.bf16.msra.mxu0 %v6344_v2  ;;  %v838_v2 = vld [vmem:[%s10586_s5 + $0x440] sm:$0xff] }
 0x15a   :  { %2380 = vmatprep.subr.bf16.mxu0 %v6353_v4 }
 0x15d   :  { %2381 = vmatpush1.bf16.msra.mxu0 %v6352_v10  ;;  %v6431_v10 = vcombine.high %v838_v2, %v842_v5 }
 0x15e   :  { %2382 = vmatprep.subr.bf16.mxu0 %v6361_v12  ;;  %v846_v12 = vld [vmem:[%s10586_s5 + $0x480] sm:$0xff] }
 0x15f   :  { %v6439_v24 = vcombine.high %v846_v12, %v850_v13  ;;  %v6438_v17 = vcombine.low %v846_v12, %v850_v13  ;;  %v903_v12 = vld [vmem:[%s10586_s5 + $0x648] sm:$0xff] }
 0x160   :  { %v907_v13 = vld [vmem:[%s10586_s5 + $0x668] sm:$0xff] }
 0x161   :  { %2383 = vmatpush1.bf16.msra.mxu0 %v6360_v20  ;;  %v6430_v20 = vcombine.low %v838_v2, %v842_v5  ;;  %v895_v2 = vld [vmem:[%s10586_s5 + $0x608] sm:$0xff] }
 0x162   :  { %2384 = vmatprep.subr.bf16.mxu0 %v6369_v23  ;;  %v6432_v23 = vcombine.low %v839_v6, %v843_v7 }
 0x165   :  { %2385 = vmatpush1.bf16.msra.mxu0 %v6368_v26  ;;  %v854_v26 = vld [vmem:[%s10586_s5 + $0x4c0] sm:$0xff] }
 0x166   :  { %2386 = vmatprep.subr.bf16.mxu0 %v6377_v27  ;;  %v858_v27 = vld [vmem:[%s10586_s5 + $0x4e0] sm:$0xff] }
 0x167   :  { %v6446_v32 = vcombine.low %v854_v26, %v858_v27 }
 0x169   :  { %2387 = vmatpush1.bf16.msra.mxu0 %v6376_v30  ;;  %v863_v30 = vld [vmem:[%s10586_s5 + $0x508] sm:$0xff] }
 0x16a   :  { %2388 = vmatprep.subr.bf16.mxu0 %v6385_v31  ;;  %v867_v31 = vld [vmem:[%s10586_s5 + $0x528] sm:$0xff] }
 0x16b   :  { %v6456_v44 = vcombine.low %v863_v30, %v867_v31 }
 0x16d   :  { %2389 = vmatpush1.bf16.msra.mxu0 %v6384_v35  ;;  %v6455_v35 = vcombine.high %v862_v28, %v866_v29  ;;  %v919_v28 = vld [vmem:[%s10586_s5 + $0x6c8] sm:$0xff] }
 0x16e   :  { %2390 = vmatprep.subr.bf16.mxu0 %v6393_v36  ;;  %v6457_v36 = vcombine.high %v863_v30, %v867_v31  ;;  %v923_v29 = vld [vmem:[%s10586_s5 + $0x6e8] sm:$0xff] }
 0x171   :  { %2391 = vmatpush1.bf16.msra.mxu0 %v6392_v40  ;;  %v871_v40 = vld [vmem:[%s10586_s5 + $0x548] sm:$0xff] }
 0x172   :  { %2392 = vmatprep.subr.bf16.mxu0 %v6401_v41  ;;  %v875_v41 = vld [vmem:[%s10586_s5 + $0x568] sm:$0xff] }
 0x175   :  { %2393 = vmatpush1.bf16.msra.mxu0 %v6400_v45  ;;  %v6463_v45 = vcombine.high %v870_v37, %v874_v38 }
 0x176   :  { %2394 = vmatprep.subr.bf16.mxu0 %v6409_v46  ;;  %v6465_v46 = vcombine.high %v871_v40, %v875_v41 }
 0x179   :  { %2395 = vmatpush1.bf16.msra.mxu0 %v6408_v49  ;;  %v879_v49 = vld [vmem:[%s10586_s5 + $0x588] sm:$0xff] }
 0x17a   :  { %2396 = vmatprep.subr.bf16.mxu0 %v6417_v50  ;;  %v883_v50 = vld [vmem:[%s10586_s5 + $0x5a8] sm:$0xff] }
 0x17d   :  { %2397 = vmatpush1.bf16.msra.mxu0 %v6416_v51  ;;  %v6462_v51 = vcombine.low %v870_v37, %v874_v38  ;;  %v927_v37 = vld [vmem:[%s10586_s5 + $0x708] sm:$0xff] }
 0x17e   :  { %2409 = vmatprep.subr.bf16.mxu0 %v6425_v52  ;;  %v6464_v52 = vcombine.low %v871_v40, %v875_v41  ;;  %v931_v38 = vld [vmem:[%s10586_s5 + $0x728] sm:$0xff]  ;;  %v6512_v41 = vcombine.low %v919_v28, %v923_v29 }
 0x1d3   :  { %v638_v56 = vpop.f32.mrb[4].mxu0 }
 0x1d4   :  { %v639_v57 = vadd.f32 %v638_v56, %v267_v54  ;;  %v640_v58 = vpop.f32.mrb[5].mxu0  ;;  %v886_v56 = vld [vmem:[%s10586_s5 + $0x5c0] sm:$0xff] }
 0x1d5   :  { %v641_v59 = vadd.f32 %v640_v58, %v271_v55  ;;  %v642_v60 = vpop.f32.mrb[6].mxu0  ;;  %v887_v58 = vld [vmem:[%s10586_s5 + $0x5c8] sm:$0xff] }
 0x1d6   :  { %v643_v61 = vadd.f32 %v642_v60, %v267_v54  ;;  %v644_v62 = vpop.f32.mrb[7].mxu0  ;;  %v690_v0 = vmax.f32 %v639_v57, 0.0  ;;  %v6471_v54 = vcombine.high %v878_v47, %v882_v48  ;;  %v890_v57 = vld [vmem:[%s10586_s5 + $0x5e0] sm:$0xff]  ;;  %v6470_v60 = vcombine.low %v878_v47, %v882_v48  ;;  %v935_v47 = vld [vmem:[%s10586_s5 + $0x748] sm:$0xff] }
 0x1d7   :  { %v645_v63 = vadd.f32 %v644_v62, %v271_v55  ;;  %v691_v3 = vmax.f32 %v641_v59, 0.0  ;;  %v6473_v55 = vcombine.high %v879_v49, %v883_v50  ;;  %v891_v59 = vld [vmem:[%s10586_s5 + $0x5e8] sm:$0xff]  ;;  %v6479_v62 = vcombine.high %v886_v56, %v890_v57 }
 0x1d8   :  { %v694_v1 = vmax.f32 %v643_v61, 0.0  ;;  %v6472_v61 = vcombine.low %v879_v49, %v883_v50  ;;  %v6480_v5 = vcombine.low %v887_v58, %v891_v59  ;;  %v939_v48 = vld [vmem:[%s10586_s5 + $0x768] sm:$0xff]  ;;  %v6520_v50 = vcombine.low %v927_v37, %v931_v38 }
 0x1d9   :  { %v695_v4 = vmax.f32 %v645_v63, 0.0  ;;  %v6481_v63 = vcombine.high %v887_v58, %v891_v59  ;;  %v943_v58 = vld [vmem:[%s10586_s5 + $0x788] sm:$0xff] }
 0x1da   :  { %v8508_v8 = vpack.c.bf16 %v694_v1, %v690_v0  ;;  %v894_v0 = vld [vmem:[%s10586_s5 + $0x600] sm:$0xff]  ;;  %v947_v59 = vld [vmem:[%s10586_s5 + $0x7a8] sm:$0xff] }
 0x1db   :  { %v8510_v9 = vpack.c.bf16 %v695_v4, %v691_v3  ;;  %v898_v1 = vld [vmem:[%s10586_s5 + $0x620] sm:$0xff]  ;;  %v899_v3 = vld [vmem:[%s10586_s5 + $0x628] sm:$0xff]  ;;  %v6478_v4 = vcombine.low %v886_v56, %v890_v57  ;;  %v8673_v56 = vsub.s32 3, %v8229_v34 }
 0x1dc   :  { %v6487_v6 = vcombine.high %v894_v0, %v898_v1  ;;  %v6489_v7 = vcombine.high %v895_v2, %v899_v3  ;;  %v6486_v14 = vcombine.low %v894_v0, %v898_v1  ;;  %v6488_v18 = vcombine.low %v895_v2, %v899_v3  ;;  %v946_v57 = vld [vmem:[%s10586_s5 + $0x7a0] sm:$0xff] }
 0x1dd   :  { %2312 = vmatprep.mubr.bf16.mxu1 %v8510_v9  ;;  %2398 = vmatprep.mubr.bf16.mxu0 %v8510_v9  ;;  %v6537_v0 = vcombine.high %v943_v58, %v947_v59  ;;  %v950_v1 = vld [vmem:[%s10586_s5 + $0x7c0] sm:$0xff]  ;;  %v279_v2 = vrot.slane %v8490_v53, %v8673_v56 }
 0x1de   :  { %2313 = vmatmul.mubr.bf16.vlgmr.msra.gmra.mrb[0].mxu1 %v8508_v8  ;;  %2399 = vmatmul.mubr.bf16.vlgmr.msra.gmra.mrb[12].mxu0 %v8508_v8  ;;  %v954_v3 = vld [vmem:[%s10586_s5 + $0x7e0] sm:$0xff] }
 0x1df   :  { %2324 = vmatpush1.bf16.msra.mxu1 %v6422_v21  ;;  %2410 = vmatpush1.bf16.msra.mxu0 %v6424_v22  ;;  %v6447_v21 = vcombine.high %v854_v26, %v858_v27  ;;  %v6449_v22 = vcombine.high %v855_v15, %v859_v16  ;;  %v911_v26 = vld [vmem:[%s10586_s5 + $0x688] sm:$0xff]  ;;  %v6496_v16 = vcombine.low %v903_v12, %v907_v13 }
 0x1e0   :  { %2325 = vmatprep.subr.bf16.mxu1 %v6431_v10  ;;  %2411 = vmatprep.subr.bf16.mxu0 %v6433_v11  ;;  %v902_v10 = vld [vmem:[%s10586_s5 + $0x640] sm:$0xff]  ;;  %v915_v27 = vld [vmem:[%s10586_s5 + $0x6a8] sm:$0xff] }
 0x1e1   :  { %v906_v11 = vld [vmem:[%s10586_s5 + $0x660] sm:$0xff]  ;;  %v6504_v31 = vcombine.low %v911_v26, %v915_v27 }
 0x1e2   :  { %v6494_v15 = vcombine.low %v902_v10, %v906_v11 }
 0x1e3   :  { %2326 = vmatpush1.bf16.msra.mxu1 %v6430_v20  ;;  %2412 = vmatpush1.bf16.msra.mxu0 %v6432_v23  ;;  %v6495_v20 = vcombine.high %v902_v10, %v906_v11  ;;  %v6497_v23 = vcombine.high %v903_v12, %v907_v13  ;;  %v6536_v10 = vcombine.low %v943_v58, %v947_v59 }
 0x1e4   :  { %2327 = vmatprep.subr.bf16.mxu1 %v6439_v24  ;;  %2413 = vmatprep.subr.bf16.mxu0 %v6441_v25  ;;  %v910_v24 = vld [vmem:[%s10586_s5 + $0x680] sm:$0xff] }
 0x1e5   :  { %v914_v25 = vld [vmem:[%s10586_s5 + $0x6a0] sm:$0xff] }
 0x1e6   :  { %v6502_v30 = vcombine.low %v910_v24, %v914_v25 }
 0x1e7   :  { %2328 = vmatpush1.bf16.msra.mxu1 %v6438_v17  ;;  %2414 = vmatpush1.bf16.msra.mxu0 %v6440_v19  ;;  %v6503_v17 = vcombine.high %v910_v24, %v914_v25  ;;  %v6505_v19 = vcombine.high %v911_v26, %v915_v27  ;;  %v705_v24 = vld [vmem:[%s10586_s5 + $0x18] sm:$0xff] }
 0x1e8   :  { %2329 = vmatprep.subr.bf16.mxu1 %v6447_v21  ;;  %2415 = vmatprep.subr.bf16.mxu0 %v6449_v22  ;;  %v918_v21 = vld [vmem:[%s10586_s5 + $0x6c0] sm:$0xff]  ;;  %v709_v25 = vld [vmem:[%s10586_s5 + $0x38] sm:$0xff] }
 0x1e9   :  { %v922_v22 = vld [vmem:[%s10586_s5 + $0x6e0] sm:$0xff] }
 0x1ea   :  { %v6510_v40 = vcombine.low %v918_v21, %v922_v22 }
 0x1eb   :  { %2330 = vmatpush1.bf16.msra.mxu1 %v6446_v32  ;;  %2416 = vmatpush1.bf16.msra.mxu0 %v6448_v33  ;;  %v6511_v32 = vcombine.high %v918_v21, %v922_v22  ;;  %v6513_v33 = vcombine.high %v919_v28, %v923_v29  ;;  %v6301_v28 = vcombine.high %v705_v24, %v709_v25 }
 0x1ec   :  { %2331 = vmatprep.subr.bf16.mxu1 %v6455_v35  ;;  %2417 = vmatprep.subr.bf16.mxu0 %v6457_v36  ;;  %v926_v35 = vld [vmem:[%s10586_s5 + $0x700] sm:$0xff] }
 0x1ed   :  { %v930_v36 = vld [vmem:[%s10586_s5 + $0x720] sm:$0xff] }
 0x1ee   :  { %v6518_v49 = vcombine.low %v926_v35, %v930_v36 }
 0x1ef   :  { %2332 = vmatpush1.bf16.msra.mxu1 %v6454_v43  ;;  %2418 = vmatpush1.bf16.msra.mxu0 %v6456_v44  ;;  %v6519_v43 = vcombine.high %v926_v35, %v930_v36  ;;  %v6521_v44 = vcombine.high %v927_v37, %v931_v38  ;;  %v713_v35 = vld [vmem:[%s10586_s5 + $0x58] sm:$0xff] }
 0x1f0   :  { %2333 = vmatprep.subr.bf16.mxu1 %v6463_v45  ;;  %2419 = vmatprep.subr.bf16.mxu0 %v6465_v46  ;;  %v934_v45 = vld [vmem:[%s10586_s5 + $0x740] sm:$0xff]  ;;  %v717_v36 = vld [vmem:[%s10586_s5 + $0x78] sm:$0xff] }
 0x1f1   :  { %v938_v46 = vld [vmem:[%s10586_s5 + $0x760] sm:$0xff] }
 0x1f3   :  { %2334 = vmatpush1.bf16.msra.mxu1 %v6462_v51  ;;  %2420 = vmatpush1.bf16.msra.mxu0 %v6464_v52  ;;  %v6527_v51 = vcombine.high %v934_v45, %v938_v46  ;;  %v6529_v52 = vcombine.high %v935_v47, %v939_v48 }
 0x1f4   :  { %2335 = vmatprep.subr.bf16.mxu1 %v6471_v54  ;;  %2421 = vmatprep.subr.bf16.mxu0 %v6473_v55  ;;  %v8667_v54 = vsub.s32 2, %v8229_v34  ;;  %v942_v55 = vld [vmem:[%s10586_s5 + $0x780] sm:$0xff] }
 0x1f7   :  { %2336 = vmatpush1.bf16.msra.mxu1 %v6470_v60  ;;  %2422 = vmatpush1.bf16.msra.mxu0 %v6472_v61  ;;  %v6526_v60 = vcombine.low %v934_v45, %v938_v46  ;;  %v6528_v61 = vcombine.low %v935_v47, %v939_v48  ;;  %v724_v45 = vld [vmem:[%s10586_s5 + $0xb0] sm:$0xff]  ;;  %v721_v46 = vld [vmem:[%s10586_s5 + $0x98] sm:$0xff] }
 0x1f8   :  { %2337 = vmatprep.subr.bf16.mxu1 %v6479_v62  ;;  %2423 = vmatprep.subr.bf16.mxu0 %v6481_v63  ;;  %v275_v62 = vrot.slane %v8490_v53, %v8667_v54  ;;  %v6535_v63 = vcombine.high %v942_v55, %v946_v57  ;;  %v6543_v53 = vcombine.high %v950_v1, %v954_v3  ;;  %v725_v47 = vld [vmem:[%s10586_s5 + $0xb8] sm:$0xff] }
 0x1f9   :  { %v6316_v59 = vcombine.low %v721_v46, %v725_v47 }
 0x1fb   :  { %2338 = vmatpush1.bf16.msra.mxu1 %v6478_v4  ;;  %2424 = vmatpush1.bf16.msra.mxu0 %v6480_v5  ;;  %v951_v4 = vld [vmem:[%s10586_s5 + $0x7c8] sm:$0xff] }
 0x1fc   :  { %2339 = vmatprep.subr.bf16.mxu1 %v6487_v6  ;;  %2425 = vmatprep.subr.bf16.mxu0 %v6489_v7  ;;  %v955_v5 = vld [vmem:[%s10586_s5 + $0x7e8] sm:$0xff]  ;;  %v6534_v7 = vcombine.low %v942_v55, %v946_v57  ;;  %v732_v55 = vld [vmem:[%s10586_s5 + $0xf0] sm:$0xff]  ;;  %v729_v57 = vld [vmem:[%s10586_s5 + $0xd8] sm:$0xff] }
 0x1fd   :  { %v6545_v13 = vcombine.high %v951_v4, %v955_v5 }
 0x1ff   :  { %2340 = vmatpush1.bf16.msra.mxu1 %v6486_v14  ;;  %2426 = vmatpush1.bf16.msra.mxu0 %v6488_v18  ;;  %v704_v14 = vld [vmem:[%s10586_s5 + $0x10] sm:$0xff] }
 0x200   :  { %2341 = vmatprep.subr.bf16.mxu1 %v6495_v20  ;;  %2427 = vmatprep.subr.bf16.mxu0 %v6497_v23  ;;  %v708_v23 = vld [vmem:[%s10586_s5 + $0x30] sm:$0xff] }
 0x201   :  { %v6299_v22 = vcombine.high %v704_v14, %v708_v23  ;;  %v6298_v38 = vcombine.low %v704_v14, %v708_v23  ;;  %v752_v14 = vld [vmem:[%s10586_s5 + $0x190] sm:$0xff] }
 0x203   :  { %2342 = vmatpush1.bf16.msra.mxu1 %v6494_v15  ;;  %2428 = vmatpush1.bf16.msra.mxu0 %v6496_v16  ;;  %v6542_v16 = vcombine.low %v950_v1, %v954_v3  ;;  %v741_v1 = vld [vmem:[%s10586_s5 + $0x138] sm:$0xff] }
 0x204   :  { %2343 = vmatprep.subr.bf16.mxu1 %v6503_v17  ;;  %2429 = vmatprep.subr.bf16.mxu0 %v6505_v19  ;;  %v6544_v17 = vcombine.low %v951_v4, %v955_v5  ;;  %v744_v5 = vld [vmem:[%s10586_s5 + $0x150] sm:$0xff] }
 0x207   :  { %2344 = vmatpush1.bf16.msra.mxu1 %v6502_v30  ;;  %2430 = vmatpush1.bf16.msra.mxu0 %v6504_v31  ;;  %v712_v31 = vld [vmem:[%s10586_s5 + $0x50] sm:$0xff] }
 0x208   :  { %2345 = vmatprep.subr.bf16.mxu1 %v6511_v32  ;;  %2431 = vmatprep.subr.bf16.mxu0 %v6513_v33  ;;  %v716_v33 = vld [vmem:[%s10586_s5 + $0x70] sm:$0xff] }
 0x209   :  { %v6306_v48 = vcombine.low %v712_v31, %v716_v33 }
 0x20b   :  { %2346 = vmatpush1.bf16.msra.mxu1 %v6510_v40  ;;  %2432 = vmatpush1.bf16.msra.mxu0 %v6512_v41  ;;  %v6300_v40 = vcombine.low %v705_v24, %v709_v25  ;;  %v6307_v41 = vcombine.high %v712_v31, %v716_v33  ;;  %v757_v24 = vld [vmem:[%s10586_s5 + $0x1b8] sm:$0xff]  ;;  %v772_v31 = vld [vmem:[%s10586_s5 + $0x230] sm:$0xff] }
 0x20c   :  { %2347 = vmatprep.subr.bf16.mxu1 %v6519_v43  ;;  %2433 = vmatprep.subr.bf16.mxu0 %v6521_v44  ;;  %v6309_v43 = vcombine.high %v713_v35, %v717_v36  ;;  %v720_v44 = vld [vmem:[%s10586_s5 + $0x90] sm:$0xff]  ;;  %v769_v33 = vld [vmem:[%s10586_s5 + $0x218] sm:$0xff] }
 0x20d   :  { %v6314_v58 = vcombine.low %v720_v44, %v724_v45 }
 0x20f   :  { %2348 = vmatpush1.bf16.msra.mxu1 %v6518_v49  ;;  %2434 = vmatpush1.bf16.msra.mxu0 %v6520_v50  ;;  %v6308_v49 = vcombine.low %v713_v35, %v717_v36  ;;  %v6315_v50 = vcombine.high %v720_v44, %v724_v45  ;;  %v773_v36 = vld [vmem:[%s10586_s5 + $0x238] sm:$0xff]  ;;  %v780_v44 = vld [vmem:[%s10586_s5 + $0x270] sm:$0xff] }
 0x210   :  { %2349 = vmatprep.subr.bf16.mxu1 %v6527_v51  ;;  %2435 = vmatprep.subr.bf16.mxu0 %v6529_v52  ;;  %v728_v51 = vld [vmem:[%s10586_s5 + $0xd0] sm:$0xff]  ;;  %v6317_v52 = vcombine.high %v721_v46, %v725_v47  ;;  %v777_v45 = vld [vmem:[%s10586_s5 + $0x258] sm:$0xff]  ;;  %v6365_v46 = vcombine.high %v769_v33, %v773_v36 }
 0x211   :  { %v781_v47 = vld [vmem:[%s10586_s5 + $0x278] sm:$0xff] }
 0x213   :  { %v681_v6 = vpop.f32.mrb[8].mxu0  ;;  %2350 = vmatpush1.bf16.msra.mxu1 %v6526_v60  ;;  %2436 = vmatpush1.bf16.msra.mxu0 %v6528_v61  ;;  %v6323_v60 = vcombine.high %v728_v51, %v732_v55  ;;  %v736_v61 = vld [vmem:[%s10586_s5 + $0x110] sm:$0xff] }
 0x214   :  { %v682_v11 = vadd.f32 %v681_v6, %v275_v62  ;;  %v683_v12 = vpop.f32.mrb[9].mxu0  ;;  %2351 = vmatprep.subr.bf16.mxu1 %v6535_v63  ;;  %2437 = vmatprep.subr.bf16.mxu0 %v6537_v0  ;;  %v740_v63 = vld [vmem:[%s10586_s5 + $0x130] sm:$0xff]  ;;  %v737_v0 = vld [vmem:[%s10586_s5 + $0x118] sm:$0xff] }
 0x215   :  { %v684_v18 = vadd.f32 %v683_v12, %v279_v2  ;;  %v685_v20 = vpop.f32.mrb[10].mxu0  ;;  %v6331_v4 = vcombine.high %v736_v61, %v740_v63  ;;  %v6333_v6 = vcombine.high %v737_v0, %v741_v1  ;;  %v6330_v12 = vcombine.low %v736_v61, %v740_v63  ;;  %v792_v61 = vld [vmem:[%s10586_s5 + $0x2d0] sm:$0xff]  ;;  %v793_v63 = vld [vmem:[%s10586_s5 + $0x2d8] sm:$0xff] }
 0x216   :  { %v686_v26 = vadd.f32 %v685_v20, %v275_v62  ;;  %v687_v27 = vpop.f32.mrb[11].mxu0  ;;  %v692_v19 = vmax.f32 %v682_v11, 0.0  ;;  %v749_v11 = vld [vmem:[%s10586_s5 + $0x178] sm:$0xff] }
 0x217   :  { %v688_v15 = vadd.f32 %v687_v27, %v279_v2  ;;  %2352 = vmatpush1.bf16.msra.mxu1 %v6534_v7  ;;  %2438 = vmatpush1.bf16.msra.mxu0 %v6536_v10  ;;  %v693_v29 = vmax.f32 %v684_v18, 0.0  ;;  %v6322_v2 = vcombine.low %v728_v51, %v732_v55  ;;  %v748_v7 = vld [vmem:[%s10586_s5 + $0x170] sm:$0xff]  ;;  %v745_v10 = vld [vmem:[%s10586_s5 + $0x158] sm:$0xff] }
 0x218   :  { %v696_v21 = vmax.f32 %v686_v26, 0.0  ;;  %2353 = vmatprep.subr.bf16.mxu1 %v6543_v53  ;;  %2439 = vmatprep.subr.bf16.mxu0 %v6545_v13  ;;  %v6332_v53 = vcombine.low %v737_v0, %v741_v1  ;;  %v6339_v13 = vcombine.high %v744_v5, %v748_v7  ;;  %v756_v18 = vld [vmem:[%s10586_s5 + $0x1b0] sm:$0xff]  ;;  %v753_v20 = vld [vmem:[%s10586_s5 + $0x198] sm:$0xff]  ;;  %v6341_v23 = vcombine.high %v745_v10, %v749_v11 }
 0x219   :  { %v697_v30 = vmax.f32 %v688_v15, 0.0  ;;  %v6338_v25 = vcombine.low %v744_v5, %v748_v7  ;;  %v6340_v26 = vcombine.low %v745_v10, %v749_v11  ;;  %v6347_v27 = vcombine.high %v752_v14, %v756_v18  ;;  %v760_v15 = vld [vmem:[%s10586_s5 + $0x1d0] sm:$0xff]  ;;  %v785_v55 = vld [vmem:[%s10586_s5 + $0x298] sm:$0xff] }
 0x21a   :  { %v8715_v32 = vpack.c.bf16 %v696_v21, %v692_v19  ;;  %v6349_v19 = vcombine.high %v753_v20, %v757_v24  ;;  %v765_v21 = vld [vmem:[%s10586_s5 + $0x1f8] sm:$0xff]  ;;  %v784_v51 = vld [vmem:[%s10586_s5 + $0x290] sm:$0xff] }
 0x21b   :  { %v8726_v37 = vpack.c.bf16 %v697_v30, %v693_v29  ;;  %2354 = vmatpush1.bf16.msra.mxu1 %v6542_v16  ;;  %2440 = vmatpush1.bf16.msra.mxu0 %v6544_v17  ;;  %v764_v16 = vld [vmem:[%s10586_s5 + $0x1f0] sm:$0xff]  ;;  %v761_v17 = vld [vmem:[%s10586_s5 + $0x1d8] sm:$0xff] }
 0x21c   :  { %2452 = vmatprep.subr.bf16.mxu1 %v6299_v22  ;;  %2538 = vmatprep.subr.bf16.mxu0 %v6301_v28  ;;  %v6346_v22 = vcombine.low %v752_v14, %v756_v18  ;;  %v6348_v28 = vcombine.low %v753_v20, %v757_v24  ;;  %v6355_v29 = vcombine.high %v760_v15, %v764_v16  ;;  %v768_v30 = vld [vmem:[%s10586_s5 + $0x210] sm:$0xff]  ;;  %v797_v1 = vld [vmem:[%s10586_s5 + $0x2f8] sm:$0xff] }
 0x21d   :  { %2355 = vmatprep.mubr.bf16.mxu1 %v8726_v37  ;;  %2441 = vmatprep.mubr.bf16.mxu0 %v8726_v37  ;;  %v6357_v35 = vcombine.high %v761_v17, %v765_v21  ;;  %v800_v5 = vld [vmem:[%s10586_s5 + $0x310] sm:$0xff]  ;;  %v801_v7 = vld [vmem:[%s10586_s5 + $0x318] sm:$0xff]  ;;  %v6389_v10 = vcombine.high %v793_v63, %v797_v1 }
 0x21e   :  { %2356 = vmatmul.mubr.bf16.vlgmr.msra.gmra.mrb[0].mxu1 %v8715_v32  ;;  %2442 = vmatmul.mubr.bf16.vlgmr.msra.gmra.mrb[12].mxu0 %v8715_v32  ;;  %v805_v11 = vld [vmem:[%s10586_s5 + $0x338] sm:$0xff]  ;;  %v808_v14 = vld [vmem:[%s10586_s5 + $0x350] sm:$0xff] }
 0x21f   :  { %2453 = vmatpush1.bf16.msra.mxu1 %v6298_v38  ;;  %2484 = vmatprep.mubr.bf16.mxu1 %v8510_v9  ;;  %v6354_v38 = vcombine.low %v760_v15, %v764_v16  ;;  %v812_v18 = vld [vmem:[%s10586_s5 + $0x370] sm:$0xff]  ;;  %v809_v20 = vld [vmem:[%s10586_s5 + $0x358] sm:$0xff] }
 0x220   :  { %2539 = vmatpush1.bf16.msra.mxu0 %v6300_v40  ;;  %2570 = vmatprep.mubr.bf16.mxu0 %v8510_v9  ;;  %v733_v9 = vld [vmem:[%s10586_s5 + $0xf8] sm:$0xff]  ;;  %v6356_v40 = vcombine.low %v761_v17, %v765_v21  ;;  %v816_v15 = vld [vmem:[%s10586_s5 + $0x390] sm:$0xff] }
 0x221   :  { %2454 = vmatprep.subr.bf16.mxu1 %v6307_v41  ;;  %2540 = vmatprep.subr.bf16.mxu0 %v6309_v43  ;;  %v6325_v62 = vcombine.high %v729_v57, %v733_v9  ;;  %v6324_v3 = vcombine.low %v729_v57, %v733_v9  ;;  %v6363_v41 = vcombine.high %v768_v30, %v772_v31  ;;  %v776_v43 = vld [vmem:[%s10586_s5 + $0x250] sm:$0xff]  ;;  %v789_v9 = vld [vmem:[%s10586_s5 + $0x2b8] sm:$0xff] }
 0x222   :  { %v6373_v57 = vcombine.high %v777_v45, %v781_v47  ;;  %v6381_v0 = vcombine.high %v785_v55, %v789_v9  ;;  %v813_v24 = vld [vmem:[%s10586_s5 + $0x378] sm:$0xff]  ;;  %v820_v16 = vld [vmem:[%s10586_s5 + $0x3b0] sm:$0xff] }
 0x223   :  { %2455 = vmatpush1.bf16.msra.mxu1 %v6306_v48  ;;  %v6362_v48 = vcombine.low %v768_v30, %v772_v31  ;;  %v817_v17 = vld [vmem:[%s10586_s5 + $0x398] sm:$0xff]  ;;  %v824_v30 = vld [vmem:[%s10586_s5 + $0x3d0] sm:$0xff] }
 0x224   :  { %2541 = vmatpush1.bf16.msra.mxu0 %v6308_v49  ;;  %2456 = vmatprep.subr.bf16.mxu1 %v6315_v50  ;;  %v6364_v49 = vcombine.low %v769_v33, %v773_v36  ;;  %v6371_v50 = vcombine.high %v776_v43, %v780_v44  ;;  %v821_v21 = vld [vmem:[%s10586_s5 + $0x3b8] sm:$0xff]  ;;  %v828_v31 = vld [vmem:[%s10586_s5 + $0x3f0] sm:$0xff] }
 0x225   :  { %2542 = vmatprep.subr.bf16.mxu0 %v6317_v52  ;;  %v788_v52 = vld [vmem:[%s10586_s5 + $0x2b0] sm:$0xff]  ;;  %v825_v33 = vld [vmem:[%s10586_s5 + $0x3d8] sm:$0xff] }
 0x226   :  { %v829_v36 = vld [vmem:[%s10586_s5 + $0x3f8] sm:$0xff] }
 0x227   :  { %2457 = vmatpush1.bf16.msra.mxu1 %v6314_v58  ;;  %v6370_v58 = vcombine.low %v776_v43, %v780_v44  ;;  %v6412_v43 = vcombine.low %v817_v17, %v821_v21  ;;  %v6419_v44 = vcombine.high %v824_v30, %v828_v31 }
 0x228   :  { %2543 = vmatpush1.bf16.msra.mxu0 %v6316_v59  ;;  %2458 = vmatprep.subr.bf16.mxu1 %v6323_v60  ;;  %v6372_v59 = vcombine.low %v777_v45, %v781_v47  ;;  %v6379_v60 = vcombine.high %v784_v51, %v788_v52  ;;  %v833_v45 = vld [vmem:[%s10586_s5 + $0x418] sm:$0xff] }
 0x229   :  { %2544 = vmatprep.subr.bf16.mxu0 %v6325_v62  ;;  %v796_v62 = vld [vmem:[%s10586_s5 + $0x2f0] sm:$0xff]  ;;  %v837_v47 = vld [vmem:[%s10586_s5 + $0x438] sm:$0xff] }
 0x22b   :  { %2459 = vmatpush1.bf16.msra.mxu1 %v6322_v2  ;;  %v6378_v2 = vcombine.low %v784_v51, %v788_v52  ;;  %v840_v51 = vld [vmem:[%s10586_s5 + $0x450] sm:$0xff] }
 0x22c   :  { %2545 = vmatpush1.bf16.msra.mxu0 %v6324_v3  ;;  %2460 = vmatprep.subr.bf16.mxu1 %v6331_v4  ;;  %v6380_v3 = vcombine.low %v785_v55, %v789_v9  ;;  %v6387_v4 = vcombine.high %v792_v61, %v796_v62  ;;  %v844_v52 = vld [vmem:[%s10586_s5 + $0x470] sm:$0xff]  ;;  %v6429_v55 = vcombine.high %v833_v45, %v837_v47  ;;  %v845_v9 = vld [vmem:[%s10586_s5 + $0x478] sm:$0xff] }
 0x22d   :  { %2546 = vmatprep.subr.bf16.mxu0 %v6333_v6  ;;  %v804_v6 = vld [vmem:[%s10586_s5 + $0x330] sm:$0xff] }
 0x22f   :  { %2461 = vmatpush1.bf16.msra.mxu1 %v6330_v12  ;;  %v6386_v12 = vcombine.low %v792_v61, %v796_v62  ;;  %v6428_v61 = vcombine.low %v833_v45, %v837_v47  ;;  %v849_v62 = vld [vmem:[%s10586_s5 + $0x498] sm:$0xff]  ;;  %v896_v47 = vld [vmem:[%s10586_s5 + $0x610] sm:$0xff] }
 0x230   :  { %2547 = vmatpush1.bf16.msra.mxu0 %v6332_v53  ;;  %2462 = vmatprep.subr.bf16.mxu1 %v6339_v13  ;;  %v6388_v53 = vcombine.low %v793_v63, %v797_v1  ;;  %v6395_v13 = vcombine.high %v800_v5, %v804_v6  ;;  %v853_v63 = vld [vmem:[%s10586_s5 + $0x4b8] sm:$0xff] }
 0x231   :  { %2548 = vmatprep.subr.bf16.mxu0 %v6341_v23  ;;  %v6397_v23 = vcombine.high %v801_v7, %v805_v11 }
 0x233   :  { %2463 = vmatpush1.bf16.msra.mxu1 %v6338_v25  ;;  %v6394_v25 = vcombine.low %v800_v5, %v804_v6 }
 0x234   :  { %2549 = vmatpush1.bf16.msra.mxu0 %v6340_v26  ;;  %2464 = vmatprep.subr.bf16.mxu1 %v6347_v27  ;;  %v6396_v26 = vcombine.low %v801_v7, %v805_v11  ;;  %v6403_v27 = vcombine.high %v808_v14, %v812_v18  ;;  %v857_v7 = vld [vmem:[%s10586_s5 + $0x4d8] sm:$0xff] }
 0x235   :  { %2550 = vmatprep.subr.bf16.mxu0 %v6349_v19  ;;  %v6405_v19 = vcombine.high %v809_v20, %v813_v24 }
 0x237   :  { %2465 = vmatpush1.bf16.msra.mxu1 %v6346_v22  ;;  %v6402_v22 = vcombine.low %v808_v14, %v812_v18  ;;  %v869_v18 = vld [vmem:[%s10586_s5 + $0x538] sm:$0xff] }
 0x238   :  { %2551 = vmatpush1.bf16.msra.mxu0 %v6348_v28  ;;  %2466 = vmatprep.subr.bf16.mxu1 %v6355_v29  ;;  %v6404_v28 = vcombine.low %v809_v20, %v813_v24  ;;  %v6411_v29 = vcombine.high %v816_v15, %v820_v16  ;;  %v872_v24 = vld [vmem:[%s10586_s5 + $0x550] sm:$0xff] }
 0x239   :  { %2552 = vmatprep.subr.bf16.mxu0 %v6357_v35  ;;  %v6413_v35 = vcombine.high %v817_v17, %v821_v21  ;;  %v880_v21 = vld [vmem:[%s10586_s5 + $0x590] sm:$0xff] }
 0x23b   :  { %2467 = vmatpush1.bf16.msra.mxu1 %v6354_v38  ;;  %v6410_v38 = vcombine.low %v816_v15, %v820_v16  ;;  %v873_v15 = vld [vmem:[%s10586_s5 + $0x558] sm:$0xff] }
 0x23c   :  { %2553 = vmatpush1.bf16.msra.mxu0 %v6356_v40  ;;  %2468 = vmatprep.subr.bf16.mxu1 %v6363_v41  ;;  %v832_v40 = vld [vmem:[%s10586_s5 + $0x410] sm:$0xff]  ;;  %v877_v16 = vld [vmem:[%s10586_s5 + $0x578] sm:$0xff] }
 0x23d   :  { %2554 = vmatprep.subr.bf16.mxu0 %v6365_v46  ;;  %v836_v41 = vld [vmem:[%s10586_s5 + $0x430] sm:$0xff]  ;;  %v6421_v46 = vcombine.high %v825_v33, %v829_v36 }
 0x23f   :  { %2469 = vmatpush1.bf16.msra.mxu1 %v6362_v48  ;;  %v6418_v48 = vcombine.low %v824_v30, %v828_v31  ;;  %v881_v30 = vld [vmem:[%s10586_s5 + $0x598] sm:$0xff] }
 0x240   :  { %2555 = vmatpush1.bf16.msra.mxu0 %v6364_v49  ;;  %2470 = vmatprep.subr.bf16.mxu1 %v6371_v50  ;;  %v6420_v49 = vcombine.low %v825_v33, %v829_v36  ;;  %v6427_v50 = vcombine.high %v832_v40, %v836_v41  ;;  %v885_v31 = vld [vmem:[%s10586_s5 + $0x5b8] sm:$0xff]  ;;  %v6469_v33 = vcombine.high %v873_v15, %v877_v16  ;;  %v888_v36 = vld [vmem:[%s10586_s5 + $0x5d0] sm:$0xff] }
 0x241   :  { %2556 = vmatprep.subr.bf16.mxu0 %v6373_v57  ;;  %v841_v57 = vld [vmem:[%s10586_s5 + $0x458] sm:$0xff]  ;;  %v6477_v45 = vcombine.high %v881_v30, %v885_v31 }
 0x242   :  { %v6437_v1 = vcombine.high %v841_v57, %v845_v9  ;;  %v6436_v5 = vcombine.low %v841_v57, %v845_v9  ;;  %v904_v9 = vld [vmem:[%s10586_s5 + $0x650] sm:$0xff] }
 0x243   :  { %2471 = vmatpush1.bf16.msra.mxu1 %v6370_v58  ;;  %v6426_v58 = vcombine.low %v832_v40, %v836_v41  ;;  %v6468_v40 = vcombine.low %v873_v15, %v877_v16  ;;  %v933_v15 = vld [vmem:[%s10586_s5 + $0x738] sm:$0xff] }
 0x244   :  { %2557 = vmatpush1.bf16.msra.mxu0 %v6372_v59  ;;  %2472 = vmatprep.subr.bf16.mxu1 %v6379_v60  ;;  %v848_v59 = vld [vmem:[%s10586_s5 + $0x490] sm:$0xff] }
 0x245   :  { %2558 = vmatprep.subr.bf16.mxu0 %v6381_v0  ;;  %v852_v60 = vld [vmem:[%s10586_s5 + $0x4b0] sm:$0xff]  ;;  %v6435_v0 = vcombine.high %v840_v51, %v844_v52 }
 0x246   :  { %v6443_v6 = vcombine.high %v848_v59, %v852_v60  ;;  %v6442_v11 = vcombine.low %v848_v59, %v852_v60 }
 0x247   :  { %2473 = vmatpush1.bf16.msra.mxu1 %v6378_v2  ;;  %v6434_v2 = vcombine.low %v840_v51, %v844_v52  ;;  %v897_v51 = vld [vmem:[%s10586_s5 + $0x618] sm:$0xff] }
 0x248   :  { %2559 = vmatpush1.bf16.msra.mxu0 %v6380_v3  ;;  %2474 = vmatprep.subr.bf16.mxu1 %v6387_v4  ;;  %v856_v3 = vld [vmem:[%s10586_s5 + $0x4d0] sm:$0xff]  ;;  %v901_v52 = vld [vmem:[%s10586_s5 + $0x638] sm:$0xff] }
 0x249   :  { %2560 = vmatprep.subr.bf16.mxu0 %v6389_v10  ;;  %v860_v4 = vld [vmem:[%s10586_s5 + $0x4f0] sm:$0xff]  ;;  %v6445_v10 = vcombine.high %v849_v62, %v853_v63 }
 0x24a   :  { %v6451_v14 = vcombine.high %v856_v3, %v860_v4 }
 0x24b   :  { %2475 = vmatpush1.bf16.msra.mxu1 %v6386_v12  ;;  %v864_v12 = vld [vmem:[%s10586_s5 + $0x510] sm:$0xff] }
 0x24c   :  { %2561 = vmatpush1.bf16.msra.mxu0 %v6388_v53  ;;  %2476 = vmatprep.subr.bf16.mxu1 %v6395_v13  ;;  %v868_v53 = vld [vmem:[%s10586_s5 + $0x530] sm:$0xff]  ;;  %v6444_v13 = vcombine.low %v849_v62, %v853_v63  ;;  %v909_v62 = vld [vmem:[%s10586_s5 + $0x678] sm:$0xff]  ;;  %v6493_v63 = vcombine.high %v897_v51, %v901_v52 }
 0x24d   :  { %2562 = vmatprep.subr.bf16.mxu0 %v6397_v23  ;;  %v6450_v23 = vcombine.low %v856_v3, %v860_v4  ;;  %v916_v4 = vld [vmem:[%s10586_s5 + $0x6b0] sm:$0xff] }
 0x24f   :  { %2477 = vmatpush1.bf16.msra.mxu1 %v6394_v25  ;;  %v876_v25 = vld [vmem:[%s10586_s5 + $0x570] sm:$0xff] }
 0x250   :  { %2563 = vmatpush1.bf16.msra.mxu0 %v6396_v26  ;;  %2478 = vmatprep.subr.bf16.mxu1 %v6403_v27  ;;  %v6459_v27 = vcombine.high %v864_v12, %v868_v53 }
 0x251   :  { %2564 = vmatprep.subr.bf16.mxu0 %v6405_v19  ;;  %v6458_v19 = vcombine.low %v864_v12, %v868_v53  ;;  %v920_v53 = vld [vmem:[%s10586_s5 + $0x6d0] sm:$0xff] }
 0x253   :  { %2479 = vmatpush1.bf16.msra.mxu1 %v6402_v22  ;;  %v884_v22 = vld [vmem:[%s10586_s5 + $0x5b0] sm:$0xff] }
 0x254   :  { %2565 = vmatpush1.bf16.msra.mxu0 %v6404_v28  ;;  %2480 = vmatprep.subr.bf16.mxu1 %v6411_v29  ;;  %v6467_v29 = vcombine.high %v872_v24, %v876_v25  ;;  %v6475_v41 = vcombine.high %v880_v21, %v884_v22 }
 0x255   :  { %2566 = vmatprep.subr.bf16.mxu0 %v6413_v35  ;;  %v6466_v35 = vcombine.low %v872_v24, %v876_v25  ;;  %v928_v25 = vld [vmem:[%s10586_s5 + $0x710] sm:$0xff] }
 0x257   :  { %2481 = vmatpush1.bf16.msra.mxu1 %v6410_v38  ;;  %v892_v38 = vld [vmem:[%s10586_s5 + $0x5f0] sm:$0xff] }
 0x258   :  { %2567 = vmatpush1.bf16.msra.mxu0 %v6412_v43  ;;  %2482 = vmatprep.subr.bf16.mxu1 %v6419_v44  ;;  %v889_v43 = vld [vmem:[%s10586_s5 + $0x5d8] sm:$0xff]  ;;  %v6482_v57 = vcombine.low %v888_v36, %v892_v38 }
 0x259   :  { %2568 = vmatprep.subr.bf16.mxu0 %v6421_v46  ;;  %v893_v44 = vld [vmem:[%s10586_s5 + $0x5f8] sm:$0xff]  ;;  %v6474_v46 = vcombine.low %v880_v21, %v884_v22  ;;  %v936_v22 = vld [vmem:[%s10586_s5 + $0x750] sm:$0xff] }
 0x25a   :  { %v6484_v59 = vcombine.low %v889_v43, %v893_v44 }
 0x25b   :  { %2483 = vmatpush1.bf16.msra.mxu1 %v6418_v48  ;;  %v900_v48 = vld [vmem:[%s10586_s5 + $0x630] sm:$0xff] }
 0x25c   :  { %2569 = vmatpush1.bf16.msra.mxu0 %v6420_v49  ;;  %2495 = vmatprep.subr.bf16.mxu1 %v6427_v50  ;;  %v6476_v49 = vcombine.low %v881_v30, %v885_v31  ;;  %v6483_v50 = vcombine.high %v888_v36, %v892_v38  ;;  %v6491_v60 = vcombine.high %v896_v47, %v900_v48  ;;  %v941_v30 = vld [vmem:[%s10586_s5 + $0x778] sm:$0xff]  ;;  %v944_v38 = vld [vmem:[%s10586_s5 + $0x790] sm:$0xff] }
 0x25d   :  { %2581 = vmatprep.subr.bf16.mxu0 %v6429_v55  ;;  %v6485_v55 = vcombine.high %v889_v43, %v893_v44  ;;  %v949_v43 = vld [vmem:[%s10586_s5 + $0x7b8] sm:$0xff] }
 0x25e   :  { %2485 = vmatmul.mubr.bf16.vlgmr.msra.gmra.mrb[4].mxu1 %v8508_v8 }
 0x25f   :  { %2571 = vmatmul.mubr.bf16.vlgmr.msra.gmra.mrb[16].mxu0 %v8508_v8  ;;  %2496 = vmatpush1.bf16.msra.mxu1 %v6426_v58  ;;  %v861_v8 = vld [vmem:[%s10586_s5 + $0x4f8] sm:$0xff]  ;;  %v908_v58 = vld [vmem:[%s10586_s5 + $0x670] sm:$0xff] }
 0x260   :  { %2527 = vmatprep.mubr.bf16.mxu1 %v8726_v37  ;;  %2582 = vmatpush1.bf16.msra.mxu0 %v6428_v61  ;;  %v6453_v20 = vcombine.high %v857_v7, %v861_v8  ;;  %v6452_v26 = vcombine.low %v857_v7, %v861_v8  ;;  %v905_v61 = vld [vmem:[%s10586_s5 + $0x658] sm:$0xff]  ;;  %v6499_v3 = vcombine.high %v904_v9, %v908_v58 }
 0x261   :  { %2613 = vmatprep.mubr.bf16.mxu0 %v8726_v37  ;;  %2497 = vmatprep.subr.bf16.mxu1 %v6435_v0  ;;  %v865_v37 = vld [vmem:[%s10586_s5 + $0x518] sm:$0xff]  ;;  %v6490_v0 = vcombine.low %v896_v47, %v900_v48  ;;  %v6498_v8 = vcombine.low %v904_v9, %v908_v58  ;;  %v952_v48 = vld [vmem:[%s10586_s5 + $0x7d0] sm:$0xff]  ;;  %v7290_v58 = vld [vmem:[%s10589_s7 + $0x4] ss:$28 sps:$4 sm:$0xff]  }
 0x262   :  { %2583 = vmatprep.subr.bf16.mxu0 %v6437_v1  ;;  %v6461_v17 = vcombine.high %v865_v37, %v869_v18  ;;  %v6460_v28 = vcombine.low %v865_v37, %v869_v18  ;;  %v912_v1 = vld [vmem:[%s10586_s5 + $0x690] sm:$0xff]  ;;  %v917_v7 = vld [vmem:[%s10586_s5 + $0x6b8] sm:$0xff] }
 0x263   :  { %2498 = vmatpush1.bf16.msra.mxu1 %v6434_v2  ;;  %v6492_v2 = vcombine.low %v897_v51, %v901_v52  ;;  %v925_v37 = vld [vmem:[%s10586_s5 + $0x6f8] sm:$0xff]  ;;  %v6506_v18 = vcombine.low %v912_v1, %v916_v4 }
 0x264   :  { %2584 = vmatpush1.bf16.msra.mxu0 %v6436_v5  ;;  %2499 = vmatprep.subr.bf16.mxu1 %v6443_v6  ;;  %v6501_v5 = vcombine.high %v905_v61, %v909_v62  ;;  %v913_v6 = vld [vmem:[%s10586_s5 + $0x698] sm:$0xff] }
 0x265   :  { %2585 = vmatprep.subr.bf16.mxu0 %v6445_v10  ;;  %v6500_v10 = vcombine.low %v905_v61, %v909_v62  ;;  %v6509_v12 = vcombine.high %v913_v6, %v917_v7  ;;  %v957_v51 = vld [vmem:[%s10586_s5 + $0x7f8] sm:$0xff]  ;;  %v7293_v62 = vld [vmem:[%s10589_s7 + $0xc] ss:$28 sps:$4 sm:$0xff]  }
 0x266   :  { %v7288_v61 = vld [vmem:[%s10589_s7] ss:$28 sps:$4 sm:$0xff]  }
 0x267   :  { %2500 = vmatpush1.bf16.msra.mxu1 %v6442_v11  ;;  %v6507_v11 = vcombine.high %v912_v1, %v916_v4  ;;  %v7294_v1 = vld [vmem:[%s10589_s7 + $0x38] ss:$28 sps:$4 sm:$0xff]  }
 0x268   :  { %2586 = vmatpush1.bf16.msra.mxu0 %v6444_v13  ;;  %2501 = vmatprep.subr.bf16.mxu1 %v6451_v14  ;;  %v924_v13 = vld [vmem:[%s10586_s5 + $0x6f0] sm:$0xff]  ;;  %v921_v14 = vld [vmem:[%s10586_s5 + $0x6d8] sm:$0xff] }
 0x269   :  { %2587 = vmatprep.subr.bf16.mxu0 %v6453_v20  ;;  %v6508_v20 = vcombine.low %v913_v6, %v917_v7  ;;  %v6517_v24 = vcombine.high %v921_v14, %v925_v37  ;;  %v6514_v16 = vcombine.low %v920_v53, %v924_v13  ;;  %v7302_v4 = vld [vmem:[%s10589_s7 + $0x74] ss:$28 sps:$4 sm:$0xff]   ;;  %v7305_v6 = vld [vmem:[%s10589_s7 + $0x7c] ss:$28 sps:$4 sm:$0xff]  }
 0x26a   :  { %v7303_v7 = vld [vmem:[%s10589_s7 + $0x78] ss:$28 sps:$4 sm:$0xff]  }
 0x26b   :  { %2502 = vmatpush1.bf16.msra.mxu1 %v6450_v23  ;;  %v6515_v23 = vcombine.high %v920_v53, %v924_v13  ;;  %v7312_v53 = vld [vmem:[%s10589_s7 + $0xe0] ss:$28 sps:$4 sm:$0xff]   ;;  %v7317_v13 = vld [vmem:[%s10589_s7 + $0xec] ss:$28 sps:$4 sm:$0xff]  }
 0x26c   :  { %2588 = vmatpush1.bf16.msra.mxu0 %v6452_v26  ;;  %2503 = vmatprep.subr.bf16.mxu1 %v6459_v27  ;;  %v932_v26 = vld [vmem:[%s10586_s5 + $0x730] sm:$0xff]  ;;  %v929_v27 = vld [vmem:[%s10586_s5 + $0x718] sm:$0xff] }
 0x26d   :  { %2589 = vmatprep.subr.bf16.mxu0 %v6461_v17  ;;  %v6516_v17 = vcombine.low %v921_v14, %v925_v37  ;;  %v6525_v21 = vcombine.high %v929_v27, %v933_v15  ;;  %v6522_v31 = vcombine.low %v928_v25, %v932_v26  ;;  %v7315_v14 = vld [vmem:[%s10589_s7 + $0xe8] ss:$28 sps:$4 sm:$0xff]   ;;  %v7320_v37 = vld [vmem:[%s10589_s7 + $0x11c] ss:$28 sps:$4 sm:$0xff]  }
 0x26f   :  { %2504 = vmatpush1.bf16.msra.mxu1 %v6458_v19  ;;  %v6523_v19 = vcombine.high %v928_v25, %v932_v26  ;;  %v7324_v25 = vld [vmem:[%s10589_s7 + $0x150] ss:$28 sps:$4 sm:$0xff]   ;;  %v7329_v26 = vld [vmem:[%s10589_s7 + $0x15c] ss:$28 sps:$4 sm:$0xff]  }
 0x270   :  { %2590 = vmatpush1.bf16.msra.mxu0 %v6460_v28  ;;  %2505 = vmatprep.subr.bf16.mxu1 %v6467_v29  ;;  %v940_v28 = vld [vmem:[%s10586_s5 + $0x770] sm:$0xff]  ;;  %v937_v29 = vld [vmem:[%s10586_s5 + $0x758] sm:$0xff] }
 0x271   :  { %2591 = vmatprep.subr.bf16.mxu0 %v6469_v33  ;;  %v6524_v33 = vcombine.low %v929_v27, %v933_v15  ;;  %v6533_v36 = vcombine.high %v937_v29, %v941_v30  ;;  %v6530_v44 = vcombine.low %v936_v22, %v940_v28  ;;  %v7327_v27 = vld [vmem:[%s10589_s7 + $0x158] ss:$28 sps:$4 sm:$0xff]   ;;  %v7332_v15 = vld [vmem:[%s10589_s7 + $0x18c] ss:$28 sps:$4 sm:$0xff]  }
 0x273   :  { %2506 = vmatpush1.bf16.msra.mxu1 %v6466_v35  ;;  %v6531_v35 = vcombine.high %v936_v22, %v940_v28  ;;  %v7341_v22 = vld [vmem:[%s10589_s7 + $0x1cc] ss:$28 sps:$4 sm:$0xff]   ;;  %v7336_v28 = vld [vmem:[%s10589_s7 + $0x1c0] ss:$28 sps:$4 sm:$0xff]  }
 0x274   :  { %2592 = vmatpush1.bf16.msra.mxu0 %v6468_v40  ;;  %2507 = vmatprep.subr.bf16.mxu1 %v6475_v41  ;;  %v948_v40 = vld [vmem:[%s10586_s5 + $0x7b0] sm:$0xff]  ;;  %v945_v41 = vld [vmem:[%s10586_s5 + $0x798] sm:$0xff] }
 0x275   :  { %2593 = vmatprep.subr.bf16.mxu0 %v6477_v45  ;;  %v6532_v45 = vcombine.low %v937_v29, %v941_v30  ;;  %v6541_v47 = vcombine.high %v945_v41, %v949_v43  ;;  %v6538_v52 = vcombine.low %v944_v38, %v948_v40  ;;  %v7339_v29 = vld [vmem:[%s10589_s7 + $0x1c8] ss:$28 sps:$4 sm:$0xff]   ;;  %v7344_v30 = vld [vmem:[%s10589_s7 + $0x1fc] ss:$28 sps:$4 sm:$0xff]  }
 0x277   :  { %2508 = vmatpush1.bf16.msra.mxu1 %v6474_v46  ;;  %v6539_v46 = vcombine.high %v944_v38, %v948_v40  ;;  %v7348_v38 = vld [vmem:[%s10589_s7 + $0x230] ss:$28 sps:$4 sm:$0xff]   ;;  %v7353_v40 = vld [vmem:[%s10589_s7 + $0x23c] ss:$28 sps:$4 sm:$0xff]  }
 0x278   :  { %2594 = vmatpush1.bf16.msra.mxu0 %v6476_v49  ;;  %2509 = vmatprep.subr.bf16.mxu1 %v6483_v50  ;;  %v956_v49 = vld [vmem:[%s10586_s5 + $0x7f0] sm:$0xff]  ;;  %v953_v50 = vld [vmem:[%s10586_s5 + $0x7d8] sm:$0xff] }
 0x279   :  { %2595 = vmatprep.subr.bf16.mxu0 %v6485_v55  ;;  %v6540_v55 = vcombine.low %v945_v41, %v949_v43  ;;  %v6549_v9 = vcombine.high %v953_v50, %v957_v51  ;;  %v7351_v41 = vld [vmem:[%s10589_s7 + $0x238] ss:$28 sps:$4 sm:$0xff]   ;;  %v7356_v43 = vld [vmem:[%s10589_s7 + $0x26c] ss:$28 sps:$4 sm:$0xff]  }
 0x27b   :  { %2510 = vmatpush1.bf16.msra.mxu1 %v6482_v57  ;;  %v6547_v57 = vcombine.high %v952_v48, %v956_v49 }
 0x27c   :  { %2596 = vmatpush1.bf16.msra.mxu0 %v6484_v59  ;;  %2511 = vmatprep.subr.bf16.mxu1 %v6491_v60  ;;  %v6546_v59 = vcombine.low %v952_v48, %v956_v49  ;;  %v6548_v60 = vcombine.low %v953_v50, %v957_v51  ;;  %v7360_v48 = vld [vmem:[%s10589_s7 + $0x2a0] ss:$28 sps:$4 sm:$0xff]   ;;  %v7365_v49 = vld [vmem:[%s10589_s7 + $0x2ac] ss:$28 sps:$4 sm:$0xff]  }
 0x27d   :  { %2597 = vmatprep.subr.bf16.mxu0 %v6493_v63  ;;  %v7291_v63 = vld [vmem:[%s10589_s7 + $0x8] ss:$28 sps:$4 sm:$0xff]   ;;  %v7368_v51 = vld [vmem:[%s10589_s7 + $0x2dc] ss:$28 sps:$4 sm:$0xff]  }
 0x27e   :  { %v7363_v50 = vld [vmem:[%s10589_s7 + $0x2a8] ss:$28 sps:$4 sm:$0xff]  }
 0x27f   :  { %2512 = vmatpush1.bf16.msra.mxu1 %v6490_v0  ;;  %v7296_v0 = vld [vmem:[%s10589_s7 + $0x3c] ss:$28 sps:$4 sm:$0xff]  }
 0x280   :  { %2598 = vmatpush1.bf16.msra.mxu0 %v6492_v2  ;;  %2513 = vmatprep.subr.bf16.mxu1 %v6499_v3  ;;  %v7299_v2 = vld [vmem:[%s10589_s7 + $0x44] ss:$28 sps:$4 sm:$0xff]  }
 0x281   :  { %2599 = vmatprep.subr.bf16.mxu0 %v6501_v5  ;;  %v7297_v3 = vld [vmem:[%s10589_s7 + $0x40] ss:$28 sps:$4 sm:$0xff]   ;;  %v7300_v5 = vld [vmem:[%s10589_s7 + $0x70] ss:$28 sps:$4 sm:$0xff]  }
 0x283   :  { %2514 = vmatpush1.bf16.msra.mxu1 %v6498_v8  ;;  %v7306_v8 = vld [vmem:[%s10589_s7 + $0xa8] ss:$28 sps:$4 sm:$0xff]  }
 0x284   :  { %2600 = vmatpush1.bf16.msra.mxu0 %v6500_v10  ;;  %2515 = vmatprep.subr.bf16.mxu1 %v6507_v11  ;;  %v7311_v10 = vld [vmem:[%s10589_s7 + $0xb4] ss:$28 sps:$4 sm:$0xff]  }
 0x285   :  { %2601 = vmatprep.subr.bf16.mxu0 %v6509_v12  ;;  %v7309_v11 = vld [vmem:[%s10589_s7 + $0xb0] ss:$28 sps:$4 sm:$0xff]   ;;  %v7314_v12 = vld [vmem:[%s10589_s7 + $0xe4] ss:$28 sps:$4 sm:$0xff]  }
 0x287   :  { %2516 = vmatpush1.bf16.msra.mxu1 %v6506_v18  ;;  %v7318_v18 = vld [vmem:[%s10589_s7 + $0x118] ss:$28 sps:$4 sm:$0xff]  }
 0x288   :  { %2602 = vmatpush1.bf16.msra.mxu0 %v6508_v20  ;;  %2517 = vmatprep.subr.bf16.mxu1 %v6515_v23  ;;  %v7323_v20 = vld [vmem:[%s10589_s7 + $0x124] ss:$28 sps:$4 sm:$0xff]  }
 0x289   :  { %2603 = vmatprep.subr.bf16.mxu0 %v6517_v24  ;;  %v7321_v23 = vld [vmem:[%s10589_s7 + $0x120] ss:$28 sps:$4 sm:$0xff]   ;;  %v7326_v24 = vld [vmem:[%s10589_s7 + $0x154] ss:$28 sps:$4 sm:$0xff]  }
 0x28b   :  { %2518 = vmatpush1.bf16.msra.mxu1 %v6514_v16  ;;  %v7330_v16 = vld [vmem:[%s10589_s7 + $0x188] ss:$28 sps:$4 sm:$0xff]  }
 0x28c   :  { %2604 = vmatpush1.bf16.msra.mxu0 %v6516_v17  ;;  %2519 = vmatprep.subr.bf16.mxu1 %v6523_v19  ;;  %v7335_v17 = vld [vmem:[%s10589_s7 + $0x194] ss:$28 sps:$4 sm:$0xff]  }
 0x28d   :  { %2605 = vmatprep.subr.bf16.mxu0 %v6525_v21  ;;  %v7333_v19 = vld [vmem:[%s10589_s7 + $0x190] ss:$28 sps:$4 sm:$0xff]   ;;  %v7338_v21 = vld [vmem:[%s10589_s7 + $0x1c4] ss:$28 sps:$4 sm:$0xff]  }
 0x28f   :  { %2520 = vmatpush1.bf16.msra.mxu1 %v6522_v31  ;;  %v7342_v31 = vld [vmem:[%s10589_s7 + $0x1f8] ss:$28 sps:$4 sm:$0xff]  }
 0x290   :  { %2606 = vmatpush1.bf16.msra.mxu0 %v6524_v33  ;;  %2521 = vmatprep.subr.bf16.mxu1 %v6531_v35  ;;  %v7347_v33 = vld [vmem:[%s10589_s7 + $0x204] ss:$28 sps:$4 sm:$0xff]  }
 0x291   :  { %2607 = vmatprep.subr.bf16.mxu0 %v6533_v36  ;;  %v7345_v35 = vld [vmem:[%s10589_s7 + $0x200] ss:$28 sps:$4 sm:$0xff]   ;;  %v7350_v36 = vld [vmem:[%s10589_s7 + $0x234] ss:$28 sps:$4 sm:$0xff]  }
 0x293   :  { %2522 = vmatpush1.bf16.msra.mxu1 %v6530_v44  ;;  %v7354_v44 = vld [vmem:[%s10589_s7 + $0x268] ss:$28 sps:$4 sm:$0xff]  }
 0x294   :  { %2608 = vmatpush1.bf16.msra.mxu0 %v6532_v45  ;;  %2523 = vmatprep.subr.bf16.mxu1 %v6539_v46  ;;  %v7359_v45 = vld [vmem:[%s10589_s7 + $0x274] ss:$28 sps:$4 sm:$0xff]  }
 0x295   :  { %2609 = vmatprep.subr.bf16.mxu0 %v6541_v47  ;;  %v7357_v46 = vld [vmem:[%s10589_s7 + $0x270] ss:$28 sps:$4 sm:$0xff]   ;;  %v7362_v47 = vld [vmem:[%s10589_s7 + $0x2a4] ss:$28 sps:$4 sm:$0xff]  }
 0x297   :  { %2524 = vmatpush1.bf16.msra.mxu1 %v6538_v52  ;;  %v7366_v52 = vld [vmem:[%s10589_s7 + $0x2d8] ss:$28 sps:$4 sm:$0xff]  }
 0x298   :  { %2610 = vmatpush1.bf16.msra.mxu0 %v6540_v55  ;;  %2525 = vmatprep.subr.bf16.mxu1 %v6547_v57  ;;  %v7371_v55 = vld [vmem:[%s10589_s7 + $0x2e4] ss:$28 sps:$4 sm:$0xff]  }
 0x299   :  { %2611 = vmatprep.subr.bf16.mxu0 %v6549_v9  ;;  %v7369_v57 = vld [vmem:[%s10589_s7 + $0x2e0] ss:$28 sps:$4 sm:$0xff]   ;;  %v7374_v9 = vld [vmem:[%s10589_s7 + $0x314] ss:$28 sps:$4 sm:$0xff]  }
 0x29b   :  { %2526 = vmatpush1.bf16.msra.mxu1 %v6546_v59  ;;  %v7377_v59 = vld [vmem:[%s10589_s7 + $0x31c] ss:$28 sps:$4 sm:$0xff]  }
 0x29c   :  { %2612 = vmatpush1.bf16.msra.mxu0 %v6548_v60  ;;  %5501 = vmatprep.subr.bf16.mxu1 %v7290_v58  ;;  %v7372_v58 = vld [vmem:[%s10589_s7 + $0x310] ss:$28 sps:$4 sm:$0xff]   ;;  %v7375_v60 = vld [vmem:[%s10589_s7 + $0x318] ss:$28 sps:$4 sm:$0xff]  }
 0x29d   :  { %5673 = vmatprep.subr.bf16.mxu0 %v7293_v62  ;;  %v7378_v62 = vld [vmem:[%s10589_s7 + $0x348] ss:$28 sps:$4 sm:$0xff]  }
 0x29e   :  { %2528 = vmatmul.mubr.bf16.vlgmr.msra.gmra.mrb[4].mxu1 %v8715_v32 }
 0x29f   :  { %2614 = vmatmul.mubr.bf16.vlgmr.msra.gmra.mrb[16].mxu0 %v8715_v32  ;;  %5502 = vmatpush1.bf16.msra.mxu1 %v7288_v61  ;;  %v7308_v32 = vld [vmem:[%s10589_s7 + $0xac] ss:$28 sps:$4 sm:$0xff]  }
 0x2a0   :  { %5674 = vmatpush1.bf16.msra.mxu0 %v7291_v63  ;;  %5503 = vmatprep.subr.bf16.mxu1 %v7296_v0  ;;  %v7380_v61 = vld [vmem:[%s10589_s7 + $0x34c] ss:$28 sps:$4 sm:$0xff]   ;;  %v7383_v63 = vld [vmem:[%s10589_s7 + $0x354] ss:$28 sps:$4 sm:$0xff]  }
 0x2a1   :  { %5675 = vmatprep.subr.bf16.mxu0 %v7299_v2  ;;  %v7381_v0 = vld [vmem:[%s10589_s7 + $0x350] ss:$28 sps:$4 sm:$0xff]  }
 0x2a2   :  { %v7389_v2 = vld [vmem:[%s10589_s7 + $0x38c] ss:$28 sps:$4 sm:$0xff]  }
 0x2a3   :  { %5504 = vmatpush1.bf16.msra.mxu1 %v7294_v1  ;;  %v7386_v1 = vld [vmem:[%s10589_s7 + $0x384] ss:$28 sps:$4 sm:$0xff]  }
 0x2a4   :  { %5676 = vmatpush1.bf16.msra.mxu0 %v7297_v3  ;;  %5505 = vmatprep.subr.bf16.mxu1 %v7302_v4  ;;  %v9301_v3 = vld [vmem:[%s10590_s6] sm:$0xff] }
 0x2a5   :  { %5677 = vmatprep.subr.bf16.mxu0 %v7305_v6  ;;  %v963_v4 = vrot.slane %v9301_v3, %v8238_v39  ;;  %v967_v6 = vrot.slane %v9301_v3, %v8244_v42 }
 0x2a7   :  { %5506 = vmatpush1.bf16.msra.mxu1 %v7300_v5  ;;  %v971_v5 = vrot.slane %v9301_v3, %v8667_v54 }
 0x2a8   :  { %5678 = vmatpush1.bf16.msra.mxu0 %v7303_v7  ;;  %5507 = vmatprep.subr.bf16.mxu1 %v7308_v32  ;;  %v975_v7 = vrot.slane %v9301_v3, %v8673_v56 }
 0x2a9   :  { %5679 = vmatprep.subr.bf16.mxu0 %v7311_v10 }
 0x2ab   :  { %5508 = vmatpush1.bf16.msra.mxu1 %v7306_v8 }
 0x2ac   :  { %5680 = vmatpush1.bf16.msra.mxu0 %v7309_v11  ;;  %5509 = vmatprep.subr.bf16.mxu1 %v7314_v12 }
 0x2ad   :  { %5681 = vmatprep.subr.bf16.mxu0 %v7317_v13 }
 0x2af   :  { %5510 = vmatpush1.bf16.msra.mxu1 %v7312_v53 }
 0x2b0   :  { %5682 = vmatpush1.bf16.msra.mxu0 %v7315_v14  ;;  %5511 = vmatprep.subr.bf16.mxu1 %v7320_v37 }
 0x2b1   :  { %5683 = vmatprep.subr.bf16.mxu0 %v7323_v20 }
 0x2b3   :  { %5512 = vmatpush1.bf16.msra.mxu1 %v7318_v18 }
 0x2b4   :  { %5684 = vmatpush1.bf16.msra.mxu0 %v7321_v23  ;;  %5513 = vmatprep.subr.bf16.mxu1 %v7326_v24 }
 0x2b5   :  { %5685 = vmatprep.subr.bf16.mxu0 %v7329_v26 }
 0x2b7   :  { %5514 = vmatpush1.bf16.msra.mxu1 %v7324_v25 }
 0x2b8   :  { %5686 = vmatpush1.bf16.msra.mxu0 %v7327_v27  ;;  %5515 = vmatprep.subr.bf16.mxu1 %v7332_v15 }
 0x2b9   :  { %5687 = vmatprep.subr.bf16.mxu0 %v7335_v17 }
 0x2bb   :  { %5516 = vmatpush1.bf16.msra.mxu1 %v7330_v16 }
 0x2bc   :  { %5688 = vmatpush1.bf16.msra.mxu0 %v7333_v19  ;;  %5517 = vmatprep.subr.bf16.mxu1 %v7338_v21 }
 0x2bd   :  { %5689 = vmatprep.subr.bf16.mxu0 %v7341_v22 }
 0x2bf   :  { %5518 = vmatpush1.bf16.msra.mxu1 %v7336_v28 }
 0x2c0   :  { %5690 = vmatpush1.bf16.msra.mxu0 %v7339_v29  ;;  %5519 = vmatprep.subr.bf16.mxu1 %v7344_v30 }
 0x2c1   :  { %5691 = vmatprep.subr.bf16.mxu0 %v7347_v33  ;;  %v7384_v33 = vld [vmem:[%s10589_s7 + $0x380] ss:$28 sps:$4 sm:$0xff]  }
 0x2c3   :  { %5520 = vmatpush1.bf16.msra.mxu1 %v7342_v31 }
 0x2c4   :  { %5692 = vmatpush1.bf16.msra.mxu0 %v7345_v35  ;;  %5521 = vmatprep.subr.bf16.mxu1 %v7350_v36  ;;  %v7387_v35 = vld [vmem:[%s10589_s7 + $0x388] ss:$28 sps:$4 sm:$0xff]  }
 0x2c5   :  { %5693 = vmatprep.subr.bf16.mxu0 %v7353_v40  ;;  %v7390_v40 = vld [vmem:[%s10589_s7 + $0x3b8] ss:$28 sps:$4 sm:$0xff]  }
 0x2c7   :  { %5522 = vmatpush1.bf16.msra.mxu1 %v7348_v38 }
 0x2c8   :  { %5694 = vmatpush1.bf16.msra.mxu0 %v7351_v41  ;;  %5523 = vmatprep.subr.bf16.mxu1 %v7356_v43  ;;  %v7392_v41 = vld [vmem:[%s10589_s7 + $0x3bc] ss:$28 sps:$4 sm:$0xff]   ;;  %v7395_v43 = vld [vmem:[%s10589_s7 + $0x3c4] ss:$28 sps:$4 sm:$0xff]  }
 0x2c9   :  { %5695 = vmatprep.subr.bf16.mxu0 %v7359_v45  ;;  %v7398_v45 = vld [vmem:[%s10589_s7 + $0x3f4] ss:$28 sps:$4 sm:$0xff]  }
 0x2cb   :  { %5524 = vmatpush1.bf16.msra.mxu1 %v7354_v44  ;;  %v7393_v44 = vld [vmem:[%s10589_s7 + $0x3c0] ss:$28 sps:$4 sm:$0xff]  }
 0x2cc   :  { %5696 = vmatpush1.bf16.msra.mxu0 %v7357_v46  ;;  %5525 = vmatprep.subr.bf16.mxu1 %v7362_v47  ;;  %v7401_v46 = vld [vmem:[%s10589_s7 + $0x3fc] ss:$28 sps:$4 sm:$0xff]   ;;  %v7396_v47 = vld [vmem:[%s10589_s7 + $0x3f0] ss:$28 sps:$4 sm:$0xff]  }
 0x2cd   :  { %5697 = vmatprep.subr.bf16.mxu0 %v7365_v49  ;;  %v7404_v49 = vld [vmem:[%s10589_s7 + $0x42c] ss:$28 sps:$4 sm:$0xff]  }
 0x2cf   :  { %5526 = vmatpush1.bf16.msra.mxu1 %v7360_v48  ;;  %v7399_v48 = vld [vmem:[%s10589_s7 + $0x3f8] ss:$28 sps:$4 sm:$0xff]  }
 0x2d0   :  { %5698 = vmatpush1.bf16.msra.mxu0 %v7363_v50  ;;  %5527 = vmatprep.subr.bf16.mxu1 %v7368_v51  ;;  %v7407_v50 = vld [vmem:[%s10589_s7 + $0x434] ss:$28 sps:$4 sm:$0xff]   ;;  %v7402_v51 = vld [vmem:[%s10589_s7 + $0x428] ss:$28 sps:$4 sm:$0xff]  }
 0x2d1   :  { %5699 = vmatprep.subr.bf16.mxu0 %v7371_v55  ;;  %v7410_v55 = vld [vmem:[%s10589_s7 + $0x464] ss:$28 sps:$4 sm:$0xff]  }
 0x2d3   :  { %5528 = vmatpush1.bf16.msra.mxu1 %v7366_v52  ;;  %v7405_v52 = vld [vmem:[%s10589_s7 + $0x430] ss:$28 sps:$4 sm:$0xff]  }
 0x2d4   :  { %5700 = vmatpush1.bf16.msra.mxu0 %v7369_v57  ;;  %5529 = vmatprep.subr.bf16.mxu1 %v7374_v9  ;;  %v7413_v57 = vld [vmem:[%s10589_s7 + $0x46c] ss:$28 sps:$4 sm:$0xff]   ;;  %v7408_v9 = vld [vmem:[%s10589_s7 + $0x460] ss:$28 sps:$4 sm:$0xff]  }
 0x2d5   :  { %5701 = vmatprep.subr.bf16.mxu0 %v7377_v59  ;;  %v7416_v59 = vld [vmem:[%s10589_s7 + $0x49c] ss:$28 sps:$4 sm:$0xff]  }
 0x2d7   :  { %5530 = vmatpush1.bf16.msra.mxu1 %v7372_v58  ;;  %v7411_v58 = vld [vmem:[%s10589_s7 + $0x468] ss:$28 sps:$4 sm:$0xff]  }
 0x2d8   :  { %5702 = vmatpush1.bf16.msra.mxu0 %v7375_v60  ;;  %5531 = vmatprep.subr.bf16.mxu1 %v7380_v61  ;;  %v7419_v60 = vld [vmem:[%s10589_s7 + $0x4a4] ss:$28 sps:$4 sm:$0xff]   ;;  %v7414_v61 = vld [vmem:[%s10589_s7 + $0x498] ss:$28 sps:$4 sm:$0xff]  }
 0x2d9   :  { %5703 = vmatprep.subr.bf16.mxu0 %v7383_v63  ;;  %v7422_v63 = vld [vmem:[%s10589_s7 + $0x4d4] ss:$28 sps:$4 sm:$0xff]  }
 0x2db   :  { %5532 = vmatpush1.bf16.msra.mxu1 %v7378_v62  ;;  %v7417_v62 = vld [vmem:[%s10589_s7 + $0x4a0] ss:$28 sps:$4 sm:$0xff]  }
 0x2dc   :  { %5704 = vmatpush1.bf16.msra.mxu0 %v7381_v0  ;;  %5544 = vmatprep.subr.bf16.mxu1 %v7386_v1  ;;  %v7425_v0 = vld [vmem:[%s10589_s7 + $0x4dc] ss:$28 sps:$4 sm:$0xff]   ;;  %v7420_v1 = vld [vmem:[%s10589_s7 + $0x4d0] ss:$28 sps:$4 sm:$0xff]  }
 0x2dd   :  { %5716 = vmatprep.subr.bf16.mxu0 %v7389_v2  ;;  %v7423_v2 = vld [vmem:[%s10589_s7 + $0x4d8] ss:$28 sps:$4 sm:$0xff]  }
 0x2f1   :  { %v2357_v32 = vpop.f32.mrb[0].mxu1  ;;  %v2443_v8 = vpop.f32.mrb[12].mxu0 }
 0x2f2   :  { %v7086_v10 = vadd.f32 %v2357_v32, %v963_v4  ;;  %v7090_v11 = vadd.f32 %v2443_v8, %v971_v5  ;;  %v2359_v12 = vpop.f32.mrb[1].mxu1  ;;  %v2445_v53 = vpop.f32.mrb[13].mxu0  ;;  %v7434_v32 = vld [vmem:[%s10589_s7 + $0x544] ss:$28 sps:$4 sm:$0xff]   ;;  %v7437_v8 = vld [vmem:[%s10589_s7 + $0x54c] ss:$28 sps:$4 sm:$0xff]  }
 0x2f3   :  { %v7087_v13 = vadd.f32 %v2359_v12, %v967_v6  ;;  %v7091_v14 = vadd.f32 %v2445_v53, %v975_v7  ;;  %v2361_v37 = vpop.f32.mrb[2].mxu1  ;;  %v2447_v18 = vpop.f32.mrb[14].mxu0  ;;  %v7440_v12 = vld [vmem:[%s10589_s7 + $0x57c] ss:$28 sps:$4 sm:$0xff]   ;;  %v7443_v53 = vld [vmem:[%s10589_s7 + $0x584] ss:$28 sps:$4 sm:$0xff]  }
 0x2f4   :  { %v7088_v20 = vadd.f32 %v2361_v37, %v963_v4  ;;  %v7092_v23 = vadd.f32 %v2447_v18, %v971_v5  ;;  %v2363_v24 = vpop.f32.mrb[3].mxu1  ;;  %v2449_v25 = vpop.f32.mrb[15].mxu0  ;;  %v2624_v26 = vmax.f32 %v7086_v10, 0.0  ;;  %v2626_v27 = vmax.f32 %v7090_v11, 0.0  ;;  %v7428_v4 = vld [vmem:[%s10589_s7 + $0x50c] ss:$28 sps:$4 sm:$0xff]  }
 0x2f5   :  { %v7089_v15 = vadd.f32 %v2363_v24, %v967_v6  ;;  %v7093_v16 = vadd.f32 %v2449_v25, %v975_v7  ;;  %v2625_v21 = vmax.f32 %v7087_v13, 0.0  ;;  %v2627_v22 = vmax.f32 %v7091_v14, 0.0  ;;  %v7431_v5 = vld [vmem:[%s10589_s7 + $0x514] ss:$28 sps:$4 sm:$0xff]   ;;  %v7426_v6 = vld [vmem:[%s10589_s7 + $0x508] ss:$28 sps:$4 sm:$0xff]  }
 0x2f6   :  { %v2632_v17 = vmax.f32 %v7088_v20, 0.0  ;;  %v2634_v19 = vmax.f32 %v7092_v23, 0.0  ;;  %v7429_v7 = vld [vmem:[%s10589_s7 + $0x510] ss:$28 sps:$4 sm:$0xff]   ;;  %v7432_v10 = vld [vmem:[%s10589_s7 + $0x540] ss:$28 sps:$4 sm:$0xff]  }
 0x2f7   :  { %v2633_v28 = vmax.f32 %v7089_v15, 0.0  ;;  %v2635_v29 = vmax.f32 %v7093_v16, 0.0  ;;  %v7435_v11 = vld [vmem:[%s10589_s7 + $0x548] ss:$28 sps:$4 sm:$0xff]   ;;  %v7438_v13 = vld [vmem:[%s10589_s7 + $0x578] ss:$28 sps:$4 sm:$0xff]  }
 0x2f8   :  { %v9311_v30 = vpack.c.bf16 %v2632_v17, %v2624_v26  ;;  %v9313_v31 = vpack.c.bf16 %v2634_v19, %v2626_v27  ;;  %v7441_v14 = vld [vmem:[%s10589_s7 + $0x580] ss:$28 sps:$4 sm:$0xff]   ;;  %v7446_v37 = vld [vmem:[%s10589_s7 + $0x5b4] ss:$28 sps:$4 sm:$0xff]   ;;  %v7452_v24 = vld [vmem:[%s10589_s7 + $0x5ec] ss:$28 sps:$4 sm:$0xff]  }
 0x2f9   :  { %v9321_v36 = vpack.c.bf16 %v2633_v28, %v2625_v21  ;;  %v9323_v38 = vpack.c.bf16 %v2635_v29, %v2627_v22  ;;  %v7449_v18 = vld [vmem:[%s10589_s7 + $0x5bc] ss:$28 sps:$4 sm:$0xff]   ;;  %v7444_v20 = vld [vmem:[%s10589_s7 + $0x5b0] ss:$28 sps:$4 sm:$0xff]   ;;  %v7450_v26 = vld [vmem:[%s10589_s7 + $0x5e8] ss:$28 sps:$4 sm:$0xff]  }
 0x2fa   :  { %v7447_v23 = vld [vmem:[%s10589_s7 + $0x5b8] ss:$28 sps:$4 sm:$0xff]   ;;  %v7453_v27 = vld [vmem:[%s10589_s7 + $0x5f0] ss:$28 sps:$4 sm:$0xff]   ;;  %v7458_v15 = vld [vmem:[%s10589_s7 + $0x624] ss:$28 sps:$4 sm:$0xff]  }
 0x2fb   :  { %5533 = vmatprep.mubr.bf16.mxu1 %v9321_v36  ;;  %5705 = vmatprep.mubr.bf16.mxu0 %v9321_v36  ;;  %v7455_v25 = vld [vmem:[%s10589_s7 + $0x5f4] ss:$28 sps:$4 sm:$0xff]   ;;  %v7461_v16 = vld [vmem:[%s10589_s7 + $0x62c] ss:$28 sps:$4 sm:$0xff]   ;;  %v7456_v17 = vld [vmem:[%s10589_s7 + $0x620] ss:$28 sps:$4 sm:$0xff]  }
 0x2fc   :  { %5534 = vmatmul.mubr.bf16.vlgmr.msra.gmra.mrb[8].mxu1 %v9311_v30  ;;  %5706 = vmatmul.mubr.bf16.vlgmr.msra.gmra.mrb[20].mxu0 %v9311_v30  ;;  %v7459_v19 = vld [vmem:[%s10589_s7 + $0x628] ss:$28 sps:$4 sm:$0xff]   ;;  %v7464_v21 = vld [vmem:[%s10589_s7 + $0x65c] ss:$28 sps:$4 sm:$0xff]  }
 0x2fd   :  { %5545 = vmatpush1.bf16.msra.mxu1 %v7384_v33  ;;  %5717 = vmatpush1.bf16.msra.mxu0 %v7387_v35  ;;  %v7467_v22 = vld [vmem:[%s10589_s7 + $0x664] ss:$28 sps:$4 sm:$0xff]   ;;  %v7462_v28 = vld [vmem:[%s10589_s7 + $0x658] ss:$28 sps:$4 sm:$0xff]  }
 0x2fe   :  { %5576 = vmatprep.mubr.bf16.mxu1 %v9323_v38  ;;  %5748 = vmatprep.mubr.bf16.mxu0 %v9323_v38  ;;  %v7465_v29 = vld [vmem:[%s10589_s7 + $0x660] ss:$28 sps:$4 sm:$0xff]   ;;  %v7470_v33 = vld [vmem:[%s10589_s7 + $0x694] ss:$28 sps:$4 sm:$0xff]  }
 0x2ff   :  { %5546 = vmatprep.subr.bf16.mxu1 %v7392_v41  ;;  %5718 = vmatprep.subr.bf16.mxu0 %v7395_v43  ;;  %v7473_v35 = vld [vmem:[%s10589_s7 + $0x69c] ss:$28 sps:$4 sm:$0xff]   ;;  %v7476_v43 = vld [vmem:[%s10589_s7 + $0x6cc] ss:$28 sps:$4 sm:$0xff]  }
 0x300   :  { %v7471_v41 = vld [vmem:[%s10589_s7 + $0x698] ss:$28 sps:$4 sm:$0xff]  }
 0x301   :  { %5547 = vmatpush1.bf16.msra.mxu1 %v7390_v40  ;;  %5719 = vmatpush1.bf16.msra.mxu0 %v7393_v44  ;;  %v7468_v40 = vld [vmem:[%s10589_s7 + $0x690] ss:$28 sps:$4 sm:$0xff]  }
 0x302   :  { %5548 = vmatprep.subr.bf16.mxu1 %v7398_v45  ;;  %5720 = vmatprep.subr.bf16.mxu0 %v7401_v46  ;;  %v7479_v44 = vld [vmem:[%s10589_s7 + $0x6d4] ss:$28 sps:$4 sm:$0xff]   ;;  %v7474_v45 = vld [vmem:[%s10589_s7 + $0x6c8] ss:$28 sps:$4 sm:$0xff]  }
 0x303   :  { %v7477_v46 = vld [vmem:[%s10589_s7 + $0x6d0] ss:$28 sps:$4 sm:$0xff]  }
 0x305   :  { %5549 = vmatpush1.bf16.msra.mxu1 %v7396_v47  ;;  %5721 = vmatpush1.bf16.msra.mxu0 %v7399_v48  ;;  %v7482_v47 = vld [vmem:[%s10589_s7 + $0x704] ss:$28 sps:$4 sm:$0xff]   ;;  %v7485_v48 = vld [vmem:[%s10589_s7 + $0x70c] ss:$28 sps:$4 sm:$0xff]  }
 0x306   :  { %5550 = vmatprep.subr.bf16.mxu1 %v7404_v49  ;;  %5722 = vmatprep.subr.bf16.mxu0 %v7407_v50  ;;  %v7480_v49 = vld [vmem:[%s10589_s7 + $0x700] ss:$28 sps:$4 sm:$0xff]   ;;  %v7483_v50 = vld [vmem:[%s10589_s7 + $0x708] ss:$28 sps:$4 sm:$0xff]  }
 0x309   :  { %5551 = vmatpush1.bf16.msra.mxu1 %v7402_v51  ;;  %5723 = vmatpush1.bf16.msra.mxu0 %v7405_v52  ;;  %v7488_v51 = vld [vmem:[%s10589_s7 + $0x73c] ss:$28 sps:$4 sm:$0xff]   ;;  %v7491_v52 = vld [vmem:[%s10589_s7 + $0x744] ss:$28 sps:$4 sm:$0xff]  }
 0x30a   :  { %5552 = vmatprep.subr.bf16.mxu1 %v7410_v55  ;;  %5724 = vmatprep.subr.bf16.mxu0 %v7413_v57  ;;  %v7486_v55 = vld [vmem:[%s10589_s7 + $0x738] ss:$28 sps:$4 sm:$0xff]   ;;  %v7489_v57 = vld [vmem:[%s10589_s7 + $0x740] ss:$28 sps:$4 sm:$0xff]  }
 0x30d   :  { %5553 = vmatpush1.bf16.msra.mxu1 %v7408_v9  ;;  %5725 = vmatpush1.bf16.msra.mxu0 %v7411_v58  ;;  %v7494_v9 = vld [vmem:[%s10589_s7 + $0x774] ss:$28 sps:$4 sm:$0xff]   ;;  %v7497_v58 = vld [vmem:[%s10589_s7 + $0x77c] ss:$28 sps:$4 sm:$0xff]  }
 0x30e   :  { %5554 = vmatprep.subr.bf16.mxu1 %v7416_v59  ;;  %5726 = vmatprep.subr.bf16.mxu0 %v7419_v60  ;;  %v7492_v59 = vld [vmem:[%s10589_s7 + $0x770] ss:$28 sps:$4 sm:$0xff]   ;;  %v7495_v60 = vld [vmem:[%s10589_s7 + $0x778] ss:$28 sps:$4 sm:$0xff]  }
 0x311   :  { %5555 = vmatpush1.bf16.msra.mxu1 %v7414_v61  ;;  %5727 = vmatpush1.bf16.msra.mxu0 %v7417_v62  ;;  %v7500_v61 = vld [vmem:[%s10589_s7 + $0x7ac] ss:$28 sps:$4 sm:$0xff]   ;;  %v7503_v62 = vld [vmem:[%s10589_s7 + $0x7b4] ss:$28 sps:$4 sm:$0xff]  }
 0x312   :  { %5556 = vmatprep.subr.bf16.mxu1 %v7422_v63  ;;  %5728 = vmatprep.subr.bf16.mxu0 %v7425_v0  ;;  %v7498_v63 = vld [vmem:[%s10589_s7 + $0x7a8] ss:$28 sps:$4 sm:$0xff]   ;;  %v7501_v0 = vld [vmem:[%s10589_s7 + $0x7b0] ss:$28 sps:$4 sm:$0xff]  }
 0x315   :  { %5557 = vmatpush1.bf16.msra.mxu1 %v7420_v1  ;;  %5729 = vmatpush1.bf16.msra.mxu0 %v7423_v2  ;;  %v7506_v1 = vld [vmem:[%s10589_s7 + $0x7e4] ss:$28 sps:$4 sm:$0xff]   ;;  %v7509_v2 = vld [vmem:[%s10589_s7 + $0x7ec] ss:$28 sps:$4 sm:$0xff]  }
 0x316   :  { %5558 = vmatprep.subr.bf16.mxu1 %v7428_v4  ;;  %5730 = vmatprep.subr.bf16.mxu0 %v7431_v5  ;;  %v7504_v4 = vld [vmem:[%s10589_s7 + $0x7e0] ss:$28 sps:$4 sm:$0xff]   ;;  %v7507_v5 = vld [vmem:[%s10589_s7 + $0x7e8] ss:$28 sps:$4 sm:$0xff]  }
 0x319   :  { %5559 = vmatpush1.bf16.msra.mxu1 %v7426_v6  ;;  %5731 = vmatpush1.bf16.msra.mxu0 %v7429_v7  ;;  %v7512_v6 = vld [vmem:[%s10589_s7 + $0x81c] ss:$28 sps:$4 sm:$0xff]   ;;  %v7515_v7 = vld [vmem:[%s10589_s7 + $0x824] ss:$28 sps:$4 sm:$0xff]  }
 0x31a   :  { %5560 = vmatprep.subr.bf16.mxu1 %v7434_v32  ;;  %5732 = vmatprep.subr.bf16.mxu0 %v7437_v8  ;;  %v7510_v32 = vld [vmem:[%s10589_s7 + $0x818] ss:$28 sps:$4 sm:$0xff]   ;;  %v7513_v8 = vld [vmem:[%s10589_s7 + $0x820] ss:$28 sps:$4 sm:$0xff]  }
 0x31d   :  { %5561 = vmatpush1.bf16.msra.mxu1 %v7432_v10  ;;  %5733 = vmatpush1.bf16.msra.mxu0 %v7435_v11  ;;  %v7518_v10 = vld [vmem:[%s10589_s7 + $0x854] ss:$28 sps:$4 sm:$0xff]   ;;  %v7521_v11 = vld [vmem:[%s10589_s7 + $0x85c] ss:$28 sps:$4 sm:$0xff]  }
 0x31e   :  { %5562 = vmatprep.subr.bf16.mxu1 %v7440_v12  ;;  %5734 = vmatprep.subr.bf16.mxu0 %v7443_v53  ;;  %v7516_v12 = vld [vmem:[%s10589_s7 + $0x850] ss:$28 sps:$4 sm:$0xff]   ;;  %v7519_v53 = vld [vmem:[%s10589_s7 + $0x858] ss:$28 sps:$4 sm:$0xff]  }
 0x321   :  { %5563 = vmatpush1.bf16.msra.mxu1 %v7438_v13  ;;  %5735 = vmatpush1.bf16.msra.mxu0 %v7441_v14  ;;  %v7524_v13 = vld [vmem:[%s10589_s7 + $0x88c] ss:$28 sps:$4 sm:$0xff]   ;;  %v7527_v14 = vld [vmem:[%s10589_s7 + $0x894] ss:$28 sps:$4 sm:$0xff]  }
 0x322   :  { %5564 = vmatprep.subr.bf16.mxu1 %v7446_v37  ;;  %5736 = vmatprep.subr.bf16.mxu0 %v7449_v18  ;;  %v7522_v37 = vld [vmem:[%s10589_s7 + $0x888] ss:$28 sps:$4 sm:$0xff]   ;;  %v7525_v18 = vld [vmem:[%s10589_s7 + $0x890] ss:$28 sps:$4 sm:$0xff]  }
 0x325   :  { %5565 = vmatpush1.bf16.msra.mxu1 %v7444_v20  ;;  %5737 = vmatpush1.bf16.msra.mxu0 %v7447_v23  ;;  %v7530_v20 = vld [vmem:[%s10589_s7 + $0x8c4] ss:$28 sps:$4 sm:$0xff]   ;;  %v7533_v23 = vld [vmem:[%s10589_s7 + $0x8cc] ss:$28 sps:$4 sm:$0xff]  }
 0x326   :  { %5566 = vmatprep.subr.bf16.mxu1 %v7452_v24  ;;  %5738 = vmatprep.subr.bf16.mxu0 %v7455_v25  ;;  %v7528_v24 = vld [vmem:[%s10589_s7 + $0x8c0] ss:$28 sps:$4 sm:$0xff]   ;;  %v7531_v25 = vld [vmem:[%s10589_s7 + $0x8c8] ss:$28 sps:$4 sm:$0xff]  }
 0x329   :  { %5567 = vmatpush1.bf16.msra.mxu1 %v7450_v26  ;;  %5739 = vmatpush1.bf16.msra.mxu0 %v7453_v27  ;;  %v7536_v26 = vld [vmem:[%s10589_s7 + $0x8fc] ss:$28 sps:$4 sm:$0xff]   ;;  %v7539_v27 = vld [vmem:[%s10589_s7 + $0x904] ss:$28 sps:$4 sm:$0xff]  }
 0x32a   :  { %5568 = vmatprep.subr.bf16.mxu1 %v7458_v15  ;;  %5740 = vmatprep.subr.bf16.mxu0 %v7461_v16  ;;  %v7534_v15 = vld [vmem:[%s10589_s7 + $0x8f8] ss:$28 sps:$4 sm:$0xff]   ;;  %v7537_v16 = vld [vmem:[%s10589_s7 + $0x900] ss:$28 sps:$4 sm:$0xff]  }
 0x32d   :  { %5569 = vmatpush1.bf16.msra.mxu1 %v7456_v17  ;;  %5741 = vmatpush1.bf16.msra.mxu0 %v7459_v19  ;;  %v7542_v17 = vld [vmem:[%s10589_s7 + $0x934] ss:$28 sps:$4 sm:$0xff]   ;;  %v7545_v19 = vld [vmem:[%s10589_s7 + $0x93c] ss:$28 sps:$4 sm:$0xff]  }
 0x32e   :  { %5570 = vmatprep.subr.bf16.mxu1 %v7464_v21  ;;  %5742 = vmatprep.subr.bf16.mxu0 %v7467_v22  ;;  %v7540_v21 = vld [vmem:[%s10589_s7 + $0x930] ss:$28 sps:$4 sm:$0xff]   ;;  %v7543_v22 = vld [vmem:[%s10589_s7 + $0x938] ss:$28 sps:$4 sm:$0xff]  }
 0x331   :  { %5571 = vmatpush1.bf16.msra.mxu1 %v7462_v28  ;;  %5743 = vmatpush1.bf16.msra.mxu0 %v7465_v29  ;;  %v7548_v28 = vld [vmem:[%s10589_s7 + $0x96c] ss:$28 sps:$4 sm:$0xff]   ;;  %v7551_v29 = vld [vmem:[%s10589_s7 + $0x974] ss:$28 sps:$4 sm:$0xff]  }
 0x332   :  { %5572 = vmatprep.subr.bf16.mxu1 %v7470_v33  ;;  %5744 = vmatprep.subr.bf16.mxu0 %v7473_v35  ;;  %v7546_v33 = vld [vmem:[%s10589_s7 + $0x968] ss:$28 sps:$4 sm:$0xff]   ;;  %v7549_v35 = vld [vmem:[%s10589_s7 + $0x970] ss:$28 sps:$4 sm:$0xff]  }
 0x335   :  { %5573 = vmatpush1.bf16.msra.mxu1 %v7468_v40  ;;  %5745 = vmatpush1.bf16.msra.mxu0 %v7471_v41  ;;  %v7554_v40 = vld [vmem:[%s10589_s7 + $0x9a4] ss:$28 sps:$4 sm:$0xff]   ;;  %v7557_v41 = vld [vmem:[%s10589_s7 + $0x9ac] ss:$28 sps:$4 sm:$0xff]  }
 0x336   :  { %5574 = vmatprep.subr.bf16.mxu1 %v7476_v43  ;;  %5746 = vmatprep.subr.bf16.mxu0 %v7479_v44  ;;  %v7552_v43 = vld [vmem:[%s10589_s7 + $0x9a0] ss:$28 sps:$4 sm:$0xff]   ;;  %v7555_v44 = vld [vmem:[%s10589_s7 + $0x9a8] ss:$28 sps:$4 sm:$0xff]  }
 0x339   :  { %5575 = vmatpush1.bf16.msra.mxu1 %v7474_v45  ;;  %5747 = vmatpush1.bf16.msra.mxu0 %v7477_v46  ;;  %v7560_v45 = vld [vmem:[%s10589_s7 + $0x9dc] ss:$28 sps:$4 sm:$0xff]   ;;  %v7563_v46 = vld [vmem:[%s10589_s7 + $0x9e4] ss:$28 sps:$4 sm:$0xff]  }
 0x33a   :  { %5587 = vmatprep.subr.bf16.mxu1 %v7482_v47  ;;  %5759 = vmatprep.subr.bf16.mxu0 %v7485_v48  ;;  %v978_v47 = vsub.s32 4, %v8229_v34  ;;  %v986_v48 = vsub.s32 6, %v8229_v34 }
 0x33c   :  { %5577 = vmatmul.mubr.bf16.vlgmr.msra.gmra.mrb[8].mxu1 %v9313_v31  ;;  %5749 = vmatmul.mubr.bf16.vlgmr.msra.gmra.mrb[20].mxu0 %v9313_v31 }
 0x33d   :  { %5588 = vmatpush1.bf16.msra.mxu1 %v7480_v49  ;;  %5760 = vmatpush1.bf16.msra.mxu0 %v7483_v50  ;;  %v982_v49 = vsub.s32 5, %v8229_v34  ;;  %v990_v50 = vsub.s32 7, %v8229_v34 }
 0x33e   :  { %5589 = vmatprep.subr.bf16.mxu1 %v7488_v51  ;;  %5761 = vmatprep.subr.bf16.mxu0 %v7491_v52  ;;  %v7558_v51 = vld [vmem:[%s10589_s7 + $0x9d8] ss:$28 sps:$4 sm:$0xff]   ;;  %v7561_v52 = vld [vmem:[%s10589_s7 + $0x9e0] ss:$28 sps:$4 sm:$0xff]  }
 0x341   :  { %5590 = vmatpush1.bf16.msra.mxu1 %v7486_v55  ;;  %5762 = vmatpush1.bf16.msra.mxu0 %v7489_v57  ;;  %v979_v55 = vrot.slane %v9301_v3, %v978_v47  ;;  %v7566_v57 = vld [vmem:[%s10589_s7 + $0xa14] ss:$28 sps:$4 sm:$0xff]  }
 0x342   :  { %5591 = vmatprep.subr.bf16.mxu1 %v7494_v9  ;;  %5763 = vmatprep.subr.bf16.mxu0 %v7497_v58  ;;  %v7569_v9 = vld [vmem:[%s10589_s7 + $0xa1c] ss:$28 sps:$4 sm:$0xff]   ;;  %v987_v58 = vrot.slane %v9301_v3, %v986_v48 }
 0x345   :  { %5592 = vmatpush1.bf16.msra.mxu1 %v7492_v59  ;;  %5764 = vmatpush1.bf16.msra.mxu0 %v7495_v60  ;;  %v983_v59 = vrot.slane %v9301_v3, %v982_v49  ;;  %v991_v60 = vrot.slane %v9301_v3, %v990_v50  ;;  %v7572_v3 = vld [vmem:[%s10589_s7 + $0xa4c] ss:$28 sps:$4 sm:$0xff]   ;;  %v7593_v50 = vld [vmem:[%s10589_s7 + $0xafc] ss:$28 sps:$4 sm:$0xff]  }
 0x346   :  { %5593 = vmatprep.subr.bf16.mxu1 %v7500_v61  ;;  %5765 = vmatprep.subr.bf16.mxu0 %v7503_v62  ;;  %v7564_v62 = vld [vmem:[%s10589_s7 + $0xa10] ss:$28 sps:$4 sm:$0xff]  }
 0x349   :  { %5594 = vmatpush1.bf16.msra.mxu1 %v7498_v63  ;;  %5766 = vmatpush1.bf16.msra.mxu0 %v7501_v0  ;;  %v7567_v63 = vld [vmem:[%s10589_s7 + $0xa18] ss:$28 sps:$4 sm:$0xff]  }
 0x34a   :  { %5595 = vmatprep.subr.bf16.mxu1 %v7506_v1  ;;  %5767 = vmatprep.subr.bf16.mxu0 %v7509_v2 }
 0x34d   :  { %5596 = vmatpush1.bf16.msra.mxu1 %v7504_v4  ;;  %5768 = vmatpush1.bf16.msra.mxu0 %v7507_v5  ;;  %v7575_v4 = vld [vmem:[%s10589_s7 + $0xa54] ss:$28 sps:$4 sm:$0xff]  }
 0x34e   :  { %5597 = vmatprep.subr.bf16.mxu1 %v7512_v6  ;;  %5769 = vmatprep.subr.bf16.mxu0 %v7515_v7 }
 0x351   :  { %5598 = vmatpush1.bf16.msra.mxu1 %v7510_v32  ;;  %5770 = vmatpush1.bf16.msra.mxu0 %v7513_v8 }
 0x352   :  { %5599 = vmatprep.subr.bf16.mxu1 %v7518_v10  ;;  %5771 = vmatprep.subr.bf16.mxu0 %v7521_v11 }
 0x355   :  { %5600 = vmatpush1.bf16.msra.mxu1 %v7516_v12  ;;  %5772 = vmatpush1.bf16.msra.mxu0 %v7519_v53 }
 0x356   :  { %5601 = vmatprep.subr.bf16.mxu1 %v7524_v13  ;;  %5773 = vmatprep.subr.bf16.mxu0 %v7527_v14 }
 0x359   :  { %5602 = vmatpush1.bf16.msra.mxu1 %v7522_v37  ;;  %5774 = vmatpush1.bf16.msra.mxu0 %v7525_v18  ;;  %v7570_v37 = vld [vmem:[%s10589_s7 + $0xa48] ss:$28 sps:$4 sm:$0xff]   ;;  %v7573_v18 = vld [vmem:[%s10589_s7 + $0xa50] ss:$28 sps:$4 sm:$0xff]  }
 0x35a   :  { %5603 = vmatprep.subr.bf16.mxu1 %v7530_v20  ;;  %5775 = vmatprep.subr.bf16.mxu0 %v7533_v23 }
 0x35d   :  { %5604 = vmatpush1.bf16.msra.mxu1 %v7528_v24  ;;  %5776 = vmatpush1.bf16.msra.mxu0 %v7531_v25  ;;  %v7578_v25 = vld [vmem:[%s10589_s7 + $0xa84] ss:$28 sps:$4 sm:$0xff]  }
 0x35e   :  { %5605 = vmatprep.subr.bf16.mxu1 %v7536_v26  ;;  %5777 = vmatprep.subr.bf16.mxu0 %v7539_v27  ;;  %v7581_v26 = vld [vmem:[%s10589_s7 + $0xa8c] ss:$28 sps:$4 sm:$0xff]  }
 0x361   :  { %5606 = vmatpush1.bf16.msra.mxu1 %v7534_v15  ;;  %5778 = vmatpush1.bf16.msra.mxu0 %v7537_v16 }
 0x362   :  { %5607 = vmatprep.subr.bf16.mxu1 %v7542_v17  ;;  %5779 = vmatprep.subr.bf16.mxu0 %v7545_v19 }
 0x365   :  { %5608 = vmatpush1.bf16.msra.mxu1 %v7540_v21  ;;  %5780 = vmatpush1.bf16.msra.mxu0 %v7543_v22 }
 0x366   :  { %5609 = vmatprep.subr.bf16.mxu1 %v7548_v28  ;;  %5781 = vmatprep.subr.bf16.mxu0 %v7551_v29 }
 0x369   :  { %5610 = vmatpush1.bf16.msra.mxu1 %v7546_v33  ;;  %5782 = vmatpush1.bf16.msra.mxu0 %v7549_v35  ;;  %v7576_v33 = vld [vmem:[%s10589_s7 + $0xa80] ss:$28 sps:$4 sm:$0xff]   ;;  %v7579_v35 = vld [vmem:[%s10589_s7 + $0xa88] ss:$28 sps:$4 sm:$0xff]  }
 0x36a   :  { %5611 = vmatprep.subr.bf16.mxu1 %v7554_v40  ;;  %5783 = vmatprep.subr.bf16.mxu0 %v7557_v41  ;;  %v7584_v41 = vld [vmem:[%s10589_s7 + $0xabc] ss:$28 sps:$4 sm:$0xff]  }
 0x36d   :  { %5612 = vmatpush1.bf16.msra.mxu1 %v7552_v43  ;;  %5784 = vmatpush1.bf16.msra.mxu0 %v7555_v44  ;;  %v7587_v43 = vld [vmem:[%s10589_s7 + $0xac4] ss:$28 sps:$4 sm:$0xff]   ;;  %v7582_v44 = vld [vmem:[%s10589_s7 + $0xab8] ss:$28 sps:$4 sm:$0xff]  }
 0x36e   :  { %5613 = vmatprep.subr.bf16.mxu1 %v7560_v45  ;;  %5785 = vmatprep.subr.bf16.mxu0 %v7563_v46  ;;  %v7585_v45 = vld [vmem:[%s10589_s7 + $0xac0] ss:$28 sps:$4 sm:$0xff]   ;;  %v7590_v46 = vld [vmem:[%s10589_s7 + $0xaf4] ss:$28 sps:$4 sm:$0xff]  }
 0x371   :  { %5614 = vmatpush1.bf16.msra.mxu1 %v7558_v51  ;;  %5786 = vmatpush1.bf16.msra.mxu0 %v7561_v52  ;;  %v2529_v61 = vpop.f32.mrb[4].mxu1  ;;  %v7588_v51 = vld [vmem:[%s10589_s7 + $0xaf0] ss:$28 sps:$4 sm:$0xff]   ;;  %v7591_v52 = vld [vmem:[%s10589_s7 + $0xaf8] ss:$28 sps:$4 sm:$0xff]  }
 0x372   :  { %v7094_v0 = vadd.f32 %v2529_v61, %v979_v55  ;;  %v2615_v1 = vpop.f32.mrb[16].mxu0  ;;  %v2531_v2 = vpop.f32.mrb[5].mxu1  ;;  %5615 = vmatprep.subr.bf16.mxu1 %v7566_v57  ;;  %5787 = vmatprep.subr.bf16.mxu0 %v7569_v9  ;;  %v7599_v57 = vld [vmem:[%s10589_s7 + $0xb34] ss:$28 sps:$4 sm:$0xff]   ;;  %v7594_v9 = vld [vmem:[%s10589_s7 + $0xb28] ss:$28 sps:$4 sm:$0xff]  }
 0x373   :  { %v7098_v5 = vadd.f32 %v2615_v1, %v987_v58  ;;  %v7095_v6 = vadd.f32 %v2531_v2, %v983_v59  ;;  %v2617_v7 = vpop.f32.mrb[17].mxu0  ;;  %v2533_v32 = vpop.f32.mrb[6].mxu1  ;;  %v7600_v61 = vld [vmem:[%s10589_s7 + $0xb60] ss:$28 sps:$4 sm:$0xff]   ;;  %v7606_v1 = vld [vmem:[%s10589_s7 + $0xb98] ss:$28 sps:$4 sm:$0xff]  }
 0x374   :  { %v7099_v8 = vadd.f32 %v2617_v7, %v991_v60  ;;  %v7096_v10 = vadd.f32 %v2533_v32, %v979_v55  ;;  %v2619_v11 = vpop.f32.mrb[18].mxu0  ;;  %v2535_v12 = vpop.f32.mrb[7].mxu1  ;;  %v2628_v20 = vmax.f32 %v7094_v0, 0.0  ;;  %v7596_v55 = vld [vmem:[%s10589_s7 + $0xb2c] ss:$28 sps:$4 sm:$0xff]  }
 0x375   :  { %v7100_v53 = vadd.f32 %v2619_v11, %v987_v58  ;;  %v7097_v13 = vadd.f32 %v2535_v12, %v983_v59  ;;  %v2621_v14 = vpop.f32.mrb[19].mxu0  ;;  %5616 = vmatpush1.bf16.msra.mxu1 %v7564_v62  ;;  %5788 = vmatpush1.bf16.msra.mxu0 %v7567_v63  ;;  %v2630_v27 = vmax.f32 %v7098_v5, 0.0  ;;  %v2629_v15 = vmax.f32 %v7095_v6, 0.0  ;;  %v7597_v58 = vld [vmem:[%s10589_s7 + $0xb30] ss:$28 sps:$4 sm:$0xff]  }
 0x376   :  { %v2636_v23 = vmax.f32 %v7096_v10, 0.0  ;;  %v7101_v24 = vadd.f32 %v2621_v14, %v991_v60  ;;  %5617 = vmatprep.subr.bf16.mxu1 %v7572_v3  ;;  %5789 = vmatprep.subr.bf16.mxu0 %v7575_v4  ;;  %v2631_v19 = vmax.f32 %v7099_v8, 0.0  ;;  %v7602_v59 = vld [vmem:[%s10589_s7 + $0xb64] ss:$28 sps:$4 sm:$0xff]   ;;  %v7605_v60 = vld [vmem:[%s10589_s7 + $0xb6c] ss:$28 sps:$4 sm:$0xff]  }
 0x377   :  { %v2638_v16 = vmax.f32 %v7100_v53, 0.0  ;;  %v2637_v17 = vmax.f32 %v7097_v13, 0.0  ;;  %v7603_v62 = vld [vmem:[%s10589_s7 + $0xb68] ss:$28 sps:$4 sm:$0xff]   ;;  %v7608_v63 = vld [vmem:[%s10589_s7 + $0xb9c] ss:$28 sps:$4 sm:$0xff]  }
 0x378   :  { %v9725_v21 = vpack.c.bf16 %v2636_v23, %v2628_v20  ;;  %v2639_v22 = vmax.f32 %v7101_v24, 0.0  ;;  %v7611_v0 = vld [vmem:[%s10589_s7 + $0xba4] ss:$28 sps:$4 sm:$0xff]   ;;  %v7614_v3 = vld [vmem:[%s10589_s7 + $0xbd4] ss:$28 sps:$4 sm:$0xff]  }
 0x379   :  { %v9727_v28 = vpack.c.bf16 %v2638_v16, %v2630_v27  ;;  %v9729_v29 = vpack.c.bf16 %v2637_v17, %v2629_v15  ;;  %5618 = vmatpush1.bf16.msra.mxu1 %v7570_v37  ;;  %5790 = vmatpush1.bf16.msra.mxu0 %v7573_v18  ;;  %v7609_v2 = vld [vmem:[%s10589_s7 + $0xba0] ss:$28 sps:$4 sm:$0xff]   ;;  %v7612_v5 = vld [vmem:[%s10589_s7 + $0xbd0] ss:$28 sps:$4 sm:$0xff]   ;;  %v7615_v6 = vld [vmem:[%s10589_s7 + $0xbd8] ss:$28 sps:$4 sm:$0xff]  }
 0x37a   :  { %v9737_v40 = vpack.c.bf16 %v2639_v22, %v2631_v19  ;;  %5630 = vmatprep.subr.bf16.mxu1 %v7578_v25  ;;  %5802 = vmatprep.subr.bf16.mxu0 %v7581_v26  ;;  %v7617_v4 = vld [vmem:[%s10589_s7 + $0xbdc] ss:$28 sps:$4 sm:$0xff]   ;;  %v7620_v7 = vld [vmem:[%s10589_s7 + $0xc0c] ss:$28 sps:$4 sm:$0xff]   ;;  %v7623_v32 = vld [vmem:[%s10589_s7 + $0xc14] ss:$28 sps:$4 sm:$0xff]  }
 0x37b   :  { %5619 = vmatprep.mubr.bf16.mxu1 %v9729_v29  ;;  %5791 = vmatprep.mubr.bf16.mxu0 %v9729_v29  ;;  %v7618_v8 = vld [vmem:[%s10589_s7 + $0xc08] ss:$28 sps:$4 sm:$0xff]   ;;  %v7621_v10 = vld [vmem:[%s10589_s7 + $0xc10] ss:$28 sps:$4 sm:$0xff]   ;;  %v7624_v53 = vld [vmem:[%s10589_s7 + $0xc40] ss:$28 sps:$4 sm:$0xff]  }
 0x37c   :  { %5620 = vmatmul.mubr.bf16.vlgmr.msra.gmra.mrb[8].mxu1 %v9725_v21  ;;  %5792 = vmatmul.mubr.bf16.vlgmr.msra.gmra.mrb[20].mxu0 %v9725_v21  ;;  %v7626_v11 = vld [vmem:[%s10589_s7 + $0xc44] ss:$28 sps:$4 sm:$0xff]   ;;  %v7629_v12 = vld [vmem:[%s10589_s7 + $0xc4c] ss:$28 sps:$4 sm:$0xff]   ;;  %v7632_v14 = vld [vmem:[%s10589_s7 + $0xc7c] ss:$28 sps:$4 sm:$0xff]  }
 0x37d   :  { %5631 = vmatpush1.bf16.msra.mxu1 %v7576_v33  ;;  %5803 = vmatpush1.bf16.msra.mxu0 %v7579_v35  ;;  %v7627_v13 = vld [vmem:[%s10589_s7 + $0xc48] ss:$28 sps:$4 sm:$0xff]   ;;  %v7630_v18 = vld [vmem:[%s10589_s7 + $0xc78] ss:$28 sps:$4 sm:$0xff]   ;;  %v7633_v20 = vld [vmem:[%s10589_s7 + $0xc80] ss:$28 sps:$4 sm:$0xff]  }
 0x37e   :  { %5662 = vmatprep.mubr.bf16.mxu1 %v9737_v40  ;;  %5834 = vmatprep.mubr.bf16.mxu0 %v9737_v40  ;;  %v7635_v37 = vld [vmem:[%s10589_s7 + $0xc84] ss:$28 sps:$4 sm:$0xff]   ;;  %v7638_v23 = vld [vmem:[%s10589_s7 + $0xcb4] ss:$28 sps:$4 sm:$0xff]   ;;  %v7641_v24 = vld [vmem:[%s10589_s7 + $0xcbc] ss:$28 sps:$4 sm:$0xff]  }
 0x37f   :  { %5632 = vmatprep.subr.bf16.mxu1 %v7584_v41  ;;  %5804 = vmatprep.subr.bf16.mxu0 %v7587_v43  ;;  %v7636_v25 = vld [vmem:[%s10589_s7 + $0xcb0] ss:$28 sps:$4 sm:$0xff]   ;;  %v7639_v26 = vld [vmem:[%s10589_s7 + $0xcb8] ss:$28 sps:$4 sm:$0xff]   ;;  %v7642_v16 = vld [vmem:[%s10589_s7 + $0xce8] ss:$28 sps:$4 sm:$0xff]  }
 0x380   :  { %v7644_v27 = vld [vmem:[%s10589_s7 + $0xcec] ss:$28 sps:$4 sm:$0xff]   ;;  %v7647_v15 = vld [vmem:[%s10589_s7 + $0xcf4] ss:$28 sps:$4 sm:$0xff]   ;;  %v7650_v19 = vld [vmem:[%s10589_s7 + $0xd24] ss:$28 sps:$4 sm:$0xff]  }
 0x381   :  { %5633 = vmatpush1.bf16.msra.mxu1 %v7582_v44  ;;  %5805 = vmatpush1.bf16.msra.mxu0 %v7585_v45  ;;  %v7645_v17 = vld [vmem:[%s10589_s7 + $0xcf0] ss:$28 sps:$4 sm:$0xff]   ;;  %v7648_v33 = vld [vmem:[%s10589_s7 + $0xd20] ss:$28 sps:$4 sm:$0xff]   ;;  %v7651_v35 = vld [vmem:[%s10589_s7 + $0xd28] ss:$28 sps:$4 sm:$0xff]  }
 0x382   :  { %5634 = vmatprep.subr.bf16.mxu1 %v7590_v46  ;;  %5806 = vmatprep.subr.bf16.mxu0 %v7593_v50  ;;  %v7653_v22 = vld [vmem:[%s10589_s7 + $0xd2c] ss:$28 sps:$4 sm:$0xff]   ;;  %v7656_v41 = vld [vmem:[%s10589_s7 + $0xd5c] ss:$28 sps:$4 sm:$0xff]   ;;  %v7659_v43 = vld [vmem:[%s10589_s7 + $0xd64] ss:$28 sps:$4 sm:$0xff]  }
 0x383   :  { %v7654_v44 = vld [vmem:[%s10589_s7 + $0xd58] ss:$28 sps:$4 sm:$0xff]   ;;  %v7657_v45 = vld [vmem:[%s10589_s7 + $0xd60] ss:$28 sps:$4 sm:$0xff]  }
 0x384   :  { %v7662_v46 = vld [vmem:[%s10589_s7 + $0xd94] ss:$28 sps:$4 sm:$0xff]   ;;  %v7665_v50 = vld [vmem:[%s10589_s7 + $0xd9c] ss:$28 sps:$4 sm:$0xff]  }
 0x385   :  { %5635 = vmatpush1.bf16.msra.mxu1 %v7588_v51  ;;  %5807 = vmatpush1.bf16.msra.mxu0 %v7591_v52  ;;  %v7660_v51 = vld [vmem:[%s10589_s7 + $0xd90] ss:$28 sps:$4 sm:$0xff]   ;;  %v7663_v52 = vld [vmem:[%s10589_s7 + $0xd98] ss:$28 sps:$4 sm:$0xff]  }
 0x386   :  { %5636 = vmatprep.subr.bf16.mxu1 %v7596_v55  ;;  %5808 = vmatprep.subr.bf16.mxu0 %v7599_v57  ;;  %v7668_v55 = vld [vmem:[%s10589_s7 + $0xdcc] ss:$28 sps:$4 sm:$0xff]   ;;  %v7671_v57 = vld [vmem:[%s10589_s7 + $0xdd4] ss:$28 sps:$4 sm:$0xff]  }
 0x389   :  { %5637 = vmatpush1.bf16.msra.mxu1 %v7594_v9  ;;  %5809 = vmatpush1.bf16.msra.mxu0 %v7597_v58  ;;  %v7666_v9 = vld [vmem:[%s10589_s7 + $0xdc8] ss:$28 sps:$4 sm:$0xff]   ;;  %v7669_v58 = vld [vmem:[%s10589_s7 + $0xdd0] ss:$28 sps:$4 sm:$0xff]  }
 0x38a   :  { %5638 = vmatprep.subr.bf16.mxu1 %v7602_v59  ;;  %5810 = vmatprep.subr.bf16.mxu0 %v7605_v60  ;;  %v7674_v59 = vld [vmem:[%s10589_s7 + $0x14] ss:$28 sps:$4 sm:$0xff]  }
 0x38b   :  { %v7675_v60 = vld [vmem:[%s10589_s7 + $0x1d8] ss:$28 sps:$4 sm:$0xff]  }
 0x38d   :  { %5639 = vmatpush1.bf16.msra.mxu1 %v7600_v61  ;;  %5811 = vmatpush1.bf16.msra.mxu0 %v7603_v62  ;;  %v7672_v61 = vld [vmem:[%s10589_s7 + $0x10] ss:$28 sps:$4 sm:$0xff]   ;;  %v7676_v62 = vld [vmem:[%s10589_s7 + $0x18] ss:$28 sps:$4 sm:$0xff]  }
 0x38e   :  { %5640 = vmatprep.subr.bf16.mxu1 %v7608_v63  ;;  %5812 = vmatprep.subr.bf16.mxu0 %v7611_v0  ;;  %v7679_v63 = vld [vmem:[%s10589_s7 + $0x4c] ss:$28 sps:$4 sm:$0xff]  }
 0x38f   :  { %v7680_v0 = vld [vmem:[%s10589_s7 + $0x210] ss:$28 sps:$4 sm:$0xff]  }
 0x391   :  { %5641 = vmatpush1.bf16.msra.mxu1 %v7606_v1  ;;  %5813 = vmatpush1.bf16.msra.mxu0 %v7609_v2  ;;  %v7677_v1 = vld [vmem:[%s10589_s7 + $0x48] ss:$28 sps:$4 sm:$0xff]   ;;  %v7681_v2 = vld [vmem:[%s10589_s7 + $0x50] ss:$28 sps:$4 sm:$0xff]  }
 0x392   :  { %5642 = vmatprep.subr.bf16.mxu1 %v7614_v3  ;;  %5814 = vmatprep.subr.bf16.mxu0 %v7617_v4  ;;  %v7684_v3 = vld [vmem:[%s10589_s7 + $0x84] ss:$28 sps:$4 sm:$0xff]  }
 0x393   :  { %v7685_v4 = vld [vmem:[%s10589_s7 + $0x248] ss:$28 sps:$4 sm:$0xff]  }
 0x395   :  { %5643 = vmatpush1.bf16.msra.mxu1 %v7612_v5  ;;  %5815 = vmatpush1.bf16.msra.mxu0 %v7615_v6  ;;  %v7682_v5 = vld [vmem:[%s10589_s7 + $0x80] ss:$28 sps:$4 sm:$0xff]  }
 0x396   :  { %5644 = vmatprep.subr.bf16.mxu1 %v7620_v7  ;;  %5816 = vmatprep.subr.bf16.mxu0 %v7623_v32  ;;  %v7689_v6 = vld [vmem:[%s10589_s7 + $0xbc] ss:$28 sps:$4 sm:$0xff]  }
 0x397   :  { %v7690_v7 = vld [vmem:[%s10589_s7 + $0x280] ss:$28 sps:$4 sm:$0xff]   ;;  %v7687_v32 = vld [vmem:[%s10589_s7 + $0xb8] ss:$28 sps:$4 sm:$0xff]  }
 0x399   :  { %5645 = vmatpush1.bf16.msra.mxu1 %v7618_v8  ;;  %5817 = vmatpush1.bf16.msra.mxu0 %v7621_v10  ;;  %v7691_v8 = vld [vmem:[%s10589_s7 + $0xc0] ss:$28 sps:$4 sm:$0xff]   ;;  %v7694_v10 = vld [vmem:[%s10589_s7 + $0xf4] ss:$28 sps:$4 sm:$0xff]  }
 0x39a   :  { %5646 = vmatprep.subr.bf16.mxu1 %v7626_v11  ;;  %5818 = vmatprep.subr.bf16.mxu0 %v7629_v12  ;;  %v7695_v11 = vld [vmem:[%s10589_s7 + $0x2b8] ss:$28 sps:$4 sm:$0xff]   ;;  %v7692_v12 = vld [vmem:[%s10589_s7 + $0xf0] ss:$28 sps:$4 sm:$0xff]  }
 0x39d   :  { %5647 = vmatpush1.bf16.msra.mxu1 %v7624_v53  ;;  %5819 = vmatpush1.bf16.msra.mxu0 %v7627_v13  ;;  %v7696_v53 = vld [vmem:[%s10589_s7 + $0xf8] ss:$28 sps:$4 sm:$0xff]   ;;  %v7699_v13 = vld [vmem:[%s10589_s7 + $0x12c] ss:$28 sps:$4 sm:$0xff]  }
 0x39e   :  { %5648 = vmatprep.subr.bf16.mxu1 %v7632_v14  ;;  %5820 = vmatprep.subr.bf16.mxu0 %v7635_v37  ;;  %v7700_v14 = vld [vmem:[%s10589_s7 + $0x2f0] ss:$28 sps:$4 sm:$0xff]   ;;  %v7697_v37 = vld [vmem:[%s10589_s7 + $0x128] ss:$28 sps:$4 sm:$0xff]  }
 0x3a1   :  { %5649 = vmatpush1.bf16.msra.mxu1 %v7630_v18  ;;  %5821 = vmatpush1.bf16.msra.mxu0 %v7633_v20  ;;  %v7701_v18 = vld [vmem:[%s10589_s7 + $0x130] ss:$28 sps:$4 sm:$0xff]   ;;  %v7704_v20 = vld [vmem:[%s10589_s7 + $0x164] ss:$28 sps:$4 sm:$0xff]  }
 0x3a2   :  { %5650 = vmatprep.subr.bf16.mxu1 %v7638_v23  ;;  %5822 = vmatprep.subr.bf16.mxu0 %v7641_v24  ;;  %v7705_v23 = vld [vmem:[%s10589_s7 + $0x328] ss:$28 sps:$4 sm:$0xff]   ;;  %v7702_v24 = vld [vmem:[%s10589_s7 + $0x160] ss:$28 sps:$4 sm:$0xff]  }
 0x3a5   :  { %5651 = vmatpush1.bf16.msra.mxu1 %v7636_v25  ;;  %5823 = vmatpush1.bf16.msra.mxu0 %v7639_v26  ;;  %v7706_v25 = vld [vmem:[%s10589_s7 + $0x168] ss:$28 sps:$4 sm:$0xff]   ;;  %v7709_v26 = vld [vmem:[%s10589_s7 + $0x19c] ss:$28 sps:$4 sm:$0xff]  }
 0x3a6   :  { %5652 = vmatprep.subr.bf16.mxu1 %v7644_v27  ;;  %5824 = vmatprep.subr.bf16.mxu0 %v7647_v15  ;;  %v7710_v27 = vld [vmem:[%s10589_s7 + $0x360] ss:$28 sps:$4 sm:$0xff]   ;;  %v7707_v15 = vld [vmem:[%s10589_s7 + $0x198] ss:$28 sps:$4 sm:$0xff]  }
 0x3a9   :  { %5653 = vmatpush1.bf16.msra.mxu1 %v7642_v16  ;;  %5825 = vmatpush1.bf16.msra.mxu0 %v7645_v17  ;;  %v7711_v16 = vld [vmem:[%s10589_s7 + $0x1a0] ss:$28 sps:$4 sm:$0xff]   ;;  %v7714_v17 = vld [vmem:[%s10589_s7 + $0x1d4] ss:$28 sps:$4 sm:$0xff]  }
 0x3aa   :  { %5654 = vmatprep.subr.bf16.mxu1 %v7650_v19  ;;  %5826 = vmatprep.subr.bf16.mxu0 %v7653_v22  ;;  %v7715_v19 = vld [vmem:[%s10589_s7 + $0x558] ss:$28 sps:$4 sm:$0xff]   ;;  %v7712_v22 = vld [vmem:[%s10589_s7 + $0x1d0] ss:$28 sps:$4 sm:$0xff]  }
 0x3ad   :  { %5655 = vmatpush1.bf16.msra.mxu1 %v7648_v33  ;;  %5827 = vmatpush1.bf16.msra.mxu0 %v7651_v35  ;;  %v7716_v33 = vld [vmem:[%s10589_s7 + $0x398] ss:$28 sps:$4 sm:$0xff]   ;;  %v7719_v35 = vld [vmem:[%s10589_s7 + $0x20c] ss:$28 sps:$4 sm:$0xff]  }
 0x3ae   :  { %5656 = vmatprep.subr.bf16.mxu1 %v7656_v41  ;;  %5828 = vmatprep.subr.bf16.mxu0 %v7659_v43  ;;  %v7720_v41 = vld [vmem:[%s10589_s7 + $0x590] ss:$28 sps:$4 sm:$0xff]   ;;  %v7717_v43 = vld [vmem:[%s10589_s7 + $0x208] ss:$28 sps:$4 sm:$0xff]  }
 0x3b1   :  { %5657 = vmatpush1.bf16.msra.mxu1 %v7654_v44  ;;  %5829 = vmatpush1.bf16.msra.mxu0 %v7657_v45  ;;  %v7721_v44 = vld [vmem:[%s10589_s7 + $0x3d0] ss:$28 sps:$4 sm:$0xff]   ;;  %v7724_v45 = vld [vmem:[%s10589_s7 + $0x244] ss:$28 sps:$4 sm:$0xff]  }
 0x3b2   :  { %5658 = vmatprep.subr.bf16.mxu1 %v7662_v46  ;;  %5830 = vmatprep.subr.bf16.mxu0 %v7665_v50  ;;  %v7725_v46 = vld [vmem:[%s10589_s7 + $0x5c8] ss:$28 sps:$4 sm:$0xff]   ;;  %v7722_v50 = vld [vmem:[%s10589_s7 + $0x240] ss:$28 sps:$4 sm:$0xff]  }
 0x3b5   :  { %5659 = vmatpush1.bf16.msra.mxu1 %v7660_v51  ;;  %5831 = vmatpush1.bf16.msra.mxu0 %v7663_v52  ;;  %v7726_v51 = vld [vmem:[%s10589_s7 + $0x408] ss:$28 sps:$4 sm:$0xff]   ;;  %v7729_v52 = vld [vmem:[%s10589_s7 + $0x27c] ss:$28 sps:$4 sm:$0xff]  }
 0x3b6   :  { %5660 = vmatprep.subr.bf16.mxu1 %v7668_v55  ;;  %5832 = vmatprep.subr.bf16.mxu0 %v7671_v57  ;;  %v7730_v55 = vld [vmem:[%s10589_s7 + $0x600] ss:$28 sps:$4 sm:$0xff]   ;;  %v7727_v57 = vld [vmem:[%s10589_s7 + $0x278] ss:$28 sps:$4 sm:$0xff]  }
 0x3b9   :  { %5661 = vmatpush1.bf16.msra.mxu1 %v7666_v9  ;;  %5833 = vmatpush1.bf16.msra.mxu0 %v7669_v58  ;;  %v7731_v9 = vld [vmem:[%s10589_s7 + $0x440] ss:$28 sps:$4 sm:$0xff]   ;;  %v7734_v58 = vld [vmem:[%s10589_s7 + $0x2b4] ss:$28 sps:$4 sm:$0xff]  }
 0x3ba   :  { %5845 = vmatprep.subr.bf16.mxu1 %v7674_v59  ;;  %6998 = vmatprep.subr.bf16.mxu0 %v7675_v60  ;;  %v7735_v59 = vld [vmem:[%s10589_s7 + $0x638] ss:$28 sps:$4 sm:$0xff]   ;;  %v7732_v60 = vld [vmem:[%s10589_s7 + $0x2b0] ss:$28 sps:$4 sm:$0xff]  }
 0x3bc   :  { %5663 = vmatmul.mubr.bf16.vlgmr.msra.gmra.mrb[8].mxu1 %v9727_v28  ;;  %5835 = vmatmul.mubr.bf16.vlgmr.msra.gmra.mrb[20].mxu0 %v9727_v28 }
 0x3bd   :  { %5846 = vmatpush1.bf16.msra.mxu1 %v7672_v61  ;;  %5877 = vmatprep.mubr.bf16.mxu1 %v9321_v36  ;;  %v7736_v61 = vld [vmem:[%s10589_s7 + $0x478] ss:$28 sps:$4 sm:$0xff]  }
 0x3be   :  { %6999 = vmatpush3.bf16.msra.mxu0 %v7676_v62  ;;  %6049 = vmatprep.mubr.bf16.mxu0 %v9321_v36  ;;  %v7686_v36 = vld [vmem:[%s10589_s7 + $0x88] ss:$28 sps:$4 sm:$0xff]  }
 0x3bf   :  { %5847 = vmatprep.subr.bf16.mxu1 %v7679_v63  ;;  %7000 = vmatprep.subr.bf16.mxu0 %v7680_v0  ;;  %v7739_v62 = vld [vmem:[%s10589_s7 + $0x2ec] ss:$28 sps:$4 sm:$0xff]  }
 0x3c0   :  { %v7740_v63 = vld [vmem:[%s10589_s7 + $0x670] ss:$28 sps:$4 sm:$0xff]   ;;  %v7737_v0 = vld [vmem:[%s10589_s7 + $0x2e8] ss:$28 sps:$4 sm:$0xff]  }
 0x3c1   :  { %5848 = vmatpush1.bf16.msra.mxu1 %v7677_v1  ;;  %v7741_v1 = vld [vmem:[%s10589_s7 + $0x4b0] ss:$28 sps:$4 sm:$0xff]  }
 0x3c2   :  { %7001 = vmatpush3.bf16.msra.mxu0 %v7681_v2  ;;  %5849 = vmatprep.subr.bf16.mxu1 %v7684_v3  ;;  %v7744_v2 = vld [vmem:[%s10589_s7 + $0x324] ss:$28 sps:$4 sm:$0xff]  }
 0x3c3   :  { %7002 = vmatprep.subr.bf16.mxu0 %v7685_v4  ;;  %v7745_v3 = vld [vmem:[%s10589_s7 + $0x6a8] ss:$28 sps:$4 sm:$0xff]   ;;  %v7742_v4 = vld [vmem:[%s10589_s7 + $0x320] ss:$28 sps:$4 sm:$0xff]  }
 0x3c5   :  { %5850 = vmatpush1.bf16.msra.mxu1 %v7682_v5  ;;  %v7746_v5 = vld [vmem:[%s10589_s7 + $0x4e8] ss:$28 sps:$4 sm:$0xff]  }
 0x3c6   :  { %7003 = vmatpush3.bf16.msra.mxu0 %v7686_v36  ;;  %5851 = vmatprep.subr.bf16.mxu1 %v7689_v6  ;;  %v7749_v36 = vld [vmem:[%s10589_s7 + $0x35c] ss:$28 sps:$4 sm:$0xff]  }
 0x3c7   :  { %7004 = vmatprep.subr.bf16.mxu0 %v7690_v7  ;;  %v7750_v6 = vld [vmem:[%s10589_s7 + $0x6e0] ss:$28 sps:$4 sm:$0xff]   ;;  %v7747_v7 = vld [vmem:[%s10589_s7 + $0x358] ss:$28 sps:$4 sm:$0xff]  }
 0x3c9   :  { %5852 = vmatpush1.bf16.msra.mxu1 %v7687_v32  ;;  %v7751_v32 = vld [vmem:[%s10589_s7 + $0x520] ss:$28 sps:$4 sm:$0xff]  }
 0x3ca   :  { %7005 = vmatpush3.bf16.msra.mxu0 %v7691_v8  ;;  %5853 = vmatprep.subr.bf16.mxu1 %v7694_v10  ;;  %v7754_v8 = vld [vmem:[%s10589_s7 + $0x394] ss:$28 sps:$4 sm:$0xff]  }
 0x3cb   :  { %7006 = vmatprep.subr.bf16.mxu0 %v7695_v11  ;;  %v7755_v10 = vld [vmem:[%s10589_s7 + $0x8d8] ss:$28 sps:$4 sm:$0xff]   ;;  %v7752_v11 = vld [vmem:[%s10589_s7 + $0x390] ss:$28 sps:$4 sm:$0xff]  }
 0x3cd   :  { %5854 = vmatpush1.bf16.msra.mxu1 %v7692_v12  ;;  %v7756_v12 = vld [vmem:[%s10589_s7 + $0x718] ss:$28 sps:$4 sm:$0xff]  }
 0x3ce   :  { %7007 = vmatpush3.bf16.msra.mxu0 %v7696_v53  ;;  %5855 = vmatprep.subr.bf16.mxu1 %v7699_v13  ;;  %v7759_v53 = vld [vmem:[%s10589_s7 + $0x3cc] ss:$28 sps:$4 sm:$0xff]  }
 0x3cf   :  { %7008 = vmatprep.subr.bf16.mxu0 %v7700_v14  ;;  %v7760_v13 = vld [vmem:[%s10589_s7 + $0x910] ss:$28 sps:$4 sm:$0xff]   ;;  %v7757_v14 = vld [vmem:[%s10589_s7 + $0x3c8] ss:$28 sps:$4 sm:$0xff]  }
 0x3d1   :  { %5856 = vmatpush1.bf16.msra.mxu1 %v7697_v37  ;;  %v7761_v37 = vld [vmem:[%s10589_s7 + $0x750] ss:$28 sps:$4 sm:$0xff]  }
 0x3d2   :  { %7009 = vmatpush3.bf16.msra.mxu0 %v7701_v18  ;;  %5857 = vmatprep.subr.bf16.mxu1 %v7704_v20  ;;  %v7765_v18 = vld [vmem:[%s10589_s7 + $0x948] ss:$28 sps:$4 sm:$0xff]  }
 0x3d3   :  { %7010 = vmatprep.subr.bf16.mxu0 %v7705_v23  ;;  %v7766_v20 = vld [vmem:[%s10589_s7 + $0x788] ss:$28 sps:$4 sm:$0xff]   ;;  %v7769_v23 = vld [vmem:[%s10589_s7 + $0x43c] ss:$28 sps:$4 sm:$0xff]  }
 0x3d5   :  { %5858 = vmatpush1.bf16.msra.mxu1 %v7702_v24  ;;  %v7770_v24 = vld [vmem:[%s10589_s7 + $0x980] ss:$28 sps:$4 sm:$0xff]  }
 0x3d6   :  { %7011 = vmatpush3.bf16.msra.mxu0 %v7706_v25  ;;  %5859 = vmatprep.subr.bf16.mxu1 %v7709_v26  ;;  %v7767_v25 = vld [vmem:[%s10589_s7 + $0x438] ss:$28 sps:$4 sm:$0xff]   ;;  %v7771_v26 = vld [vmem:[%s10589_s7 + $0x7c0] ss:$28 sps:$4 sm:$0xff]  }
 0x3d7   :  { %7012 = vmatprep.subr.bf16.mxu0 %v7710_v27  ;;  %v7774_v27 = vld [vmem:[%s10589_s7 + $0x474] ss:$28 sps:$4 sm:$0xff]  }
 0x3d9   :  { %5860 = vmatpush1.bf16.msra.mxu1 %v7707_v15  ;;  %v7775_v15 = vld [vmem:[%s10589_s7 + $0x9b8] ss:$28 sps:$4 sm:$0xff]  }
 0x3da   :  { %7013 = vmatpush3.bf16.msra.mxu0 %v7711_v16  ;;  %5861 = vmatprep.subr.bf16.mxu1 %v7714_v17  ;;  %v7772_v16 = vld [vmem:[%s10589_s7 + $0x470] ss:$28 sps:$4 sm:$0xff]   ;;  %v7776_v17 = vld [vmem:[%s10589_s7 + $0x7f8] ss:$28 sps:$4 sm:$0xff]  }
 0x3db   :  { %7020 = vmatprep.subr.bf16.mxu0 %v7715_v19  ;;  %v7779_v19 = vld [vmem:[%s10589_s7 + $0x4ac] ss:$28 sps:$4 sm:$0xff]  }
 0x3dd   :  { %6050 = vmatmul.mubr.bf16.vlgmr.msra.gmra.mrb[24].mxu0 %v9311_v30  ;;  %5862 = vmatpush1.bf16.msra.mxu1 %v7712_v22  ;;  %v7780_v22 = vld [vmem:[%s10589_s7 + $0x9f0] ss:$28 sps:$4 sm:$0xff]  }
 0x3de   :  { %7021 = vmatpush3.bf16.msra.mxu0 %v7716_v33  ;;  %6090 = vmatprep.mubr.bf16.mxu0 %v9323_v38  ;;  %v7777_v33 = vld [vmem:[%s10589_s7 + $0x4a8] ss:$28 sps:$4 sm:$0xff]  }
 0x3df   :  { %5863 = vmatprep.subr.bf16.mxu1 %v7719_v35  ;;  %7022 = vmatprep.subr.bf16.mxu0 %v7720_v41  ;;  %v7781_v35 = vld [vmem:[%s10589_s7 + $0x830] ss:$28 sps:$4 sm:$0xff]   ;;  %v7784_v41 = vld [vmem:[%s10589_s7 + $0x4e4] ss:$28 sps:$4 sm:$0xff]  }
 0x3e1   :  { %5864 = vmatpush1.bf16.msra.mxu1 %v7717_v43  ;;  %v7785_v43 = vld [vmem:[%s10589_s7 + $0xa28] ss:$28 sps:$4 sm:$0xff]  }
 0x3e2   :  { %7023 = vmatpush3.bf16.msra.mxu0 %v7721_v44  ;;  %5865 = vmatprep.subr.bf16.mxu1 %v7724_v45  ;;  %v7782_v44 = vld [vmem:[%s10589_s7 + $0x4e0] ss:$28 sps:$4 sm:$0xff]   ;;  %v7786_v45 = vld [vmem:[%s10589_s7 + $0x868] ss:$28 sps:$4 sm:$0xff]  }
 0x3e3   :  { %7024 = vmatprep.subr.bf16.mxu0 %v7725_v46  ;;  %v7789_v46 = vld [vmem:[%s10589_s7 + $0x51c] ss:$28 sps:$4 sm:$0xff]  }
 0x3e5   :  { %5866 = vmatpush1.bf16.msra.mxu1 %v7722_v50  ;;  %v7790_v50 = vld [vmem:[%s10589_s7 + $0xa60] ss:$28 sps:$4 sm:$0xff]  }
 0x3e6   :  { %7025 = vmatpush3.bf16.msra.mxu0 %v7726_v51  ;;  %5867 = vmatprep.subr.bf16.mxu1 %v7729_v52  ;;  %v7787_v51 = vld [vmem:[%s10589_s7 + $0x518] ss:$28 sps:$4 sm:$0xff]   ;;  %v7791_v52 = vld [vmem:[%s10589_s7 + $0x8a0] ss:$28 sps:$4 sm:$0xff]  }
 0x3e7   :  { %7026 = vmatprep.subr.bf16.mxu0 %v7730_v55  ;;  %v7794_v55 = vld [vmem:[%s10589_s7 + $0x554] ss:$28 sps:$4 sm:$0xff]  }
 0x3e9   :  { %5868 = vmatpush1.bf16.msra.mxu1 %v7727_v57  ;;  %v7795_v57 = vld [vmem:[%s10589_s7 + $0xc58] ss:$28 sps:$4 sm:$0xff]  }
 0x3ea   :  { %7027 = vmatpush3.bf16.msra.mxu0 %v7731_v9  ;;  %5869 = vmatprep.subr.bf16.mxu1 %v7734_v58  ;;  %v7792_v9 = vld [vmem:[%s10589_s7 + $0x550] ss:$28 sps:$4 sm:$0xff]   ;;  %v7796_v58 = vld [vmem:[%s10589_s7 + $0xa98] ss:$28 sps:$4 sm:$0xff]  }
 0x3eb   :  { %7028 = vmatprep.subr.bf16.mxu0 %v7735_v59  ;;  %v7799_v59 = vld [vmem:[%s10589_s7 + $0x58c] ss:$28 sps:$4 sm:$0xff]  }
 0x3ed   :  { %5870 = vmatpush1.bf16.msra.mxu1 %v7732_v60  ;;  %v7800_v60 = vld [vmem:[%s10589_s7 + $0xc90] ss:$28 sps:$4 sm:$0xff]  }
 0x3ee   :  { %7029 = vmatpush3.bf16.msra.mxu0 %v7736_v61  ;;  %5871 = vmatprep.subr.bf16.mxu1 %v7739_v62  ;;  %v7797_v61 = vld [vmem:[%s10589_s7 + $0x588] ss:$28 sps:$4 sm:$0xff]   ;;  %v7801_v62 = vld [vmem:[%s10589_s7 + $0xad0] ss:$28 sps:$4 sm:$0xff]  }
 0x3ef   :  { %7030 = vmatprep.subr.bf16.mxu0 %v7740_v63  ;;  %v7804_v63 = vld [vmem:[%s10589_s7 + $0x5c4] ss:$28 sps:$4 sm:$0xff]  }
 0x3f1   :  { %5872 = vmatpush1.bf16.msra.mxu1 %v7737_v0  ;;  %v7805_v0 = vld [vmem:[%s10589_s7 + $0xcc8] ss:$28 sps:$4 sm:$0xff]  }
 0x3f2   :  { %7031 = vmatpush3.bf16.msra.mxu0 %v7741_v1  ;;  %5873 = vmatprep.subr.bf16.mxu1 %v7744_v2  ;;  %v7802_v1 = vld [vmem:[%s10589_s7 + $0x5c0] ss:$28 sps:$4 sm:$0xff]   ;;  %v7806_v2 = vld [vmem:[%s10589_s7 + $0xb08] ss:$28 sps:$4 sm:$0xff]  }
 0x3f3   :  { %7032 = vmatprep.subr.bf16.mxu0 %v7745_v3  ;;  %v7809_v3 = vld [vmem:[%s10589_s7 + $0x5fc] ss:$28 sps:$4 sm:$0xff]  }
 0x3f5   :  { %5874 = vmatpush1.bf16.msra.mxu1 %v7742_v4  ;;  %v7810_v4 = vld [vmem:[%s10589_s7 + $0xd00] ss:$28 sps:$4 sm:$0xff]  }
 0x3f6   :  { %7033 = vmatpush3.bf16.msra.mxu0 %v7746_v5  ;;  %5875 = vmatprep.subr.bf16.mxu1 %v7749_v36  ;;  %v7807_v5 = vld [vmem:[%s10589_s7 + $0x5f8] ss:$28 sps:$4 sm:$0xff]   ;;  %v7811_v36 = vld [vmem:[%s10589_s7 + $0xb40] ss:$28 sps:$4 sm:$0xff]  }
 0x3f7   :  { %7034 = vmatprep.subr.bf16.mxu0 %v7750_v6  ;;  %v7814_v6 = vld [vmem:[%s10589_s7 + $0x634] ss:$28 sps:$4 sm:$0xff]  }
 0x3f9   :  { %5876 = vmatpush1.bf16.msra.mxu1 %v7747_v7  ;;  %v7815_v7 = vld [vmem:[%s10589_s7 + $0xd38] ss:$28 sps:$4 sm:$0xff]  }
 0x3fa   :  { %7035 = vmatpush3.bf16.msra.mxu0 %v7751_v32  ;;  %5888 = vmatprep.subr.bf16.mxu1 %v7754_v8  ;;  %v7812_v32 = vld [vmem:[%s10589_s7 + $0x630] ss:$28 sps:$4 sm:$0xff]   ;;  %v7816_v8 = vld [vmem:[%s10589_s7 + $0xb78] ss:$28 sps:$4 sm:$0xff]  }
 0x3fb   :  { %7042 = vmatprep.subr.bf16.mxu0 %v7755_v10  ;;  %v7819_v10 = vld [vmem:[%s10589_s7 + $0x66c] ss:$28 sps:$4 sm:$0xff]  }
 0x3fc   :  { %5878 = vmatmul.mubr.bf16.vlgmr.msra.gmra.mrb[12].mxu1 %v9311_v30  ;;  %v7764_v30 = vld [vmem:[%s10589_s7 + $0x404] ss:$28 sps:$4 sm:$0xff]  }
 0x3fd   :  { %6091 = vmatmul.mubr.bf16.vlgmr.msra.gmra.mrb[28].mxu0 %v9313_v31  ;;  %5889 = vmatpush1.bf16.msra.mxu1 %v7752_v11  ;;  %v7820_v11 = vld [vmem:[%s10589_s7 + $0xd70] ss:$28 sps:$4 sm:$0xff]  }
 0x3fe   :  { %5920 = vmatprep.mubr.bf16.mxu1 %v9323_v38  ;;  %7043 = vmatpush3.bf16.msra.mxu0 %v7756_v12  ;;  %v7762_v38 = vld [vmem:[%s10589_s7 + $0x400] ss:$28 sps:$4 sm:$0xff]   ;;  %v7817_v12 = vld [vmem:[%s10589_s7 + $0x668] ss:$28 sps:$4 sm:$0xff]  }
 0x3ff   :  { %6131 = vmatprep.mubr.bf16.mxu0 %v9729_v29  ;;  %5890 = vmatprep.subr.bf16.mxu1 %v7759_v53  ;;  %v7821_v53 = vld [vmem:[%s10589_s7 + $0xbb0] ss:$28 sps:$4 sm:$0xff]  }
 0x400   :  { %7044 = vmatprep.subr.bf16.mxu0 %v7760_v13  ;;  %v7824_v13 = vld [vmem:[%s10589_s7 + $0x6a4] ss:$28 sps:$4 sm:$0xff]  }
 0x401   :  { %5891 = vmatpush1.bf16.msra.mxu1 %v7757_v14  ;;  %v7825_v14 = vld [vmem:[%s10589_s7 + $0xda8] ss:$28 sps:$4 sm:$0xff]  }
 0x402   :  { %7045 = vmatpush3.bf16.msra.mxu0 %v7761_v37  ;;  %5892 = vmatprep.subr.bf16.mxu1 %v7764_v30  ;;  %v7822_v37 = vld [vmem:[%s10589_s7 + $0x6a0] ss:$28 sps:$4 sm:$0xff]   ;;  %v7826_v30 = vld [vmem:[%s10589_s7 + $0xbe8] ss:$28 sps:$4 sm:$0xff]  }
 0x403   :  { %7046 = vmatprep.subr.bf16.mxu0 %v7765_v18  ;;  %v7829_v18 = vld [vmem:[%s10589_s7 + $0x6dc] ss:$28 sps:$4 sm:$0xff]  }
 0x405   :  { %5893 = vmatpush1.bf16.msra.mxu1 %v7762_v38  ;;  %v7830_v38 = vld [vmem:[%s10589_s7 + $0xde0] ss:$28 sps:$4 sm:$0xff]  }
 0x406   :  { %7047 = vmatpush3.bf16.msra.mxu0 %v7766_v20  ;;  %5894 = vmatprep.subr.bf16.mxu1 %v7769_v23  ;;  %v7827_v20 = vld [vmem:[%s10589_s7 + $0x6d8] ss:$28 sps:$4 sm:$0xff]   ;;  %v7831_v23 = vld [vmem:[%s10589_s7 + $0xc20] ss:$28 sps:$4 sm:$0xff]  }
 0x407   :  { %7048 = vmatprep.subr.bf16.mxu0 %v7770_v24  ;;  %v7834_v24 = vld [vmem:[%s10589_s7 + $0x714] ss:$28 sps:$4 sm:$0xff]  }
 0x409   :  { %5895 = vmatpush1.bf16.msra.mxu1 %v7767_v25  ;;  %v7832_v25 = vld [vmem:[%s10589_s7 + $0x710] ss:$28 sps:$4 sm:$0xff]  }
 0x40a   :  { %7049 = vmatpush3.bf16.msra.mxu0 %v7771_v26  ;;  %5896 = vmatprep.subr.bf16.mxu1 %v7774_v27  ;;  %v7837_v26 = vld [vmem:[%s10589_s7 + $0x74c] ss:$28 sps:$4 sm:$0xff]  }
 0x40b   :  { %7050 = vmatprep.subr.bf16.mxu0 %v7775_v15  ;;  %v7835_v27 = vld [vmem:[%s10589_s7 + $0x748] ss:$28 sps:$4 sm:$0xff]  }
 0x40c   :  { %v7840_v15 = vld [vmem:[%s10589_s7 + $0x784] ss:$28 sps:$4 sm:$0xff]  }
 0x40d   :  { %5897 = vmatpush1.bf16.msra.mxu1 %v7772_v16  ;;  %v7838_v16 = vld [vmem:[%s10589_s7 + $0x780] ss:$28 sps:$4 sm:$0xff]  }
 0x40e   :  { %7051 = vmatpush3.bf16.msra.mxu0 %v7776_v17  ;;  %5898 = vmatprep.subr.bf16.mxu1 %v7779_v19  ;;  %v7846_v17 = vld [vmem:[%s10589_s7 + $0x7f4] ss:$28 sps:$4 sm:$0xff]  }
 0x40f   :  { %7052 = vmatprep.subr.bf16.mxu0 %v7780_v22  ;;  %v7844_v19 = vld [vmem:[%s10589_s7 + $0x7f0] ss:$28 sps:$4 sm:$0xff]  }
 0x410   :  { %v7849_v22 = vld [vmem:[%s10589_s7 + $0x82c] ss:$28 sps:$4 sm:$0xff]  }
 0x411   :  { %5899 = vmatpush1.bf16.msra.mxu1 %v7777_v33  ;;  %v7847_v33 = vld [vmem:[%s10589_s7 + $0x828] ss:$28 sps:$4 sm:$0xff]  }
 0x412   :  { %7053 = vmatpush3.bf16.msra.mxu0 %v7781_v35  ;;  %5900 = vmatprep.subr.bf16.mxu1 %v7784_v41  ;;  %v7852_v35 = vld [vmem:[%s10589_s7 + $0x864] ss:$28 sps:$4 sm:$0xff]  }
 0x413   :  { %7054 = vmatprep.subr.bf16.mxu0 %v7785_v43  ;;  %v7850_v41 = vld [vmem:[%s10589_s7 + $0x860] ss:$28 sps:$4 sm:$0xff]  }
 0x414   :  { %v7855_v43 = vld [vmem:[%s10589_s7 + $0x89c] ss:$28 sps:$4 sm:$0xff]  }
 0x415   :  { %5901 = vmatpush1.bf16.msra.mxu1 %v7782_v44  ;;  %v7853_v44 = vld [vmem:[%s10589_s7 + $0x898] ss:$28 sps:$4 sm:$0xff]  }
 0x416   :  { %7055 = vmatpush3.bf16.msra.mxu0 %v7786_v45  ;;  %5902 = vmatprep.subr.bf16.mxu1 %v7789_v46  ;;  %v7858_v45 = vld [vmem:[%s10589_s7 + $0x8d4] ss:$28 sps:$4 sm:$0xff]  }
 0x417   :  { %7056 = vmatprep.subr.bf16.mxu0 %v7790_v50  ;;  %v7856_v46 = vld [vmem:[%s10589_s7 + $0x8d0] ss:$28 sps:$4 sm:$0xff]  }
 0x418   :  { %v7861_v50 = vld [vmem:[%s10589_s7 + $0x90c] ss:$28 sps:$4 sm:$0xff]  }
 0x419   :  { %5903 = vmatpush1.bf16.msra.mxu1 %v7787_v51  ;;  %v7859_v51 = vld [vmem:[%s10589_s7 + $0x908] ss:$28 sps:$4 sm:$0xff]  }
 0x41a   :  { %7057 = vmatpush3.bf16.msra.mxu0 %v7791_v52  ;;  %5904 = vmatprep.subr.bf16.mxu1 %v7794_v55  ;;  %v7864_v52 = vld [vmem:[%s10589_s7 + $0x944] ss:$28 sps:$4 sm:$0xff]  }
 0x41b   :  { %7064 = vmatprep.subr.bf16.mxu0 %v7795_v57  ;;  %v7862_v55 = vld [vmem:[%s10589_s7 + $0x940] ss:$28 sps:$4 sm:$0xff]  }
 0x41c   :  { %v7867_v57 = vld [vmem:[%s10589_s7 + $0x97c] ss:$28 sps:$4 sm:$0xff]  }
 0x41d   :  { %6132 = vmatmul.mubr.bf16.vlgmr.msra.gmra.mrb[32].mxu0 %v9725_v21  ;;  %5905 = vmatpush1.bf16.msra.mxu1 %v7792_v9  ;;  %v7865_v9 = vld [vmem:[%s10589_s7 + $0x978] ss:$28 sps:$4 sm:$0xff]  }
 0x41e   :  { %7065 = vmatpush3.bf16.msra.mxu0 %v7796_v58  ;;  %6172 = vmatprep.mubr.bf16.mxu0 %v9737_v40  ;;  %v7870_v58 = vld [vmem:[%s10589_s7 + $0x9b4] ss:$28 sps:$4 sm:$0xff]  }
 0x41f   :  { %5906 = vmatprep.subr.bf16.mxu1 %v7799_v59  ;;  %7066 = vmatprep.subr.bf16.mxu0 %v7800_v60  ;;  %v7868_v59 = vld [vmem:[%s10589_s7 + $0x9b0] ss:$28 sps:$4 sm:$0xff]  }
 0x420   :  { %v7873_v60 = vld [vmem:[%s10589_s7 + $0x9ec] ss:$28 sps:$4 sm:$0xff]  }
 0x421   :  { %5907 = vmatpush1.bf16.msra.mxu1 %v7797_v61  ;;  %v7871_v61 = vld [vmem:[%s10589_s7 + $0x9e8] ss:$28 sps:$4 sm:$0xff]  }
 0x422   :  { %7067 = vmatpush3.bf16.msra.mxu0 %v7801_v62  ;;  %5908 = vmatprep.subr.bf16.mxu1 %v7804_v63  ;;  %v7876_v62 = vld [vmem:[%s10589_s7 + $0xa24] ss:$28 sps:$4 sm:$0xff]  }
 0x423   :  { %7068 = vmatprep.subr.bf16.mxu0 %v7805_v0  ;;  %v7874_v63 = vld [vmem:[%s10589_s7 + $0xa20] ss:$28 sps:$4 sm:$0xff]  }
 0x424   :  { %v7879_v0 = vld [vmem:[%s10589_s7 + $0xa5c] ss:$28 sps:$4 sm:$0xff]  }
 0x425   :  { %5909 = vmatpush1.bf16.msra.mxu1 %v7802_v1  ;;  %v7877_v1 = vld [vmem:[%s10589_s7 + $0xa58] ss:$28 sps:$4 sm:$0xff]  }
 0x426   :  { %7069 = vmatpush3.bf16.msra.mxu0 %v7806_v2  ;;  %5910 = vmatprep.subr.bf16.mxu1 %v7809_v3  ;;  %v7882_v2 = vld [vmem:[%s10589_s7 + $0xa94] ss:$28 sps:$4 sm:$0xff]  }
 0x427   :  { %7070 = vmatprep.subr.bf16.mxu0 %v7810_v4  ;;  %v7880_v3 = vld [vmem:[%s10589_s7 + $0xa90] ss:$28 sps:$4 sm:$0xff]  }
 0x428   :  { %v7885_v4 = vld [vmem:[%s10589_s7 + $0xacc] ss:$28 sps:$4 sm:$0xff]  }
 0x429   :  { %5911 = vmatpush1.bf16.msra.mxu1 %v7807_v5  ;;  %v7883_v5 = vld [vmem:[%s10589_s7 + $0xac8] ss:$28 sps:$4 sm:$0xff]  }
 0x42a   :  { %7071 = vmatpush3.bf16.msra.mxu0 %v7811_v36  ;;  %5912 = vmatprep.subr.bf16.mxu1 %v7814_v6  ;;  %v7888_v36 = vld [vmem:[%s10589_s7 + $0xb04] ss:$28 sps:$4 sm:$0xff]  }
 0x42b   :  { %7072 = vmatprep.subr.bf16.mxu0 %v7815_v7  ;;  %v7886_v6 = vld [vmem:[%s10589_s7 + $0xb00] ss:$28 sps:$4 sm:$0xff]   ;;  %v7894_v7 = vld [vmem:[%s10589_s7 + $0xb74] ss:$28 sps:$4 sm:$0xff]  }
 0x42d   :  { %5913 = vmatpush1.bf16.msra.mxu1 %v7812_v32  ;;  %v7892_v32 = vld [vmem:[%s10589_s7 + $0xb70] ss:$28 sps:$4 sm:$0xff]  }
 0x42e   :  { %7073 = vmatpush3.bf16.msra.mxu0 %v7816_v8  ;;  %5914 = vmatprep.subr.bf16.mxu1 %v7819_v10  ;;  %v10455_v8 = vld [vmem:[%s10591_s8] sm:$0xff]  ;;  %v7897_v10 = vld [vmem:[%s10589_s7 + $0xbac] ss:$28 sps:$4 sm:$0xff]  }
 0x42f   :  { %7074 = vmatprep.subr.bf16.mxu0 %v7820_v11  ;;  %v3165_v11 = vrot.slane %v10455_v8, %v8238_v39 }
 0x431   :  { %5915 = vmatpush1.bf16.msra.mxu1 %v7817_v12  ;;  %v3173_v12 = vrot.slane %v10455_v8, %v8667_v54 }
 0x432   :  { %7075 = vmatpush3.bf16.msra.mxu0 %v7821_v53  ;;  %5916 = vmatprep.subr.bf16.mxu1 %v7824_v13  ;;  %v3169_v53 = vrot.slane %v10455_v8, %v8244_v42  ;;  %v3177_v13 = vrot.slane %v10455_v8, %v8673_v56  ;;  %v7898_v56 = vld [vmem:[%s10589_s7 + $0xbe0] ss:$28 sps:$4 sm:$0xff]  }
 0x433   :  { %7076 = vmatprep.subr.bf16.mxu0 %v7825_v14  ;;  %v7895_v14 = vld [vmem:[%s10589_s7 + $0xba8] ss:$28 sps:$4 sm:$0xff]  }
 0x435   :  { %5917 = vmatpush1.bf16.msra.mxu1 %v7822_v37  ;;  %v7900_v37 = vld [vmem:[%s10589_s7 + $0xbe4] ss:$28 sps:$4 sm:$0xff]  }
 0x436   :  { %7077 = vmatpush3.bf16.msra.mxu0 %v7826_v30  ;;  %5918 = vmatprep.subr.bf16.mxu1 %v7829_v18 }
 0x437   :  { %7078 = vmatprep.subr.bf16.mxu0 %v7830_v38 }
 0x439   :  { %5919 = vmatpush1.bf16.msra.mxu1 %v7827_v20 }
 0x43a   :  { %7079 = vmatpush3.bf16.msra.mxu0 %v7831_v23  ;;  %5931 = vmatprep.subr.bf16.mxu1 %v7834_v24 }
 0x43c   :  { %5921 = vmatmul.mubr.bf16.vlgmr.msra.gmra.mrb[12].mxu1 %v9313_v31  ;;  %v7843_v31 = vld [vmem:[%s10589_s7 + $0x7bc] ss:$28 sps:$4 sm:$0xff]  }
 0x43d   :  { %6173 = vmatmul.mubr.bf16.vlgmr.msra.gmra.mrb[36].mxu0 %v9727_v28  ;;  %5932 = vmatpush1.bf16.msra.mxu1 %v7832_v25 }
 0x43e   :  { %5963 = vmatprep.mubr.bf16.mxu1 %v9729_v29  ;;  %5933 = vmatprep.subr.bf16.mxu1 %v7837_v26  ;;  %v7841_v29 = vld [vmem:[%s10589_s7 + $0x7b8] ss:$28 sps:$4 sm:$0xff]  }
 0x441   :  { %5934 = vmatpush1.bf16.msra.mxu1 %v7835_v27 }
 0x442   :  { %5935 = vmatprep.subr.bf16.mxu1 %v7840_v15 }
 0x445   :  { %5936 = vmatpush1.bf16.msra.mxu1 %v7838_v16  ;;  %v7903_v16 = vld [vmem:[%s10589_s7 + $0xc1c] ss:$28 sps:$4 sm:$0xff]  }
 0x446   :  { %5937 = vmatprep.subr.bf16.mxu1 %v7843_v31 }
 0x449   :  { %5938 = vmatpush1.bf16.msra.mxu1 %v7841_v29 }
 0x44a   :  { %5939 = vmatprep.subr.bf16.mxu1 %v7846_v17 }
 0x44d   :  { %5940 = vmatpush1.bf16.msra.mxu1 %v7844_v19  ;;  %v7901_v19 = vld [vmem:[%s10589_s7 + $0xc18] ss:$28 sps:$4 sm:$0xff]  }
 0x44e   :  { %5941 = vmatprep.subr.bf16.mxu1 %v7849_v22  ;;  %v7906_v22 = vld [vmem:[%s10589_s7 + $0xc54] ss:$28 sps:$4 sm:$0xff]  }
 0x451   :  { %5942 = vmatpush1.bf16.msra.mxu1 %v7847_v33  ;;  %v7904_v33 = vld [vmem:[%s10589_s7 + $0xc50] ss:$28 sps:$4 sm:$0xff]  }
 0x452   :  { %5943 = vmatprep.subr.bf16.mxu1 %v7852_v35  ;;  %v7909_v35 = vld [vmem:[%s10589_s7 + $0xc8c] ss:$28 sps:$4 sm:$0xff]  }
 0x455   :  { %5944 = vmatpush1.bf16.msra.mxu1 %v7850_v41 }
 0x456   :  { %5945 = vmatprep.subr.bf16.mxu1 %v7855_v43 }
 0x459   :  { %5946 = vmatpush1.bf16.msra.mxu1 %v7853_v44  ;;  %v7907_v44 = vld [vmem:[%s10589_s7 + $0xc88] ss:$28 sps:$4 sm:$0xff]  }
 0x45a   :  { %5947 = vmatprep.subr.bf16.mxu1 %v7858_v45 }
 0x45d   :  { %5948 = vmatpush1.bf16.msra.mxu1 %v7856_v46  ;;  %v7912_v46 = vld [vmem:[%s10589_s7 + $0xcc4] ss:$28 sps:$4 sm:$0xff]  }
 0x45e   :  { %5949 = vmatprep.subr.bf16.mxu1 %v7861_v50 }
 0x461   :  { %5950 = vmatpush1.bf16.msra.mxu1 %v7859_v51 }
 0x462   :  { %5951 = vmatprep.subr.bf16.mxu1 %v7864_v52 }
 0x465   :  { %5952 = vmatpush1.bf16.msra.mxu1 %v7862_v55  ;;  %v7910_v55 = vld [vmem:[%s10589_s7 + $0xcc0] ss:$28 sps:$4 sm:$0xff]  }
 0x466   :  { %5953 = vmatprep.subr.bf16.mxu1 %v7867_v57 }
 0x469   :  { %5954 = vmatpush1.bf16.msra.mxu1 %v7865_v9  ;;  %v7915_v9 = vld [vmem:[%s10589_s7 + $0xcfc] ss:$28 sps:$4 sm:$0xff]  }
 0x46a   :  { %5955 = vmatprep.subr.bf16.mxu1 %v7870_v58 }
 0x46d   :  { %5956 = vmatpush1.bf16.msra.mxu1 %v7868_v59  ;;  %v7913_v59 = vld [vmem:[%s10589_s7 + $0xcf8] ss:$28 sps:$4 sm:$0xff]  }
 0x46e   :  { %5957 = vmatprep.subr.bf16.mxu1 %v7873_v60  ;;  %v7918_v60 = vld [vmem:[%s10589_s7 + $0xd34] ss:$28 sps:$4 sm:$0xff]  }
 0x471   :  { %5958 = vmatpush1.bf16.msra.mxu1 %v7871_v61  ;;  %v7916_v61 = vld [vmem:[%s10589_s7 + $0xd30] ss:$28 sps:$4 sm:$0xff]  }
 0x472   :  { %5959 = vmatprep.subr.bf16.mxu1 %v7876_v62  ;;  %v7921_v62 = vld [vmem:[%s10589_s7 + $0xd6c] ss:$28 sps:$4 sm:$0xff]  }
 0x475   :  { %5960 = vmatpush1.bf16.msra.mxu1 %v7874_v63  ;;  %v7919_v63 = vld [vmem:[%s10589_s7 + $0xd68] ss:$28 sps:$4 sm:$0xff]  }
 0x476   :  { %5961 = vmatprep.subr.bf16.mxu1 %v7879_v0  ;;  %v7924_v0 = vld [vmem:[%s10589_s7 + $0xda4] ss:$28 sps:$4 sm:$0xff]  }
 0x479   :  { %5962 = vmatpush1.bf16.msra.mxu1 %v7877_v1 }
 0x47a   :  { %5974 = vmatprep.subr.bf16.mxu1 %v7882_v2 }
 0x47c   :  { %5964 = vmatmul.mubr.bf16.vlgmr.msra.gmra.mrb[12].mxu1 %v9725_v21  ;;  %v7891_v21 = vld [vmem:[%s10589_s7 + $0xb3c] ss:$28 sps:$4 sm:$0xff]  }
 0x47d   :  { %5975 = vmatpush1.bf16.msra.mxu1 %v7880_v3  ;;  %6006 = vmatprep.mubr.bf16.mxu1 %v9737_v40  ;;  %v7889_v40 = vld [vmem:[%s10589_s7 + $0xb38] ss:$28 sps:$4 sm:$0xff]   ;;  %v7922_v3 = vld [vmem:[%s10589_s7 + $0xda0] ss:$28 sps:$4 sm:$0xff]  }
 0x47e   :  { %5976 = vmatprep.subr.bf16.mxu1 %v7885_v4 }
 0x481   :  { %5977 = vmatpush1.bf16.msra.mxu1 %v7883_v5 }
 0x482   :  { %5978 = vmatprep.subr.bf16.mxu1 %v7888_v36  ;;  %v7927_v36 = vld [vmem:[%s10589_s7 + $0xddc] ss:$28 sps:$4 sm:$0xff]  }
 0x485   :  { %5979 = vmatpush1.bf16.msra.mxu1 %v7886_v6 }
 0x486   :  { %5980 = vmatprep.subr.bf16.mxu1 %v7891_v21 }
 0x489   :  { %5981 = vmatpush1.bf16.msra.mxu1 %v7889_v40  ;;  %v7925_v40 = vld [vmem:[%s10589_s7 + $0xdd8] ss:$28 sps:$4 sm:$0xff]  }
 0x48a   :  { %5982 = vmatprep.subr.bf16.mxu1 %v7894_v7  ;;  %v3189_v7 = vrot.slane %v10455_v8, %v986_v48 }
 0x48d   :  { %5983 = vmatpush1.bf16.msra.mxu1 %v7892_v32 }
 0x48e   :  { %5984 = vmatprep.subr.bf16.mxu1 %v7897_v10 }
 0x48f   :  { %v5664_v39 = vpop.f32.mrb[8].mxu1  ;;  %v5836_v30 = vpop.f32.mrb[20].mxu0 }
 0x490   :  { %v7102_v18 = vadd.f32 %v5664_v39, %v3165_v11  ;;  %v7106_v54 = vadd.f32 %v5836_v30, %v3173_v12  ;;  %v5666_v38 = vpop.f32.mrb[9].mxu1  ;;  %v5838_v20 = vpop.f32.mrb[21].mxu0 }
 0x491   :  { %v7103_v23 = vadd.f32 %v5666_v38, %v3169_v53  ;;  %v7107_v42 = vadd.f32 %v5838_v20, %v3177_v13  ;;  %v5668_v24 = vpop.f32.mrb[10].mxu1  ;;  %v5840_v25 = vpop.f32.mrb[22].mxu0  ;;  %5985 = vmatpush1.bf16.msra.mxu1 %v7895_v14 }
 0x492   :  { %7928 = vtanh.f32 %v7102_v18  ;;  %v7104_v26 = vadd.f32 %v5668_v24, %v3165_v11  ;;  %v5670_v27 = vpop.f32.mrb[11].mxu1  ;;  %v5842_v15 = vpop.f32.mrb[23].mxu0  ;;  %5986 = vmatprep.subr.bf16.mxu1 %v7900_v37  ;;  %v7108_v31 = vadd.f32 %v5840_v25, %v3173_v12 }
 0x493   :  { %7930 = vtanh.f32 %v7106_v54  ;;  %v7105_v29 = vadd.f32 %v5670_v27, %v3169_v53  ;;  %v7109_v17 = vadd.f32 %v5842_v15, %v3177_v13 }
 0x494   :  { %7932 = vtanh.f32 %v7103_v23 }
 0x495   :  { %7934 = vtanh.f32 %v7107_v42  ;;  %5987 = vmatpush1.bf16.msra.mxu1 %v7898_v56 }
 0x496   :  { %7936 = vtanh.f32 %v7104_v26  ;;  %5988 = vmatprep.subr.bf16.mxu1 %v7903_v16 }
 0x497   :  { %7938 = vtanh.f32 %v7108_v31 }
 0x498   :  { %7940 = vtanh.f32 %v7105_v29 }
 0x499   :  { %7942 = vtanh.f32 %v7109_v17  ;;  %5989 = vmatpush1.bf16.msra.mxu1 %v7901_v19  ;;  %v3181_v19 = vrot.slane %v10455_v8, %v978_v47 }
 0x49a   :  { %5990 = vmatprep.subr.bf16.mxu1 %v7906_v22  ;;  %v3185_v22 = vrot.slane %v10455_v8, %v982_v49 }
 0x49c   :  { %v7929_v41 = vpop.eup %7928 }
 0x49d   :  { %v7931_v43 = vpop.eup %7930  ;;  %6195 = vst [vmem:[%s10592_s9] sm:$0xff] %v7929_v41  ;;  %5991 = vmatpush1.bf16.msra.mxu1 %v7904_v33 }
 0x49e   :  { %v7933_v45 = vpop.eup %7932  ;;  %6197 = vst [vmem:[%s10592_s9 + $0x10] sm:$0xff] %v7931_v43  ;;  %5992 = vmatprep.subr.bf16.mxu1 %v7909_v35 }
 0x49f   :  { %v7935_v50 = vpop.eup %7934  ;;  %6196 = vst [vmem:[%s10592_s9 + $0x8] sm:$0xff] %v7933_v45 }
 0x4a0   :  { %v7937_v51 = vpop.eup %7936  ;;  %6198 = vst [vmem:[%s10592_s9 + $0x18] sm:$0xff] %v7935_v50 }
 0x4a1   :  { %v7939_v52 = vpop.eup %7938  ;;  %6202 = vst [vmem:[%s10592_s9 + $0x38] sm:$0xff] %v7937_v51  ;;  %5993 = vmatpush1.bf16.msra.mxu1 %v7907_v44 }
 0x4a2   :  { %v7941_v57 = vpop.eup %7940  ;;  %6204 = vst [vmem:[%s10592_s9 + $0x48] sm:$0xff] %v7939_v52  ;;  %5994 = vmatprep.subr.bf16.mxu1 %v7912_v46 }
 0x4a3   :  { %v7943_v58 = vpop.eup %7942  ;;  %6203 = vst [vmem:[%s10592_s9 + $0x40] sm:$0xff] %v7941_v57 }
 0x4a4   :  { %6205 = vst [vmem:[%s10592_s9 + $0x50] sm:$0xff] %v7943_v58 }
 0x4a5   :  { %5995 = vmatpush1.bf16.msra.mxu1 %v7910_v55 }
 0x4a6   :  { %5996 = vmatprep.subr.bf16.mxu1 %v7915_v9 }
 0x4a9   :  { %5997 = vmatpush1.bf16.msra.mxu1 %v7913_v59 }
 0x4aa   :  { %5998 = vmatprep.subr.bf16.mxu1 %v7918_v60 }
 0x4ad   :  { %5999 = vmatpush1.bf16.msra.mxu1 %v7916_v61 }
 0x4ae   :  { %6000 = vmatprep.subr.bf16.mxu1 %v7921_v62 }
 0x4b0   :  { %v7014_v1 = vpop.f32.mrb[24].mxu0 }
 0x4b1   :  { %v7015_v2 = vpop.f32.mrb[25].mxu0  ;;  %6001 = vmatpush1.bf16.msra.mxu1 %v7919_v63 }
 0x4b2   :  { %v7016_v4 = vadd.f32 %v7015_v2, %v7014_v1  ;;  %v7017_v5 = vpop.f32.mrb[26].mxu0  ;;  %6002 = vmatprep.subr.bf16.mxu1 %v7924_v0 }
 0x4b3   :  { %v7018_v6 = vpop.f32.mrb[27].mxu0 }
 0x4b4   :  { %v7019_v21 = vadd.f32 %v7018_v6, %v7017_v5  ;;  %v6052_v11 = vadd.f32 %v7016_v4, %v3189_v7 }
 0x4b5   :  { %6003 = vmatpush1.bf16.msra.mxu1 %v7922_v3 }
 0x4b6   :  { %6004 = vmatprep.subr.bf16.mxu1 %v7927_v36  ;;  %v6055_v14 = vadd.f32 %v7019_v21, %v3189_v7 }
 0x4b9   :  { %6005 = vmatpush1.bf16.msra.mxu1 %v7925_v40 }
 0x4bc   :  { %6007 = vmatmul.mubr.bf16.vlgmr.msra.gmra.mrb[12].mxu1 %v9727_v28 }
 0x4d0   :  { %v7036_v32 = vpop.f32.mrb[28].mxu0 }
 0x4d1   :  { %v7037_v10 = vpop.f32.mrb[29].mxu0 }
 0x4d2   :  { %v7038_v12 = vadd.f32 %v7037_v10, %v7036_v32  ;;  %v7039_v53 = vpop.f32.mrb[30].mxu0 }
 0x4d3   :  { %v7040_v13 = vpop.f32.mrb[31].mxu0 }
 0x4d4   :  { %v6093_v37 = vadd.f32 %v7038_v12, %v6052_v11  ;;  %v7041_v39 = vadd.f32 %v7040_v13, %v7039_v53 }
 0x4d6   :  { %v6096_v30 = vadd.f32 %v7041_v39, %v6055_v14 }
 0x4f0   :  { %v7058_v18 = vpop.f32.mrb[32].mxu0 }
 0x4f1   :  { %v7059_v54 = vpop.f32.mrb[33].mxu0 }
 0x4f2   :  { %v7060_v38 = vadd.f32 %v7059_v54, %v7058_v18  ;;  %v7061_v20 = vpop.f32.mrb[34].mxu0 }
 0x4f3   :  { %v7062_v23 = vpop.f32.mrb[35].mxu0 }
 0x4f4   :  { %v6134_v28 = vadd.f32 %v7060_v38, %v6093_v37  ;;  %v7063_v42 = vadd.f32 %v7062_v23, %v7061_v20 }
 0x4f6   :  { %v6137_v24 = vadd.f32 %v7063_v42, %v6096_v30 }
 0x510   :  { %v7080_v25 = vpop.f32.mrb[36].mxu0 }
 0x511   :  { %v7081_v48 = vpop.f32.mrb[37].mxu0 }
 0x512   :  { %v7082_v56 = vadd.f32 %v7081_v48, %v7080_v25  ;;  %v7083_v26 = vpop.f32.mrb[38].mxu0 }
 0x513   :  { %v7084_v27 = vpop.f32.mrb[39].mxu0 }
 0x514   :  { %v6175_v15 = vadd.f32 %v7082_v56, %v6134_v28  ;;  %v7085_v16 = vadd.f32 %v7084_v27, %v7083_v26 }
 0x516   :  { %7944 = vtanh.f32 %v6175_v15  ;;  %v6178_v31 = vadd.f32 %v7085_v16, %v6137_v24 }
 0x518   :  { %7946 = vtanh.f32 %v6178_v31 }
 0x520   :  { %v7945_v29 = vpop.eup %7944 }
 0x521   :  { %6201 = vst [vmem:[%s10592_s9 + $0x30] sm:$0xff] %v7945_v29 }
 0x522   :  { %v7947_v17 = vpop.eup %7946 }
 0x523   :  { %6208 = vst [vmem:[%s10592_s9 + $0x68] sm:$0xff] %v7947_v17 }
 0x58f   :  { %v6008_v33 = vpop.f32.mrb[12].mxu1 }
 0x590   :  { %v7110_v35 = vadd.f32 %v6008_v33, %v3181_v19  ;;  %v6010_v41 = vpop.f32.mrb[13].mxu1 }
 0x591   :  { %v7111_v43 = vadd.f32 %v6010_v41, %v3185_v22  ;;  %v6012_v44 = vpop.f32.mrb[14].mxu1 }
 0x592   :  { %7948 = vtanh.f32 %v7110_v35  ;;  %v7112_v45 = vadd.f32 %v6012_v44, %v3181_v19  ;;  %v6014_v46 = vpop.f32.mrb[15].mxu1 }
 0x593   :  { %7950 = vtanh.f32 %v7111_v43  ;;  %v7113_v50 = vadd.f32 %v6014_v46, %v3185_v22 }
 0x594   :  { %7952 = vtanh.f32 %v7112_v45 }
 0x595   :  { %7954 = vtanh.f32 %v7113_v50 }
 0x59c   :  { %v7949_v51 = vpop.eup %7948 }
 0x59d   :  { %v7951_v52 = vpop.eup %7950  ;;  %6199 = vst [vmem:[%s10592_s9 + $0x20] sm:$0xff] %v7949_v51 }
 0x59e   :  { %v7953_v34 = vpop.eup %7952  ;;  %6200 = vst [vmem:[%s10592_s9 + $0x28] sm:$0xff] %v7951_v52 }
 0x59f   :  { %v7955_v47 = vpop.eup %7954  ;;  %6206 = vst [vmem:[%s10592_s9 + $0x58] sm:$0xff] %v7953_v34 }
 0x5a0   :  { %6207 = vst [vmem:[%s10592_s9 + $0x60] sm:$0xff] %v7955_v47 }

</bundles_post_ra>
